<compile_context>
chip_gen: v5e
topology: v5e:2x2
jax: 0.10.0
libtpu: 0.0.40
codegen_flags: <defaults>
</compile_context>

<pallas_src>
import functools

import jax
import jax.numpy as jnp
import numpy as np
from jax.experimental import pallas as pl
from jax.experimental.pallas import tpu as pltpu


# ----------------------------- fused Pallas kernel ---------------------------

def _lenet53_kernel(x_ref, w1_ref, b1_ref, p1h_ref, p1w_ref,
                    w2_ref, b2_ref, p2h_ref, p2w_ref,
                    w3_ref, b3_ref, wf1_ref, bf1_ref, wf2_ref, bf2_ref,
                    out_ref, p1_s, p2_s, *, dims):
    """One image per grid step.  Activations in [H, W*C] interleaved layout."""
    K = dims["K"]
    C1, C2, C3 = dims["C1"], dims["C2"], dims["C3"]
    Ho1, Wo1 = dims["Ho1"], dims["Wo1"]
    Ho2, Wo2 = dims["Ho2"], dims["Wo2"]
    dot = functools.partial(jnp.dot, preferred_element_type=jnp.float32)

    # ---- conv1 (Cin=1) + tanh: K*K shifted matmuls vs block-diag weights ----
    acc1 = jnp.zeros((Ho1, Wo1 * C1), jnp.float32)
    for ki in range(K):
        for kj in range(K):
            xs = x_ref[0, 0, ki:ki + Ho1, kj:kj + Wo1]          # [Ho1, Wo1]
            acc1 = acc1 + dot(xs, w1_ref[ki * K + kj])          # [Ho1, Wo1*C1]
    h1 = jnp.tanh(acc1 + b1_ref[...])

    # ---- avgpool 2x2 as two matmuls; stage result in VMEM scratch ----
    p1_s[...] = dot(dot(p1h_ref[...], h1), p1w_ref[...])        # [Hp1, Wp1*C1]

    # ---- conv2 + tanh ----
    acc2 = jnp.zeros((Ho2, Wo2 * C2), jnp.float32)
    for ki in range(K):
        for kj in range(K):
            xs = p1_s[ki:ki + Ho2, kj * C1:(kj + Wo2) * C1]     # [Ho2, Wo2*C1]
            acc2 = acc2 + dot(xs, w2_ref[ki * K + kj])          # [Ho2, Wo2*C2]
    h2 = jnp.tanh(acc2 + b2_ref[...])

    # ---- avgpool 2x2 ----
    p2_s[...] = dot(dot(p2h_ref[...], h2), p2w_ref[...])        # [Hp2, Wp2*C2]

    # ---- conv3 + tanh (5x5 input, 5x5 kernel -> full contraction, [1,120]) --
    acc3 = jnp.zeros((1, C3), jnp.float32)
    for ki in range(K):
        acc3 = acc3 + dot(p2_s[ki:ki + 1, :], w3_ref[ki])       # [1, C3]
    h3 = jnp.tanh(acc3 + b3_ref[...])

    # ---- classifier: fc1 + tanh, fc2 + log_softmax ----
    h4 = jnp.tanh(dot(h3, wf1_ref[...]) + bf1_ref[...])         # [1, 84]
    logits = dot(h4, wf2_ref[...]) + bf2_ref[...]               # [1, num_classes]
    m = jnp.max(logits, axis=-1, keepdims=True)
    z = logits - m
    lse = jnp.log(jnp.sum(jnp.exp(z), axis=-1, keepdims=True))
    out_ref[0] = (z - lse).astype(out_ref.dtype)


# ------------------------- one-time parameter packing ------------------------

def pack_params(params, in_hw, padding=0):
    """Pack PyTorch-layout weights into matmul-friendly slabs (host-side, once)."""
    H, W = in_hw
    K = 5
    C1, C2, C3 = 6, 16, 120
    H0, W0 = H + 2 * padding, W + 2 * padding
    Ho1, Wo1 = H0 - K + 1, W0 - K + 1
    assert Ho1 % 2 == 0 and Wo1 % 2 == 0
    Hp1, Wp1 = Ho1 // 2, Wo1 // 2
    Ho2, Wo2 = Hp1 - K + 1, Wp1 - K + 1
    assert Ho2 % 2 == 0 and Wo2 % 2 == 0
    Hp2, Wp2 = Ho2 // 2, Wo2 // 2
    assert Hp2 - K + 1 == 1 and Wp2 - K + 1 == 1, "classifier expects 120-dim flatten"

    def block_diag_conv(w, Wo):
        # w: [Cout, Cin, K, K] -> [K*K, Wo*Cin, Wo*Cout] block-diagonal slabs.
        cout, cin = w.shape[0], w.shape[1]
        base = jnp.transpose(w, (2, 3, 1, 0)).reshape(K * K, cin, cout)
        eye = jnp.eye(Wo, dtype=w.dtype)
        bd = jnp.einsum("jJ,tio->tjiJo", eye, base)
        return bd.reshape(K * K, Wo * cin, Wo * cout)

    def pool_h(Ho):       # left matrix: averages row pairs
        return 0.5 * jnp.repeat(jnp.eye(Ho // 2, dtype=jnp.float32), 2, axis=1)

    def pool_w(Wo, C):    # right matrix: averages column pairs, channel-preserving
        p = 0.5 * jnp.repeat(jnp.eye(Wo // 2, dtype=jnp.float32), 2, axis=0)
        return jnp.kron(p, jnp.eye(C, dtype=jnp.float32))

    w3 = params["conv3_w"]                                       # [120,16,5,5]
    w3stk = jnp.transpose(w3, (2, 3, 1, 0)).reshape(K, K * C2, C3)

    packed = dict(
        w1=block_diag_conv(params["conv1_w"], Wo1),
        b1=jnp.tile(params["conv1_b"], Wo1).reshape(1, Wo1 * C1),
        p1h=pool_h(Ho1), p1w=pool_w(Wo1, C1),
        w2=block_diag_conv(params["conv2_w"], Wo2),
        b2=jnp.tile(params["conv2_b"], Wo2).reshape(1, Wo2 * C2),
        p2h=pool_h(Ho2), p2w=pool_w(Wo2, C2),
        w3=w3stk, b3=params["conv3_b"].reshape(1, C3),
        wf1=params["fc1_w"], bf1=params["fc1_b"].reshape(1, -1),
        wf2=params["fc2_w"], bf2=params["fc2_b"].reshape(1, -1),
    )
    dims = dict(K=K, C1=C1, C2=C2, C3=C3, H0=H0, W0=W0,
                Ho1=Ho1, Wo1=Wo1, Hp1=Hp1, Wp1=Wp1,
                Ho2=Ho2, Wo2=Wo2, Hp2=Hp2, Wp2=Wp2, padding=padding)
    return packed, dims


# -------------------------------- forward ------------------------------------

def lenet53_forward(packed, x, *, dims):
    pad = dims["padding"]
    if pad:
        x = jnp.pad(x, ((0, 0), (0, 0), (pad, pad), (pad, pad)))
    N = x.shape[0]
    H0, W0 = dims["H0"], dims["W0"]
    num_classes = packed["wf2"].shape[1]

    weight_order = ("w1", "b1", "p1h", "p1w", "w2", "b2", "p2h", "p2w",
                    "w3", "b3", "wf1", "bf1", "wf2", "bf2")
    weights = [packed[k] for k in weight_order]

    def const_map(ndim):
        return lambda n: (0,) * ndim

    in_specs = [pl.BlockSpec((1, 1, H0, W0), lambda n: (n, 0, 0, 0))]
    in_specs += [pl.BlockSpec(w.shape, const_map(w.ndim)) for w in weights]

    out = pl.pallas_call(
        functools.partial(_lenet53_kernel, dims=dims),
        out_shape=jax.ShapeDtypeStruct((N, 1, num_classes), jnp.float32),
        grid=(N,),
        in_specs=in_specs,
        out_specs=pl.BlockSpec((1, 1, num_classes), lambda n: (n, 0, 0)),
        scratch_shapes=[
            pltpu.VMEM((dims["Hp1"], dims["Wp1"] * dims["C1"]), jnp.float32),
            pltpu.VMEM((dims["Hp2"], dims["Wp2"] * dims["C2"]), jnp.float32),
        ],
        compiler_params=pltpu.CompilerParams(
            dimension_semantics=("parallel",),
            vmem_limit_bytes=32 * 1024 * 1024,
        ),
    )(x, *weights)
    return out[:, 0, :]


# ------------------------------ init & reference -----------------------------

def init_params(key, num_classes=10):
    ks = jax.random.split(key, 10)

    def u(k, shape, fan_in):
        bound = 1.0 / np.sqrt(fan_in)
        return jax.random.uniform(k, shape, jnp.float32, -bound, bound)

    return {
        "conv1_w": u(ks[0], (6, 1, 5, 5), 1 * 25),
        "conv1_b": u(ks[1], (6,), 1 * 25),
        "conv2_w": u(ks[2], (16, 6, 5, 5), 6 * 25),
        "conv2_b": u(ks[3], (16,), 6 * 25),
        "conv3_w": u(ks[4], (120, 16, 5, 5), 16 * 25),
        "conv3_b": u(ks[5], (120,), 16 * 25),
        # fc weights stored as [in, out] (transposed vs torch's [out, in])
        "fc1_w": u(ks[6], (120, 84), 120),
        "fc1_b": u(ks[7], (84,), 120),
        "fc2_w": u(ks[8], (84, num_classes), 84),
        "fc2_b": u(ks[9], (num_classes,), 84),
    }


def ref_forward(params, x, padding):
    def conv(x, w, b, pad):
        y = jax.lax.conv_general_dilated(
            x, w, (1, 1), [(pad, pad), (pad, pad)],
            dimension_numbers=("NCHW", "OIHW", "NCHW"))
        return jnp.tanh(y + b[None, :, None, None])

    def pool(x):
        n, c, h, w = x.shape
        return x.reshape(n, c, h // 2, 2, w // 2, 2).mean(axis=(3, 5))

    o = conv(x, params["conv1_w"], params["conv1_b"], padding)
    o = pool(o)
    o = conv(o, params["conv2_w"], params["conv2_b"], 0)
    o = pool(o)
    o = conv(o, params["conv3_w"], params["conv3_b"], 0)
    o = o.reshape(o.shape[0], -1)
    o = jnp.tanh(o @ params["fc1_w"] + params["fc1_b"])
    o = o @ params["fc2_w"] + params["fc2_b"]
    return jax.nn.log_softmax(o, axis=-1)


# ---------------------------------- main -------------------------------------

if __name__ == "__main__":
    key = jax.random.PRNGKey(0)
    k_params, k_x = jax.random.split(key)

    num_classes = 10
    padding = 0
    params = init_params(k_params, num_classes=num_classes)

    # 32x32 input with padding=0 gives the 1x1x120 feature map that fc1 expects.
    x = jax.random.normal(k_x, (2, 1, 32, 32), dtype=jnp.float32)

    packed, dims = pack_params(params, (32, 32), padding=padding)
    fwd = jax.jit(functools.partial(lenet53_forward, dims=dims))

    out = jax.block_until_ready(fwd(packed, x))
    ref = jax.block_until_ready(ref_forward(params, x, padding))

    assert out.shape == (2, num_classes)
    assert np.allclose(np.asarray(out), np.asarray(ref), atol=2e-3, rtol=2e-3)

    print("KERNEL_OK")
</pallas_src>

<mosaic_0001>
module attributes {stable_mosaic.version = 11 : i64} {
  func.func @_lenet53_kernel(%arg0: i32, %arg1: memref<1x1x32x32xf32, #tpu.memory_space<vmem>>, %arg2: memref<25x28x168xf32, #tpu.memory_space<vmem>>, %arg3: memref<1x168xf32, #tpu.memory_space<vmem>>, %arg4: memref<14x28xf32, #tpu.memory_space<vmem>>, %arg5: memref<168x84xf32, #tpu.memory_space<vmem>>, %arg6: memref<25x60x160xf32, #tpu.memory_space<vmem>>, %arg7: memref<1x160xf32, #tpu.memory_space<vmem>>, %arg8: memref<5x10xf32, #tpu.memory_space<vmem>>, %arg9: memref<160x80xf32, #tpu.memory_space<vmem>>, %arg10: memref<5x80x120xf32, #tpu.memory_space<vmem>>, %arg11: memref<1x120xf32, #tpu.memory_space<vmem>>, %arg12: memref<120x84xf32, #tpu.memory_space<vmem>>, %arg13: memref<1x84xf32, #tpu.memory_space<vmem>>, %arg14: memref<84x10xf32, #tpu.memory_space<vmem>>, %arg15: memref<1x10xf32, #tpu.memory_space<vmem>>, %arg16: memref<1x1x10xf32, #tpu.memory_space<vmem>>, %arg17: memref<14x84xf32, #tpu.memory_space<vmem>>, %arg18: memref<5x80xf32, #tpu.memory_space<vmem>>) attributes {dimension_semantics = [#tpu.dimension_semantics<parallel>], iteration_bounds = array<i64: 2>, scalar_prefetch = 0 : i64, scratch_operands = 2 : i64, tpu.core_type = #tpu.core_type<tc>, window_params = [{transform_indices = @transform_0, window_bounds = array<i64: 1, 1, 32, 32>}, {pipeline_mode = #tpu.pipeline_mode<synchronous>, transform_indices = @transform_1, window_bounds = array<i64: 25, 28, 168>}, {pipeline_mode = #tpu.pipeline_mode<synchronous>, transform_indices = @transform_2, window_bounds = array<i64: 1, 168>}, {pipeline_mode = #tpu.pipeline_mode<synchronous>, transform_indices = @transform_3, window_bounds = array<i64: 14, 28>}, {pipeline_mode = #tpu.pipeline_mode<synchronous>, transform_indices = @transform_4, window_bounds = array<i64: 168, 84>}, {pipeline_mode = #tpu.pipeline_mode<synchronous>, transform_indices = @transform_5, window_bounds = array<i64: 25, 60, 160>}, {pipeline_mode = #tpu.pipeline_mode<synchronous>, transform_indices = @transform_6, window_bounds = array<i64: 1, 160>}, {pipeline_mode = #tpu.pipeline_mode<synchronous>, transform_indices = @transform_7, window_bounds = array<i64: 5, 10>}, {pipeline_mode = #tpu.pipeline_mode<synchronous>, transform_indices = @transform_8, window_bounds = array<i64: 160, 80>}, {pipeline_mode = #tpu.pipeline_mode<synchronous>, transform_indices = @transform_9, window_bounds = array<i64: 5, 80, 120>}, {pipeline_mode = #tpu.pipeline_mode<synchronous>, transform_indices = @transform_10, window_bounds = array<i64: 1, 120>}, {pipeline_mode = #tpu.pipeline_mode<synchronous>, transform_indices = @transform_11, window_bounds = array<i64: 120, 84>}, {pipeline_mode = #tpu.pipeline_mode<synchronous>, transform_indices = @transform_12, window_bounds = array<i64: 1, 84>}, {pipeline_mode = #tpu.pipeline_mode<synchronous>, transform_indices = @transform_13, window_bounds = array<i64: 84, 10>}, {pipeline_mode = #tpu.pipeline_mode<synchronous>, transform_indices = @transform_14, window_bounds = array<i64: 1, 10>}, {transform_indices = @transform_15, window_bounds = array<i64: 1, 1, 10>}]} {
    %cst = arith.constant 0.000000e+00 : f32
    %0 = vector.broadcast %cst : f32 to vector<28x168xf32>
    %c0 = arith.constant 0 : index
    %c0_0 = arith.constant 0 : index
    %c0_1 = arith.constant 0 : index
    %c0_2 = arith.constant 0 : index
    %1 = vector.load %arg1[%c0, %c0_0, %c0_1, %c0_2] : memref<1x1x32x32xf32, #tpu.memory_space<vmem>>, vector<1x1x28x28xf32>
    %2 = vector.shape_cast %1 : vector<1x1x28x28xf32> to vector<28x28xf32>
    %c0_3 = arith.constant 0 : index
    %c0_4 = arith.constant 0 : index
    %c0_5 = arith.constant 0 : index
    %3 = vector.load %arg2[%c0_3, %c0_4, %c0_5] : memref<25x28x168xf32, #tpu.memory_space<vmem>>, vector<1x28x168xf32>
    %4 = vector.shape_cast %3 : vector<1x28x168xf32> to vector<28x168xf32>
    %cst_6 = arith.constant dense<0.000000e+00> : vector<28x168xf32>
    %5 = tpu.matmul %2, %4, %cst_6 {dimension_numbers = #tpu.dot_dimension_numbers<[1], [0], [0], [1], [0, 0, 1, 1], [], []>} : vector<28x28xf32>, vector<28x168xf32>, vector<28x168xf32> -> vector<28x168xf32>
    %6 = arith.addf %0, %5 : vector<28x168xf32>
    %c0_7 = arith.constant 0 : index
    %c0_8 = arith.constant 0 : index
    %c0_9 = arith.constant 0 : index
    %c1 = arith.constant 1 : index
    %7 = vector.load %arg1[%c0_7, %c0_8, %c0_9, %c1] : memref<1x1x32x32xf32, #tpu.memory_space<vmem>>, vector<1x1x28x28xf32>
    %8 = vector.shape_cast %7 : vector<1x1x28x28xf32> to vector<28x28xf32>
    %c1_10 = arith.constant 1 : index
    %c0_11 = arith.constant 0 : index
    %c0_12 = arith.constant 0 : index
    %9 = vector.load %arg2[%c1_10, %c0_11, %c0_12] : memref<25x28x168xf32, #tpu.memory_space<vmem>>, vector<1x28x168xf32>
    %10 = vector.shape_cast %9 : vector<1x28x168xf32> to vector<28x168xf32>
    %cst_13 = arith.constant dense<0.000000e+00> : vector<28x168xf32>
    %11 = tpu.matmul %8, %10, %cst_13 {dimension_numbers = #tpu.dot_dimension_numbers<[1], [0], [0], [1], [0, 0, 1, 1], [], []>} : vector<28x28xf32>, vector<28x168xf32>, vector<28x168xf32> -> vector<28x168xf32>
    %12 = arith.addf %6, %11 : vector<28x168xf32>
    %c0_14 = arith.constant 0 : index
    %c0_15 = arith.constant 0 : index
    %c0_16 = arith.constant 0 : index
    %c2 = arith.constant 2 : index
    %13 = vector.load %arg1[%c0_14, %c0_15, %c0_16, %c2] : memref<1x1x32x32xf32, #tpu.memory_space<vmem>>, vector<1x1x28x28xf32>
    %14 = vector.shape_cast %13 : vector<1x1x28x28xf32> to vector<28x28xf32>
    %c2_17 = arith.constant 2 : index
    %c0_18 = arith.constant 0 : index
    %c0_19 = arith.constant 0 : index
    %15 = vector.load %arg2[%c2_17, %c0_18, %c0_19] : memref<25x28x168xf32, #tpu.memory_space<vmem>>, vector<1x28x168xf32>
    %16 = vector.shape_cast %15 : vector<1x28x168xf32> to vector<28x168xf32>
    %cst_20 = arith.constant dense<0.000000e+00> : vector<28x168xf32>
    %17 = tpu.matmul %14, %16, %cst_20 {dimension_numbers = #tpu.dot_dimension_numbers<[1], [0], [0], [1], [0, 0, 1, 1], [], []>} : vector<28x28xf32>, vector<28x168xf32>, vector<28x168xf32> -> vector<28x168xf32>
    %18 = arith.addf %12, %17 : vector<28x168xf32>
    %c0_21 = arith.constant 0 : index
    %c0_22 = arith.constant 0 : index
    %c0_23 = arith.constant 0 : index
    %c3 = arith.constant 3 : index
    %19 = vector.load %arg1[%c0_21, %c0_22, %c0_23, %c3] : memref<1x1x32x32xf32, #tpu.memory_space<vmem>>, vector<1x1x28x28xf32>
    %20 = vector.shape_cast %19 : vector<1x1x28x28xf32> to vector<28x28xf32>
    %c3_24 = arith.constant 3 : index
    %c0_25 = arith.constant 0 : index
    %c0_26 = arith.constant 0 : index
    %21 = vector.load %arg2[%c3_24, %c0_25, %c0_26] : memref<25x28x168xf32, #tpu.memory_space<vmem>>, vector<1x28x168xf32>
    %22 = vector.shape_cast %21 : vector<1x28x168xf32> to vector<28x168xf32>
    %cst_27 = arith.constant dense<0.000000e+00> : vector<28x168xf32>
    %23 = tpu.matmul %20, %22, %cst_27 {dimension_numbers = #tpu.dot_dimension_numbers<[1], [0], [0], [1], [0, 0, 1, 1], [], []>} : vector<28x28xf32>, vector<28x168xf32>, vector<28x168xf32> -> vector<28x168xf32>
    %24 = arith.addf %18, %23 : vector<28x168xf32>
    %c0_28 = arith.constant 0 : index
    %c0_29 = arith.constant 0 : index
    %c0_30 = arith.constant 0 : index
    %c4 = arith.constant 4 : index
    %25 = vector.load %arg1[%c0_28, %c0_29, %c0_30, %c4] : memref<1x1x32x32xf32, #tpu.memory_space<vmem>>, vector<1x1x28x28xf32>
    %26 = vector.shape_cast %25 : vector<1x1x28x28xf32> to vector<28x28xf32>
    %c4_31 = arith.constant 4 : index
    %c0_32 = arith.constant 0 : index
    %c0_33 = arith.constant 0 : index
    %27 = vector.load %arg2[%c4_31, %c0_32, %c0_33] : memref<25x28x168xf32, #tpu.memory_space<vmem>>, vector<1x28x168xf32>
    %28 = vector.shape_cast %27 : vector<1x28x168xf32> to vector<28x168xf32>
    %cst_34 = arith.constant dense<0.000000e+00> : vector<28x168xf32>
    %29 = tpu.matmul %26, %28, %cst_34 {dimension_numbers = #tpu.dot_dimension_numbers<[1], [0], [0], [1], [0, 0, 1, 1], [], []>} : vector<28x28xf32>, vector<28x168xf32>, vector<28x168xf32> -> vector<28x168xf32>
    %30 = arith.addf %24, %29 : vector<28x168xf32>
    %c0_35 = arith.constant 0 : index
    %c0_36 = arith.constant 0 : index
    %c1_37 = arith.constant 1 : index
    %c0_38 = arith.constant 0 : index
    %31 = vector.load %arg1[%c0_35, %c0_36, %c1_37, %c0_38] : memref<1x1x32x32xf32, #tpu.memory_space<vmem>>, vector<1x1x28x28xf32>
    %32 = vector.shape_cast %31 : vector<1x1x28x28xf32> to vector<28x28xf32>
    %c5 = arith.constant 5 : index
    %c0_39 = arith.constant 0 : index
    %c0_40 = arith.constant 0 : index
    %33 = vector.load %arg2[%c5, %c0_39, %c0_40] : memref<25x28x168xf32, #tpu.memory_space<vmem>>, vector<1x28x168xf32>
    %34 = vector.shape_cast %33 : vector<1x28x168xf32> to vector<28x168xf32>
    %cst_41 = arith.constant dense<0.000000e+00> : vector<28x168xf32>
    %35 = tpu.matmul %32, %34, %cst_41 {dimension_numbers = #tpu.dot_dimension_numbers<[1], [0], [0], [1], [0, 0, 1, 1], [], []>} : vector<28x28xf32>, vector<28x168xf32>, vector<28x168xf32> -> vector<28x168xf32>
    %36 = arith.addf %30, %35 : vector<28x168xf32>
    %c0_42 = arith.constant 0 : index
    %c0_43 = arith.constant 0 : index
    %c1_44 = arith.constant 1 : index
    %c1_45 = arith.constant 1 : index
    %37 = vector.load %arg1[%c0_42, %c0_43, %c1_44, %c1_45] : memref<1x1x32x32xf32, #tpu.memory_space<vmem>>, vector<1x1x28x28xf32>
    %38 = vector.shape_cast %37 : vector<1x1x28x28xf32> to vector<28x28xf32>
    %c6 = arith.constant 6 : index
    %c0_46 = arith.constant 0 : index
    %c0_47 = arith.constant 0 : index
    %39 = vector.load %arg2[%c6, %c0_46, %c0_47] : memref<25x28x168xf32, #tpu.memory_space<vmem>>, vector<1x28x168xf32>
    %40 = vector.shape_cast %39 : vector<1x28x168xf32> to vector<28x168xf32>
    %cst_48 = arith.constant dense<0.000000e+00> : vector<28x168xf32>
    %41 = tpu.matmul %38, %40, %cst_48 {dimension_numbers = #tpu.dot_dimension_numbers<[1], [0], [0], [1], [0, 0, 1, 1], [], []>} : vector<28x28xf32>, vector<28x168xf32>, vector<28x168xf32> -> vector<28x168xf32>
    %42 = arith.addf %36, %41 : vector<28x168xf32>
    %c0_49 = arith.constant 0 : index
    %c0_50 = arith.constant 0 : index
    %c1_51 = arith.constant 1 : index
    %c2_52 = arith.constant 2 : index
    %43 = vector.load %arg1[%c0_49, %c0_50, %c1_51, %c2_52] : memref<1x1x32x32xf32, #tpu.memory_space<vmem>>, vector<1x1x28x28xf32>
    %44 = vector.shape_cast %43 : vector<1x1x28x28xf32> to vector<28x28xf32>
    %c7 = arith.constant 7 : index
    %c0_53 = arith.constant 0 : index
    %c0_54 = arith.constant 0 : index
    %45 = vector.load %arg2[%c7, %c0_53, %c0_54] : memref<25x28x168xf32, #tpu.memory_space<vmem>>, vector<1x28x168xf32>
    %46 = vector.shape_cast %45 : vector<1x28x168xf32> to vector<28x168xf32>
    %cst_55 = arith.constant dense<0.000000e+00> : vector<28x168xf32>
    %47 = tpu.matmul %44, %46, %cst_55 {dimension_numbers = #tpu.dot_dimension_numbers<[1], [0], [0], [1], [0, 0, 1, 1], [], []>} : vector<28x28xf32>, vector<28x168xf32>, vector<28x168xf32> -> vector<28x168xf32>
    %48 = arith.addf %42, %47 : vector<28x168xf32>
    %c0_56 = arith.constant 0 : index
    %c0_57 = arith.constant 0 : index
    %c1_58 = arith.constant 1 : index
    %c3_59 = arith.constant 3 : index
    %49 = vector.load %arg1[%c0_56, %c0_57, %c1_58, %c3_59] : memref<1x1x32x32xf32, #tpu.memory_space<vmem>>, vector<1x1x28x28xf32>
    %50 = vector.shape_cast %49 : vector<1x1x28x28xf32> to vector<28x28xf32>
    %c8 = arith.constant 8 : index
    %c0_60 = arith.constant 0 : index
    %c0_61 = arith.constant 0 : index
    %51 = vector.load %arg2[%c8, %c0_60, %c0_61] : memref<25x28x168xf32, #tpu.memory_space<vmem>>, vector<1x28x168xf32>
    %52 = vector.shape_cast %51 : vector<1x28x168xf32> to vector<28x168xf32>
    %cst_62 = arith.constant dense<0.000000e+00> : vector<28x168xf32>
    %53 = tpu.matmul %50, %52, %cst_62 {dimension_numbers = #tpu.dot_dimension_numbers<[1], [0], [0], [1], [0, 0, 1, 1], [], []>} : vector<28x28xf32>, vector<28x168xf32>, vector<28x168xf32> -> vector<28x168xf32>
    %54 = arith.addf %48, %53 : vector<28x168xf32>
    %c0_63 = arith.constant 0 : index
    %c0_64 = arith.constant 0 : index
    %c1_65 = arith.constant 1 : index
    %c4_66 = arith.constant 4 : index
    %55 = vector.load %arg1[%c0_63, %c0_64, %c1_65, %c4_66] : memref<1x1x32x32xf32, #tpu.memory_space<vmem>>, vector<1x1x28x28xf32>
    %56 = vector.shape_cast %55 : vector<1x1x28x28xf32> to vector<28x28xf32>
    %c9 = arith.constant 9 : index
    %c0_67 = arith.constant 0 : index
    %c0_68 = arith.constant 0 : index
    %57 = vector.load %arg2[%c9, %c0_67, %c0_68] : memref<25x28x168xf32, #tpu.memory_space<vmem>>, vector<1x28x168xf32>
    %58 = vector.shape_cast %57 : vector<1x28x168xf32> to vector<28x168xf32>
    %cst_69 = arith.constant dense<0.000000e+00> : vector<28x168xf32>
    %59 = tpu.matmul %56, %58, %cst_69 {dimension_numbers = #tpu.dot_dimension_numbers<[1], [0], [0], [1], [0, 0, 1, 1], [], []>} : vector<28x28xf32>, vector<28x168xf32>, vector<28x168xf32> -> vector<28x168xf32>
    %60 = arith.addf %54, %59 : vector<28x168xf32>
    %c0_70 = arith.constant 0 : index
    %c0_71 = arith.constant 0 : index
    %c2_72 = arith.constant 2 : index
    %c0_73 = arith.constant 0 : index
    %61 = vector.load %arg1[%c0_70, %c0_71, %c2_72, %c0_73] : memref<1x1x32x32xf32, #tpu.memory_space<vmem>>, vector<1x1x28x28xf32>
    %62 = vector.shape_cast %61 : vector<1x1x28x28xf32> to vector<28x28xf32>
    %c10 = arith.constant 10 : index
    %c0_74 = arith.constant 0 : index
    %c0_75 = arith.constant 0 : index
    %63 = vector.load %arg2[%c10, %c0_74, %c0_75] : memref<25x28x168xf32, #tpu.memory_space<vmem>>, vector<1x28x168xf32>
    %64 = vector.shape_cast %63 : vector<1x28x168xf32> to vector<28x168xf32>
    %cst_76 = arith.constant dense<0.000000e+00> : vector<28x168xf32>
    %65 = tpu.matmul %62, %64, %cst_76 {dimension_numbers = #tpu.dot_dimension_numbers<[1], [0], [0], [1], [0, 0, 1, 1], [], []>} : vector<28x28xf32>, vector<28x168xf32>, vector<28x168xf32> -> vector<28x168xf32>
    %66 = arith.addf %60, %65 : vector<28x168xf32>
    %c0_77 = arith.constant 0 : index
    %c0_78 = arith.constant 0 : index
    %c2_79 = arith.constant 2 : index
    %c1_80 = arith.constant 1 : index
    %67 = vector.load %arg1[%c0_77, %c0_78, %c2_79, %c1_80] : memref<1x1x32x32xf32, #tpu.memory_space<vmem>>, vector<1x1x28x28xf32>
    %68 = vector.shape_cast %67 : vector<1x1x28x28xf32> to vector<28x28xf32>
    %c11 = arith.constant 11 : index
    %c0_81 = arith.constant 0 : index
    %c0_82 = arith.constant 0 : index
    %69 = vector.load %arg2[%c11, %c0_81, %c0_82] : memref<25x28x168xf32, #tpu.memory_space<vmem>>, vector<1x28x168xf32>
    %70 = vector.shape_cast %69 : vector<1x28x168xf32> to vector<28x168xf32>
    %cst_83 = arith.constant dense<0.000000e+00> : vector<28x168xf32>
    %71 = tpu.matmul %68, %70, %cst_83 {dimension_numbers = #tpu.dot_dimension_numbers<[1], [0], [0], [1], [0, 0, 1, 1], [], []>} : vector<28x28xf32>, vector<28x168xf32>, vector<28x168xf32> -> vector<28x168xf32>
    %72 = arith.addf %66, %71 : vector<28x168xf32>
    %c0_84 = arith.constant 0 : index
    %c0_85 = arith.constant 0 : index
    %c2_86 = arith.constant 2 : index
    %c2_87 = arith.constant 2 : index
    %73 = vector.load %arg1[%c0_84, %c0_85, %c2_86, %c2_87] : memref<1x1x32x32xf32, #tpu.memory_space<vmem>>, vector<1x1x28x28xf32>
    %74 = vector.shape_cast %73 : vector<1x1x28x28xf32> to vector<28x28xf32>
    %c12 = arith.constant 12 : index
    %c0_88 = arith.constant 0 : index
    %c0_89 = arith.constant 0 : index
    %75 = vector.load %arg2[%c12, %c0_88, %c0_89] : memref<25x28x168xf32, #tpu.memory_space<vmem>>, vector<1x28x168xf32>
    %76 = vector.shape_cast %75 : vector<1x28x168xf32> to vector<28x168xf32>
    %cst_90 = arith.constant dense<0.000000e+00> : vector<28x168xf32>
    %77 = tpu.matmul %74, %76, %cst_90 {dimension_numbers = #tpu.dot_dimension_numbers<[1], [0], [0], [1], [0, 0, 1, 1], [], []>} : vector<28x28xf32>, vector<28x168xf32>, vector<28x168xf32> -> vector<28x168xf32>
    %78 = arith.addf %72, %77 : vector<28x168xf32>
    %c0_91 = arith.constant 0 : index
    %c0_92 = arith.constant 0 : index
    %c2_93 = arith.constant 2 : index
    %c3_94 = arith.constant 3 : index
    %79 = vector.load %arg1[%c0_91, %c0_92, %c2_93, %c3_94] : memref<1x1x32x32xf32, #tpu.memory_space<vmem>>, vector<1x1x28x28xf32>
    %80 = vector.shape_cast %79 : vector<1x1x28x28xf32> to vector<28x28xf32>
    %c13 = arith.constant 13 : index
    %c0_95 = arith.constant 0 : index
    %c0_96 = arith.constant 0 : index
    %81 = vector.load %arg2[%c13, %c0_95, %c0_96] : memref<25x28x168xf32, #tpu.memory_space<vmem>>, vector<1x28x168xf32>
    %82 = vector.shape_cast %81 : vector<1x28x168xf32> to vector<28x168xf32>
    %cst_97 = arith.constant dense<0.000000e+00> : vector<28x168xf32>
    %83 = tpu.matmul %80, %82, %cst_97 {dimension_numbers = #tpu.dot_dimension_numbers<[1], [0], [0], [1], [0, 0, 1, 1], [], []>} : vector<28x28xf32>, vector<28x168xf32>, vector<28x168xf32> -> vector<28x168xf32>
    %84 = arith.addf %78, %83 : vector<28x168xf32>
    %c0_98 = arith.constant 0 : index
    %c0_99 = arith.constant 0 : index
    %c2_100 = arith.constant 2 : index
    %c4_101 = arith.constant 4 : index
    %85 = vector.load %arg1[%c0_98, %c0_99, %c2_100, %c4_101] : memref<1x1x32x32xf32, #tpu.memory_space<vmem>>, vector<1x1x28x28xf32>
    %86 = vector.shape_cast %85 : vector<1x1x28x28xf32> to vector<28x28xf32>
    %c14 = arith.constant 14 : index
    %c0_102 = arith.constant 0 : index
    %c0_103 = arith.constant 0 : index
    %87 = vector.load %arg2[%c14, %c0_102, %c0_103] : memref<25x28x168xf32, #tpu.memory_space<vmem>>, vector<1x28x168xf32>
    %88 = vector.shape_cast %87 : vector<1x28x168xf32> to vector<28x168xf32>
    %cst_104 = arith.constant dense<0.000000e+00> : vector<28x168xf32>
    %89 = tpu.matmul %86, %88, %cst_104 {dimension_numbers = #tpu.dot_dimension_numbers<[1], [0], [0], [1], [0, 0, 1, 1], [], []>} : vector<28x28xf32>, vector<28x168xf32>, vector<28x168xf32> -> vector<28x168xf32>
    %90 = arith.addf %84, %89 : vector<28x168xf32>
    %c0_105 = arith.constant 0 : index
    %c0_106 = arith.constant 0 : index
    %c3_107 = arith.constant 3 : index
    %c0_108 = arith.constant 0 : index
    %91 = vector.load %arg1[%c0_105, %c0_106, %c3_107, %c0_108] : memref<1x1x32x32xf32, #tpu.memory_space<vmem>>, vector<1x1x28x28xf32>
    %92 = vector.shape_cast %91 : vector<1x1x28x28xf32> to vector<28x28xf32>
    %c15 = arith.constant 15 : index
    %c0_109 = arith.constant 0 : index
    %c0_110 = arith.constant 0 : index
    %93 = vector.load %arg2[%c15, %c0_109, %c0_110] : memref<25x28x168xf32, #tpu.memory_space<vmem>>, vector<1x28x168xf32>
    %94 = vector.shape_cast %93 : vector<1x28x168xf32> to vector<28x168xf32>
    %cst_111 = arith.constant dense<0.000000e+00> : vector<28x168xf32>
    %95 = tpu.matmul %92, %94, %cst_111 {dimension_numbers = #tpu.dot_dimension_numbers<[1], [0], [0], [1], [0, 0, 1, 1], [], []>} : vector<28x28xf32>, vector<28x168xf32>, vector<28x168xf32> -> vector<28x168xf32>
    %96 = arith.addf %90, %95 : vector<28x168xf32>
    %c0_112 = arith.constant 0 : index
    %c0_113 = arith.constant 0 : index
    %c3_114 = arith.constant 3 : index
    %c1_115 = arith.constant 1 : index
    %97 = vector.load %arg1[%c0_112, %c0_113, %c3_114, %c1_115] : memref<1x1x32x32xf32, #tpu.memory_space<vmem>>, vector<1x1x28x28xf32>
    %98 = vector.shape_cast %97 : vector<1x1x28x28xf32> to vector<28x28xf32>
    %c16 = arith.constant 16 : index
    %c0_116 = arith.constant 0 : index
    %c0_117 = arith.constant 0 : index
    %99 = vector.load %arg2[%c16, %c0_116, %c0_117] : memref<25x28x168xf32, #tpu.memory_space<vmem>>, vector<1x28x168xf32>
    %100 = vector.shape_cast %99 : vector<1x28x168xf32> to vector<28x168xf32>
    %cst_118 = arith.constant dense<0.000000e+00> : vector<28x168xf32>
    %101 = tpu.matmul %98, %100, %cst_118 {dimension_numbers = #tpu.dot_dimension_numbers<[1], [0], [0], [1], [0, 0, 1, 1], [], []>} : vector<28x28xf32>, vector<28x168xf32>, vector<28x168xf32> -> vector<28x168xf32>
    %102 = arith.addf %96, %101 : vector<28x168xf32>
    %c0_119 = arith.constant 0 : index
    %c0_120 = arith.constant 0 : index
    %c3_121 = arith.constant 3 : index
    %c2_122 = arith.constant 2 : index
    %103 = vector.load %arg1[%c0_119, %c0_120, %c3_121, %c2_122] : memref<1x1x32x32xf32, #tpu.memory_space<vmem>>, vector<1x1x28x28xf32>
    %104 = vector.shape_cast %103 : vector<1x1x28x28xf32> to vector<28x28xf32>
    %c17 = arith.constant 17 : index
    %c0_123 = arith.constant 0 : index
    %c0_124 = arith.constant 0 : index
    %105 = vector.load %arg2[%c17, %c0_123, %c0_124] : memref<25x28x168xf32, #tpu.memory_space<vmem>>, vector<1x28x168xf32>
    %106 = vector.shape_cast %105 : vector<1x28x168xf32> to vector<28x168xf32>
    %cst_125 = arith.constant dense<0.000000e+00> : vector<28x168xf32>
    %107 = tpu.matmul %104, %106, %cst_125 {dimension_numbers = #tpu.dot_dimension_numbers<[1], [0], [0], [1], [0, 0, 1, 1], [], []>} : vector<28x28xf32>, vector<28x168xf32>, vector<28x168xf32> -> vector<28x168xf32>
    %108 = arith.addf %102, %107 : vector<28x168xf32>
    %c0_126 = arith.constant 0 : index
    %c0_127 = arith.constant 0 : index
    %c3_128 = arith.constant 3 : index
    %c3_129 = arith.constant 3 : index
    %109 = vector.load %arg1[%c0_126, %c0_127, %c3_128, %c3_129] : memref<1x1x32x32xf32, #tpu.memory_space<vmem>>, vector<1x1x28x28xf32>
    %110 = vector.shape_cast %109 : vector<1x1x28x28xf32> to vector<28x28xf32>
    %c18 = arith.constant 18 : index
    %c0_130 = arith.constant 0 : index
    %c0_131 = arith.constant 0 : index
    %111 = vector.load %arg2[%c18, %c0_130, %c0_131] : memref<25x28x168xf32, #tpu.memory_space<vmem>>, vector<1x28x168xf32>
    %112 = vector.shape_cast %111 : vector<1x28x168xf32> to vector<28x168xf32>
    %cst_132 = arith.constant dense<0.000000e+00> : vector<28x168xf32>
    %113 = tpu.matmul %110, %112, %cst_132 {dimension_numbers = #tpu.dot_dimension_numbers<[1], [0], [0], [1], [0, 0, 1, 1], [], []>} : vector<28x28xf32>, vector<28x168xf32>, vector<28x168xf32> -> vector<28x168xf32>
    %114 = arith.addf %108, %113 : vector<28x168xf32>
    %c0_133 = arith.constant 0 : index
    %c0_134 = arith.constant 0 : index
    %c3_135 = arith.constant 3 : index
    %c4_136 = arith.constant 4 : index
    %115 = vector.load %arg1[%c0_133, %c0_134, %c3_135, %c4_136] : memref<1x1x32x32xf32, #tpu.memory_space<vmem>>, vector<1x1x28x28xf32>
    %116 = vector.shape_cast %115 : vector<1x1x28x28xf32> to vector<28x28xf32>
    %c19 = arith.constant 19 : index
    %c0_137 = arith.constant 0 : index
    %c0_138 = arith.constant 0 : index
    %117 = vector.load %arg2[%c19, %c0_137, %c0_138] : memref<25x28x168xf32, #tpu.memory_space<vmem>>, vector<1x28x168xf32>
    %118 = vector.shape_cast %117 : vector<1x28x168xf32> to vector<28x168xf32>
    %cst_139 = arith.constant dense<0.000000e+00> : vector<28x168xf32>
    %119 = tpu.matmul %116, %118, %cst_139 {dimension_numbers = #tpu.dot_dimension_numbers<[1], [0], [0], [1], [0, 0, 1, 1], [], []>} : vector<28x28xf32>, vector<28x168xf32>, vector<28x168xf32> -> vector<28x168xf32>
    %120 = arith.addf %114, %119 : vector<28x168xf32>
    %c0_140 = arith.constant 0 : index
    %c0_141 = arith.constant 0 : index
    %c4_142 = arith.constant 4 : index
    %c0_143 = arith.constant 0 : index
    %121 = vector.load %arg1[%c0_140, %c0_141, %c4_142, %c0_143] : memref<1x1x32x32xf32, #tpu.memory_space<vmem>>, vector<1x1x28x28xf32>
    %122 = vector.shape_cast %121 : vector<1x1x28x28xf32> to vector<28x28xf32>
    %c20 = arith.constant 20 : index
    %c0_144 = arith.constant 0 : index
    %c0_145 = arith.constant 0 : index
    %123 = vector.load %arg2[%c20, %c0_144, %c0_145] : memref<25x28x168xf32, #tpu.memory_space<vmem>>, vector<1x28x168xf32>
    %124 = vector.shape_cast %123 : vector<1x28x168xf32> to vector<28x168xf32>
    %cst_146 = arith.constant dense<0.000000e+00> : vector<28x168xf32>
    %125 = tpu.matmul %122, %124, %cst_146 {dimension_numbers = #tpu.dot_dimension_numbers<[1], [0], [0], [1], [0, 0, 1, 1], [], []>} : vector<28x28xf32>, vector<28x168xf32>, vector<28x168xf32> -> vector<28x168xf32>
    %126 = arith.addf %120, %125 : vector<28x168xf32>
    %c0_147 = arith.constant 0 : index
    %c0_148 = arith.constant 0 : index
    %c4_149 = arith.constant 4 : index
    %c1_150 = arith.constant 1 : index
    %127 = vector.load %arg1[%c0_147, %c0_148, %c4_149, %c1_150] : memref<1x1x32x32xf32, #tpu.memory_space<vmem>>, vector<1x1x28x28xf32>
    %128 = vector.shape_cast %127 : vector<1x1x28x28xf32> to vector<28x28xf32>
    %c21 = arith.constant 21 : index
    %c0_151 = arith.constant 0 : index
    %c0_152 = arith.constant 0 : index
    %129 = vector.load %arg2[%c21, %c0_151, %c0_152] : memref<25x28x168xf32, #tpu.memory_space<vmem>>, vector<1x28x168xf32>
    %130 = vector.shape_cast %129 : vector<1x28x168xf32> to vector<28x168xf32>
    %cst_153 = arith.constant dense<0.000000e+00> : vector<28x168xf32>
    %131 = tpu.matmul %128, %130, %cst_153 {dimension_numbers = #tpu.dot_dimension_numbers<[1], [0], [0], [1], [0, 0, 1, 1], [], []>} : vector<28x28xf32>, vector<28x168xf32>, vector<28x168xf32> -> vector<28x168xf32>
    %132 = arith.addf %126, %131 : vector<28x168xf32>
    %c0_154 = arith.constant 0 : index
    %c0_155 = arith.constant 0 : index
    %c4_156 = arith.constant 4 : index
    %c2_157 = arith.constant 2 : index
    %133 = vector.load %arg1[%c0_154, %c0_155, %c4_156, %c2_157] : memref<1x1x32x32xf32, #tpu.memory_space<vmem>>, vector<1x1x28x28xf32>
    %134 = vector.shape_cast %133 : vector<1x1x28x28xf32> to vector<28x28xf32>
    %c22 = arith.constant 22 : index
    %c0_158 = arith.constant 0 : index
    %c0_159 = arith.constant 0 : index
    %135 = vector.load %arg2[%c22, %c0_158, %c0_159] : memref<25x28x168xf32, #tpu.memory_space<vmem>>, vector<1x28x168xf32>
    %136 = vector.shape_cast %135 : vector<1x28x168xf32> to vector<28x168xf32>
    %cst_160 = arith.constant dense<0.000000e+00> : vector<28x168xf32>
    %137 = tpu.matmul %134, %136, %cst_160 {dimension_numbers = #tpu.dot_dimension_numbers<[1], [0], [0], [1], [0, 0, 1, 1], [], []>} : vector<28x28xf32>, vector<28x168xf32>, vector<28x168xf32> -> vector<28x168xf32>
    %138 = arith.addf %132, %137 : vector<28x168xf32>
    %c0_161 = arith.constant 0 : index
    %c0_162 = arith.constant 0 : index
    %c4_163 = arith.constant 4 : index
    %c3_164 = arith.constant 3 : index
    %139 = vector.load %arg1[%c0_161, %c0_162, %c4_163, %c3_164] : memref<1x1x32x32xf32, #tpu.memory_space<vmem>>, vector<1x1x28x28xf32>
    %140 = vector.shape_cast %139 : vector<1x1x28x28xf32> to vector<28x28xf32>
    %c23 = arith.constant 23 : index
    %c0_165 = arith.constant 0 : index
    %c0_166 = arith.constant 0 : index
    %141 = vector.load %arg2[%c23, %c0_165, %c0_166] : memref<25x28x168xf32, #tpu.memory_space<vmem>>, vector<1x28x168xf32>
    %142 = vector.shape_cast %141 : vector<1x28x168xf32> to vector<28x168xf32>
    %cst_167 = arith.constant dense<0.000000e+00> : vector<28x168xf32>
    %143 = tpu.matmul %140, %142, %cst_167 {dimension_numbers = #tpu.dot_dimension_numbers<[1], [0], [0], [1], [0, 0, 1, 1], [], []>} : vector<28x28xf32>, vector<28x168xf32>, vector<28x168xf32> -> vector<28x168xf32>
    %144 = arith.addf %138, %143 : vector<28x168xf32>
    %c0_168 = arith.constant 0 : index
    %c0_169 = arith.constant 0 : index
    %c4_170 = arith.constant 4 : index
    %c4_171 = arith.constant 4 : index
    %145 = vector.load %arg1[%c0_168, %c0_169, %c4_170, %c4_171] : memref<1x1x32x32xf32, #tpu.memory_space<vmem>>, vector<1x1x28x28xf32>
    %146 = vector.shape_cast %145 : vector<1x1x28x28xf32> to vector<28x28xf32>
    %c24 = arith.constant 24 : index
    %c0_172 = arith.constant 0 : index
    %c0_173 = arith.constant 0 : index
    %147 = vector.load %arg2[%c24, %c0_172, %c0_173] : memref<25x28x168xf32, #tpu.memory_space<vmem>>, vector<1x28x168xf32>
    %148 = vector.shape_cast %147 : vector<1x28x168xf32> to vector<28x168xf32>
    %cst_174 = arith.constant dense<0.000000e+00> : vector<28x168xf32>
    %149 = tpu.matmul %146, %148, %cst_174 {dimension_numbers = #tpu.dot_dimension_numbers<[1], [0], [0], [1], [0, 0, 1, 1], [], []>} : vector<28x28xf32>, vector<28x168xf32>, vector<28x168xf32> -> vector<28x168xf32>
    %150 = arith.addf %144, %149 : vector<28x168xf32>
    %c0_175 = arith.constant 0 : index
    %c0_176 = arith.constant 0 : index
    %151 = vector.load %arg3[%c0_175, %c0_176] : memref<1x168xf32, #tpu.memory_space<vmem>>, vector<1x168xf32>
    %152 = vector.broadcast %151 : vector<1x168xf32> to vector<28x168xf32>
    %153 = arith.addf %150, %152 : vector<28x168xf32>
    %154 = math.tanh %153 : vector<28x168xf32>
    %c0_177 = arith.constant 0 : index
    %c0_178 = arith.constant 0 : index
    %155 = vector.load %arg4[%c0_177, %c0_178] : memref<14x28xf32, #tpu.memory_space<vmem>>, vector<14x28xf32>
    %cst_179 = arith.constant dense<0.000000e+00> : vector<14x168xf32>
    %156 = tpu.matmul %155, %154, %cst_179 {dimension_numbers = #tpu.dot_dimension_numbers<[1], [0], [0], [1], [0, 0, 1, 1], [], []>} : vector<14x28xf32>, vector<28x168xf32>, vector<14x168xf32> -> vector<14x168xf32>
    %c0_180 = arith.constant 0 : index
    %c0_181 = arith.constant 0 : index
    %157 = vector.load %arg5[%c0_180, %c0_181] : memref<168x84xf32, #tpu.memory_space<vmem>>, vector<168x84xf32>
    %cst_182 = arith.constant dense<0.000000e+00> : vector<14x84xf32>
    %158 = tpu.matmul %156, %157, %cst_182 {dimension_numbers = #tpu.dot_dimension_numbers<[1], [0], [0], [1], [0, 0, 1, 1], [], []>} : vector<14x168xf32>, vector<168x84xf32>, vector<14x84xf32> -> vector<14x84xf32>
    %c0_183 = arith.constant 0 : index
    %c0_184 = arith.constant 0 : index
    %159 = vector.load %arg17[%c0_183, %c0_184] : memref<14x84xf32, #tpu.memory_space<vmem>>, vector<14x84xf32>
    tpu.vector_store %arg17[%c0_183, %c0_184], %158 {strides = array<i32>} : memref<14x84xf32, #tpu.memory_space<vmem>>, vector<14x84xf32>,
    %cst_185 = arith.constant 0.000000e+00 : f32
    %160 = vector.broadcast %cst_185 : f32 to vector<10x160xf32>
    %c0_186 = arith.constant 0 : index
    %c0_187 = arith.constant 0 : index
    %161 = vector.load %arg17[%c0_186, %c0_187] : memref<14x84xf32, #tpu.memory_space<vmem>>, vector<10x60xf32>
    %c0_188 = arith.constant 0 : index
    %c0_189 = arith.constant 0 : index
    %c0_190 = arith.constant 0 : index
    %162 = vector.load %arg6[%c0_188, %c0_189, %c0_190] : memref<25x60x160xf32, #tpu.memory_space<vmem>>, vector<1x60x160xf32>
    %163 = vector.shape_cast %162 : vector<1x60x160xf32> to vector<60x160xf32>
    %cst_191 = arith.constant dense<0.000000e+00> : vector<10x160xf32>
    %164 = tpu.matmul %161, %163, %cst_191 {dimension_numbers = #tpu.dot_dimension_numbers<[1], [0], [0], [1], [0, 0, 1, 1], [], []>} : vector<10x60xf32>, vector<60x160xf32>, vector<10x160xf32> -> vector<10x160xf32>
    %165 = arith.addf %160, %164 : vector<10x160xf32>
    %c0_192 = arith.constant 0 : index
    %c6_193 = arith.constant 6 : index
    %166 = vector.load %arg17[%c0_192, %c6_193] : memref<14x84xf32, #tpu.memory_space<vmem>>, vector<10x60xf32>
    %c1_194 = arith.constant 1 : index
    %c0_195 = arith.constant 0 : index
    %c0_196 = arith.constant 0 : index
    %167 = vector.load %arg6[%c1_194, %c0_195, %c0_196] : memref<25x60x160xf32, #tpu.memory_space<vmem>>, vector<1x60x160xf32>
    %168 = vector.shape_cast %167 : vector<1x60x160xf32> to vector<60x160xf32>
    %cst_197 = arith.constant dense<0.000000e+00> : vector<10x160xf32>
    %169 = tpu.matmul %166, %168, %cst_197 {dimension_numbers = #tpu.dot_dimension_numbers<[1], [0], [0], [1], [0, 0, 1, 1], [], []>} : vector<10x60xf32>, vector<60x160xf32>, vector<10x160xf32> -> vector<10x160xf32>
    %170 = arith.addf %165, %169 : vector<10x160xf32>
    %c0_198 = arith.constant 0 : index
    %c12_199 = arith.constant 12 : index
    %171 = vector.load %arg17[%c0_198, %c12_199] : memref<14x84xf32, #tpu.memory_space<vmem>>, vector<10x60xf32>
    %c2_200 = arith.constant 2 : index
    %c0_201 = arith.constant 0 : index
    %c0_202 = arith.constant 0 : index
    %172 = vector.load %arg6[%c2_200, %c0_201, %c0_202] : memref<25x60x160xf32, #tpu.memory_space<vmem>>, vector<1x60x160xf32>
    %173 = vector.shape_cast %172 : vector<1x60x160xf32> to vector<60x160xf32>
    %cst_203 = arith.constant dense<0.000000e+00> : vector<10x160xf32>
    %174 = tpu.matmul %171, %173, %cst_203 {dimension_numbers = #tpu.dot_dimension_numbers<[1], [0], [0], [1], [0, 0, 1, 1], [], []>} : vector<10x60xf32>, vector<60x160xf32>, vector<10x160xf32> -> vector<10x160xf32>
    %175 = arith.addf %170, %174 : vector<10x160xf32>
    %c0_204 = arith.constant 0 : index
    %c18_205 = arith.constant 18 : index
    %176 = vector.load %arg17[%c0_204, %c18_205] : memref<14x84xf32, #tpu.memory_space<vmem>>, vector<10x60xf32>
    %c3_206 = arith.constant 3 : index
    %c0_207 = arith.constant 0 : index
    %c0_208 = arith.constant 0 : index
    %177 = vector.load %arg6[%c3_206, %c0_207, %c0_208] : memref<25x60x160xf32, #tpu.memory_space<vmem>>, vector<1x60x160xf32>
    %178 = vector.shape_cast %177 : vector<1x60x160xf32> to vector<60x160xf32>
    %cst_209 = arith.constant dense<0.000000e+00> : vector<10x160xf32>
    %179 = tpu.matmul %176, %178, %cst_209 {dimension_numbers = #tpu.dot_dimension_numbers<[1], [0], [0], [1], [0, 0, 1, 1], [], []>} : vector<10x60xf32>, vector<60x160xf32>, vector<10x160xf32> -> vector<10x160xf32>
    %180 = arith.addf %175, %179 : vector<10x160xf32>
    %c0_210 = arith.constant 0 : index
    %c24_211 = arith.constant 24 : index
    %181 = vector.load %arg17[%c0_210, %c24_211] : memref<14x84xf32, #tpu.memory_space<vmem>>, vector<10x60xf32>
    %c4_212 = arith.constant 4 : index
    %c0_213 = arith.constant 0 : index
    %c0_214 = arith.constant 0 : index
    %182 = vector.load %arg6[%c4_212, %c0_213, %c0_214] : memref<25x60x160xf32, #tpu.memory_space<vmem>>, vector<1x60x160xf32>
    %183 = vector.shape_cast %182 : vector<1x60x160xf32> to vector<60x160xf32>
    %cst_215 = arith.constant dense<0.000000e+00> : vector<10x160xf32>
    %184 = tpu.matmul %181, %183, %cst_215 {dimension_numbers = #tpu.dot_dimension_numbers<[1], [0], [0], [1], [0, 0, 1, 1], [], []>} : vector<10x60xf32>, vector<60x160xf32>, vector<10x160xf32> -> vector<10x160xf32>
    %185 = arith.addf %180, %184 : vector<10x160xf32>
    %c1_216 = arith.constant 1 : index
    %c0_217 = arith.constant 0 : index
    %186 = vector.load %arg17[%c1_216, %c0_217] : memref<14x84xf32, #tpu.memory_space<vmem>>, vector<10x60xf32>
    %c5_218 = arith.constant 5 : index
    %c0_219 = arith.constant 0 : index
    %c0_220 = arith.constant 0 : index
    %187 = vector.load %arg6[%c5_218, %c0_219, %c0_220] : memref<25x60x160xf32, #tpu.memory_space<vmem>>, vector<1x60x160xf32>
    %188 = vector.shape_cast %187 : vector<1x60x160xf32> to vector<60x160xf32>
    %cst_221 = arith.constant dense<0.000000e+00> : vector<10x160xf32>
    %189 = tpu.matmul %186, %188, %cst_221 {dimension_numbers = #tpu.dot_dimension_numbers<[1], [0], [0], [1], [0, 0, 1, 1], [], []>} : vector<10x60xf32>, vector<60x160xf32>, vector<10x160xf32> -> vector<10x160xf32>
    %190 = arith.addf %185, %189 : vector<10x160xf32>
    %c1_222 = arith.constant 1 : index
    %c6_223 = arith.constant 6 : index
    %191 = vector.load %arg17[%c1_222, %c6_223] : memref<14x84xf32, #tpu.memory_space<vmem>>, vector<10x60xf32>
    %c6_224 = arith.constant 6 : index
    %c0_225 = arith.constant 0 : index
    %c0_226 = arith.constant 0 : index
    %192 = vector.load %arg6[%c6_224, %c0_225, %c0_226] : memref<25x60x160xf32, #tpu.memory_space<vmem>>, vector<1x60x160xf32>
    %193 = vector.shape_cast %192 : vector<1x60x160xf32> to vector<60x160xf32>
    %cst_227 = arith.constant dense<0.000000e+00> : vector<10x160xf32>
    %194 = tpu.matmul %191, %193, %cst_227 {dimension_numbers = #tpu.dot_dimension_numbers<[1], [0], [0], [1], [0, 0, 1, 1], [], []>} : vector<10x60xf32>, vector<60x160xf32>, vector<10x160xf32> -> vector<10x160xf32>
    %195 = arith.addf %190, %194 : vector<10x160xf32>
    %c1_228 = arith.constant 1 : index
    %c12_229 = arith.constant 12 : index
    %196 = vector.load %arg17[%c1_228, %c12_229] : memref<14x84xf32, #tpu.memory_space<vmem>>, vector<10x60xf32>
    %c7_230 = arith.constant 7 : index
    %c0_231 = arith.constant 0 : index
    %c0_232 = arith.constant 0 : index
    %197 = vector.load %arg6[%c7_230, %c0_231, %c0_232] : memref<25x60x160xf32, #tpu.memory_space<vmem>>, vector<1x60x160xf32>
    %198 = vector.shape_cast %197 : vector<1x60x160xf32> to vector<60x160xf32>
    %cst_233 = arith.constant dense<0.000000e+00> : vector<10x160xf32>
    %199 = tpu.matmul %196, %198, %cst_233 {dimension_numbers = #tpu.dot_dimension_numbers<[1], [0], [0], [1], [0, 0, 1, 1], [], []>} : vector<10x60xf32>, vector<60x160xf32>, vector<10x160xf32> -> vector<10x160xf32>
    %200 = arith.addf %195, %199 : vector<10x160xf32>
    %c1_234 = arith.constant 1 : index
    %c18_235 = arith.constant 18 : index
    %201 = vector.load %arg17[%c1_234, %c18_235] : memref<14x84xf32, #tpu.memory_space<vmem>>, vector<10x60xf32>
    %c8_236 = arith.constant 8 : index
    %c0_237 = arith.constant 0 : index
    %c0_238 = arith.constant 0 : index
    %202 = vector.load %arg6[%c8_236, %c0_237, %c0_238] : memref<25x60x160xf32, #tpu.memory_space<vmem>>, vector<1x60x160xf32>
    %203 = vector.shape_cast %202 : vector<1x60x160xf32> to vector<60x160xf32>
    %cst_239 = arith.constant dense<0.000000e+00> : vector<10x160xf32>
    %204 = tpu.matmul %201, %203, %cst_239 {dimension_numbers = #tpu.dot_dimension_numbers<[1], [0], [0], [1], [0, 0, 1, 1], [], []>} : vector<10x60xf32>, vector<60x160xf32>, vector<10x160xf32> -> vector<10x160xf32>
    %205 = arith.addf %200, %204 : vector<10x160xf32>
    %c1_240 = arith.constant 1 : index
    %c24_241 = arith.constant 24 : index
    %206 = vector.load %arg17[%c1_240, %c24_241] : memref<14x84xf32, #tpu.memory_space<vmem>>, vector<10x60xf32>
    %c9_242 = arith.constant 9 : index
    %c0_243 = arith.constant 0 : index
    %c0_244 = arith.constant 0 : index
    %207 = vector.load %arg6[%c9_242, %c0_243, %c0_244] : memref<25x60x160xf32, #tpu.memory_space<vmem>>, vector<1x60x160xf32>
    %208 = vector.shape_cast %207 : vector<1x60x160xf32> to vector<60x160xf32>
    %cst_245 = arith.constant dense<0.000000e+00> : vector<10x160xf32>
    %209 = tpu.matmul %206, %208, %cst_245 {dimension_numbers = #tpu.dot_dimension_numbers<[1], [0], [0], [1], [0, 0, 1, 1], [], []>} : vector<10x60xf32>, vector<60x160xf32>, vector<10x160xf32> -> vector<10x160xf32>
    %210 = arith.addf %205, %209 : vector<10x160xf32>
    %c2_246 = arith.constant 2 : index
    %c0_247 = arith.constant 0 : index
    %211 = vector.load %arg17[%c2_246, %c0_247] : memref<14x84xf32, #tpu.memory_space<vmem>>, vector<10x60xf32>
    %c10_248 = arith.constant 10 : index
    %c0_249 = arith.constant 0 : index
    %c0_250 = arith.constant 0 : index
    %212 = vector.load %arg6[%c10_248, %c0_249, %c0_250] : memref<25x60x160xf32, #tpu.memory_space<vmem>>, vector<1x60x160xf32>
    %213 = vector.shape_cast %212 : vector<1x60x160xf32> to vector<60x160xf32>
    %cst_251 = arith.constant dense<0.000000e+00> : vector<10x160xf32>
    %214 = tpu.matmul %211, %213, %cst_251 {dimension_numbers = #tpu.dot_dimension_numbers<[1], [0], [0], [1], [0, 0, 1, 1], [], []>} : vector<10x60xf32>, vector<60x160xf32>, vector<10x160xf32> -> vector<10x160xf32>
    %215 = arith.addf %210, %214 : vector<10x160xf32>
    %c2_252 = arith.constant 2 : index
    %c6_253 = arith.constant 6 : index
    %216 = vector.load %arg17[%c2_252, %c6_253] : memref<14x84xf32, #tpu.memory_space<vmem>>, vector<10x60xf32>
    %c11_254 = arith.constant 11 : index
    %c0_255 = arith.constant 0 : index
    %c0_256 = arith.constant 0 : index
    %217 = vector.load %arg6[%c11_254, %c0_255, %c0_256] : memref<25x60x160xf32, #tpu.memory_space<vmem>>, vector<1x60x160xf32>
    %218 = vector.shape_cast %217 : vector<1x60x160xf32> to vector<60x160xf32>
    %cst_257 = arith.constant dense<0.000000e+00> : vector<10x160xf32>
    %219 = tpu.matmul %216, %218, %cst_257 {dimension_numbers = #tpu.dot_dimension_numbers<[1], [0], [0], [1], [0, 0, 1, 1], [], []>} : vector<10x60xf32>, vector<60x160xf32>, vector<10x160xf32> -> vector<10x160xf32>
    %220 = arith.addf %215, %219 : vector<10x160xf32>
    %c2_258 = arith.constant 2 : index
    %c12_259 = arith.constant 12 : index
    %221 = vector.load %arg17[%c2_258, %c12_259] : memref<14x84xf32, #tpu.memory_space<vmem>>, vector<10x60xf32>
    %c12_260 = arith.constant 12 : index
    %c0_261 = arith.constant 0 : index
    %c0_262 = arith.constant 0 : index
    %222 = vector.load %arg6[%c12_260, %c0_261, %c0_262] : memref<25x60x160xf32, #tpu.memory_space<vmem>>, vector<1x60x160xf32>
    %223 = vector.shape_cast %222 : vector<1x60x160xf32> to vector<60x160xf32>
    %cst_263 = arith.constant dense<0.000000e+00> : vector<10x160xf32>
    %224 = tpu.matmul %221, %223, %cst_263 {dimension_numbers = #tpu.dot_dimension_numbers<[1], [0], [0], [1], [0, 0, 1, 1], [], []>} : vector<10x60xf32>, vector<60x160xf32>, vector<10x160xf32> -> vector<10x160xf32>
    %225 = arith.addf %220, %224 : vector<10x160xf32>
    %c2_264 = arith.constant 2 : index
    %c18_265 = arith.constant 18 : index
    %226 = vector.load %arg17[%c2_264, %c18_265] : memref<14x84xf32, #tpu.memory_space<vmem>>, vector<10x60xf32>
    %c13_266 = arith.constant 13 : index
    %c0_267 = arith.constant 0 : index
    %c0_268 = arith.constant 0 : index
    %227 = vector.load %arg6[%c13_266, %c0_267, %c0_268] : memref<25x60x160xf32, #tpu.memory_space<vmem>>, vector<1x60x160xf32>
    %228 = vector.shape_cast %227 : vector<1x60x160xf32> to vector<60x160xf32>
    %cst_269 = arith.constant dense<0.000000e+00> : vector<10x160xf32>
    %229 = tpu.matmul %226, %228, %cst_269 {dimension_numbers = #tpu.dot_dimension_numbers<[1], [0], [0], [1], [0, 0, 1, 1], [], []>} : vector<10x60xf32>, vector<60x160xf32>, vector<10x160xf32> -> vector<10x160xf32>
    %230 = arith.addf %225, %229 : vector<10x160xf32>
    %c2_270 = arith.constant 2 : index
    %c24_271 = arith.constant 24 : index
    %231 = vector.load %arg17[%c2_270, %c24_271] : memref<14x84xf32, #tpu.memory_space<vmem>>, vector<10x60xf32>
    %c14_272 = arith.constant 14 : index
    %c0_273 = arith.constant 0 : index
    %c0_274 = arith.constant 0 : index
    %232 = vector.load %arg6[%c14_272, %c0_273, %c0_274] : memref<25x60x160xf32, #tpu.memory_space<vmem>>, vector<1x60x160xf32>
    %233 = vector.shape_cast %232 : vector<1x60x160xf32> to vector<60x160xf32>
    %cst_275 = arith.constant dense<0.000000e+00> : vector<10x160xf32>
    %234 = tpu.matmul %231, %233, %cst_275 {dimension_numbers = #tpu.dot_dimension_numbers<[1], [0], [0], [1], [0, 0, 1, 1], [], []>} : vector<10x60xf32>, vector<60x160xf32>, vector<10x160xf32> -> vector<10x160xf32>
    %235 = arith.addf %230, %234 : vector<10x160xf32>
    %c3_276 = arith.constant 3 : index
    %c0_277 = arith.constant 0 : index
    %236 = vector.load %arg17[%c3_276, %c0_277] : memref<14x84xf32, #tpu.memory_space<vmem>>, vector<10x60xf32>
    %c15_278 = arith.constant 15 : index
    %c0_279 = arith.constant 0 : index
    %c0_280 = arith.constant 0 : index
    %237 = vector.load %arg6[%c15_278, %c0_279, %c0_280] : memref<25x60x160xf32, #tpu.memory_space<vmem>>, vector<1x60x160xf32>
    %238 = vector.shape_cast %237 : vector<1x60x160xf32> to vector<60x160xf32>
    %cst_281 = arith.constant dense<0.000000e+00> : vector<10x160xf32>
    %239 = tpu.matmul %236, %238, %cst_281 {dimension_numbers = #tpu.dot_dimension_numbers<[1], [0], [0], [1], [0, 0, 1, 1], [], []>} : vector<10x60xf32>, vector<60x160xf32>, vector<10x160xf32> -> vector<10x160xf32>
    %240 = arith.addf %235, %239 : vector<10x160xf32>
    %c3_282 = arith.constant 3 : index
    %c6_283 = arith.constant 6 : index
    %241 = vector.load %arg17[%c3_282, %c6_283] : memref<14x84xf32, #tpu.memory_space<vmem>>, vector<10x60xf32>
    %c16_284 = arith.constant 16 : index
    %c0_285 = arith.constant 0 : index
    %c0_286 = arith.constant 0 : index
    %242 = vector.load %arg6[%c16_284, %c0_285, %c0_286] : memref<25x60x160xf32, #tpu.memory_space<vmem>>, vector<1x60x160xf32>
    %243 = vector.shape_cast %242 : vector<1x60x160xf32> to vector<60x160xf32>
    %cst_287 = arith.constant dense<0.000000e+00> : vector<10x160xf32>
    %244 = tpu.matmul %241, %243, %cst_287 {dimension_numbers = #tpu.dot_dimension_numbers<[1], [0], [0], [1], [0, 0, 1, 1], [], []>} : vector<10x60xf32>, vector<60x160xf32>, vector<10x160xf32> -> vector<10x160xf32>
    %245 = arith.addf %240, %244 : vector<10x160xf32>
    %c3_288 = arith.constant 3 : index
    %c12_289 = arith.constant 12 : index
    %246 = vector.load %arg17[%c3_288, %c12_289] : memref<14x84xf32, #tpu.memory_space<vmem>>, vector<10x60xf32>
    %c17_290 = arith.constant 17 : index
    %c0_291 = arith.constant 0 : index
    %c0_292 = arith.constant 0 : index
    %247 = vector.load %arg6[%c17_290, %c0_291, %c0_292] : memref<25x60x160xf32, #tpu.memory_space<vmem>>, vector<1x60x160xf32>
    %248 = vector.shape_cast %247 : vector<1x60x160xf32> to vector<60x160xf32>
    %cst_293 = arith.constant dense<0.000000e+00> : vector<10x160xf32>
    %249 = tpu.matmul %246, %248, %cst_293 {dimension_numbers = #tpu.dot_dimension_numbers<[1], [0], [0], [1], [0, 0, 1, 1], [], []>} : vector<10x60xf32>, vector<60x160xf32>, vector<10x160xf32> -> vector<10x160xf32>
    %250 = arith.addf %245, %249 : vector<10x160xf32>
    %c3_294 = arith.constant 3 : index
    %c18_295 = arith.constant 18 : index
    %251 = vector.load %arg17[%c3_294, %c18_295] : memref<14x84xf32, #tpu.memory_space<vmem>>, vector<10x60xf32>
    %c18_296 = arith.constant 18 : index
    %c0_297 = arith.constant 0 : index
    %c0_298 = arith.constant 0 : index
    %252 = vector.load %arg6[%c18_296, %c0_297, %c0_298] : memref<25x60x160xf32, #tpu.memory_space<vmem>>, vector<1x60x160xf32>
    %253 = vector.shape_cast %252 : vector<1x60x160xf32> to vector<60x160xf32>
    %cst_299 = arith.constant dense<0.000000e+00> : vector<10x160xf32>
    %254 = tpu.matmul %251, %253, %cst_299 {dimension_numbers = #tpu.dot_dimension_numbers<[1], [0], [0], [1], [0, 0, 1, 1], [], []>} : vector<10x60xf32>, vector<60x160xf32>, vector<10x160xf32> -> vector<10x160xf32>
    %255 = arith.addf %250, %254 : vector<10x160xf32>
    %c3_300 = arith.constant 3 : index
    %c24_301 = arith.constant 24 : index
    %256 = vector.load %arg17[%c3_300, %c24_301] : memref<14x84xf32, #tpu.memory_space<vmem>>, vector<10x60xf32>
    %c19_302 = arith.constant 19 : index
    %c0_303 = arith.constant 0 : index
    %c0_304 = arith.constant 0 : index
    %257 = vector.load %arg6[%c19_302, %c0_303, %c0_304] : memref<25x60x160xf32, #tpu.memory_space<vmem>>, vector<1x60x160xf32>
    %258 = vector.shape_cast %257 : vector<1x60x160xf32> to vector<60x160xf32>
    %cst_305 = arith.constant dense<0.000000e+00> : vector<10x160xf32>
    %259 = tpu.matmul %256, %258, %cst_305 {dimension_numbers = #tpu.dot_dimension_numbers<[1], [0], [0], [1], [0, 0, 1, 1], [], []>} : vector<10x60xf32>, vector<60x160xf32>, vector<10x160xf32> -> vector<10x160xf32>
    %260 = arith.addf %255, %259 : vector<10x160xf32>
    %c4_306 = arith.constant 4 : index
    %c0_307 = arith.constant 0 : index
    %261 = vector.load %arg17[%c4_306, %c0_307] : memref<14x84xf32, #tpu.memory_space<vmem>>, vector<10x60xf32>
    %c20_308 = arith.constant 20 : index
    %c0_309 = arith.constant 0 : index
    %c0_310 = arith.constant 0 : index
    %262 = vector.load %arg6[%c20_308, %c0_309, %c0_310] : memref<25x60x160xf32, #tpu.memory_space<vmem>>, vector<1x60x160xf32>
    %263 = vector.shape_cast %262 : vector<1x60x160xf32> to vector<60x160xf32>
    %cst_311 = arith.constant dense<0.000000e+00> : vector<10x160xf32>
    %264 = tpu.matmul %261, %263, %cst_311 {dimension_numbers = #tpu.dot_dimension_numbers<[1], [0], [0], [1], [0, 0, 1, 1], [], []>} : vector<10x60xf32>, vector<60x160xf32>, vector<10x160xf32> -> vector<10x160xf32>
    %265 = arith.addf %260, %264 : vector<10x160xf32>
    %c4_312 = arith.constant 4 : index
    %c6_313 = arith.constant 6 : index
    %266 = vector.load %arg17[%c4_312, %c6_313] : memref<14x84xf32, #tpu.memory_space<vmem>>, vector<10x60xf32>
    %c21_314 = arith.constant 21 : index
    %c0_315 = arith.constant 0 : index
    %c0_316 = arith.constant 0 : index
    %267 = vector.load %arg6[%c21_314, %c0_315, %c0_316] : memref<25x60x160xf32, #tpu.memory_space<vmem>>, vector<1x60x160xf32>
    %268 = vector.shape_cast %267 : vector<1x60x160xf32> to vector<60x160xf32>
    %cst_317 = arith.constant dense<0.000000e+00> : vector<10x160xf32>
    %269 = tpu.matmul %266, %268, %cst_317 {dimension_numbers = #tpu.dot_dimension_numbers<[1], [0], [0], [1], [0, 0, 1, 1], [], []>} : vector<10x60xf32>, vector<60x160xf32>, vector<10x160xf32> -> vector<10x160xf32>
    %270 = arith.addf %265, %269 : vector<10x160xf32>
    %c4_318 = arith.constant 4 : index
    %c12_319 = arith.constant 12 : index
    %271 = vector.load %arg17[%c4_318, %c12_319] : memref<14x84xf32, #tpu.memory_space<vmem>>, vector<10x60xf32>
    %c22_320 = arith.constant 22 : index
    %c0_321 = arith.constant 0 : index
    %c0_322 = arith.constant 0 : index
    %272 = vector.load %arg6[%c22_320, %c0_321, %c0_322] : memref<25x60x160xf32, #tpu.memory_space<vmem>>, vector<1x60x160xf32>
    %273 = vector.shape_cast %272 : vector<1x60x160xf32> to vector<60x160xf32>
    %cst_323 = arith.constant dense<0.000000e+00> : vector<10x160xf32>
    %274 = tpu.matmul %271, %273, %cst_323 {dimension_numbers = #tpu.dot_dimension_numbers<[1], [0], [0], [1], [0, 0, 1, 1], [], []>} : vector<10x60xf32>, vector<60x160xf32>, vector<10x160xf32> -> vector<10x160xf32>
    %275 = arith.addf %270, %274 : vector<10x160xf32>
    %c4_324 = arith.constant 4 : index
    %c18_325 = arith.constant 18 : index
    %276 = vector.load %arg17[%c4_324, %c18_325] : memref<14x84xf32, #tpu.memory_space<vmem>>, vector<10x60xf32>
    %c23_326 = arith.constant 23 : index
    %c0_327 = arith.constant 0 : index
    %c0_328 = arith.constant 0 : index
    %277 = vector.load %arg6[%c23_326, %c0_327, %c0_328] : memref<25x60x160xf32, #tpu.memory_space<vmem>>, vector<1x60x160xf32>
    %278 = vector.shape_cast %277 : vector<1x60x160xf32> to vector<60x160xf32>
    %cst_329 = arith.constant dense<0.000000e+00> : vector<10x160xf32>
    %279 = tpu.matmul %276, %278, %cst_329 {dimension_numbers = #tpu.dot_dimension_numbers<[1], [0], [0], [1], [0, 0, 1, 1], [], []>} : vector<10x60xf32>, vector<60x160xf32>, vector<10x160xf32> -> vector<10x160xf32>
    %280 = arith.addf %275, %279 : vector<10x160xf32>
    %c4_330 = arith.constant 4 : index
    %c24_331 = arith.constant 24 : index
    %281 = vector.load %arg17[%c4_330, %c24_331] : memref<14x84xf32, #tpu.memory_space<vmem>>, vector<10x60xf32>
    %c24_332 = arith.constant 24 : index
    %c0_333 = arith.constant 0 : index
    %c0_334 = arith.constant 0 : index
    %282 = vector.load %arg6[%c24_332, %c0_333, %c0_334] : memref<25x60x160xf32, #tpu.memory_space<vmem>>, vector<1x60x160xf32>
    %283 = vector.shape_cast %282 : vector<1x60x160xf32> to vector<60x160xf32>
    %cst_335 = arith.constant dense<0.000000e+00> : vector<10x160xf32>
    %284 = tpu.matmul %281, %283, %cst_335 {dimension_numbers = #tpu.dot_dimension_numbers<[1], [0], [0], [1], [0, 0, 1, 1], [], []>} : vector<10x60xf32>, vector<60x160xf32>, vector<10x160xf32> -> vector<10x160xf32>
    %285 = arith.addf %280, %284 : vector<10x160xf32>
    %c0_336 = arith.constant 0 : index
    %c0_337 = arith.constant 0 : index
    %286 = vector.load %arg7[%c0_336, %c0_337] : memref<1x160xf32, #tpu.memory_space<vmem>>, vector<1x160xf32>
    %287 = vector.broadcast %286 : vector<1x160xf32> to vector<10x160xf32>
    %288 = arith.addf %285, %287 : vector<10x160xf32>
    %289 = math.tanh %288 : vector<10x160xf32>
    %c0_338 = arith.constant 0 : index
    %c0_339 = arith.constant 0 : index
    %290 = vector.load %arg8[%c0_338, %c0_339] : memref<5x10xf32, #tpu.memory_space<vmem>>, vector<5x10xf32>
    %cst_340 = arith.constant dense<0.000000e+00> : vector<5x160xf32>
    %291 = tpu.matmul %290, %289, %cst_340 {dimension_numbers = #tpu.dot_dimension_numbers<[1], [0], [0], [1], [0, 0, 1, 1], [], []>} : vector<5x10xf32>, vector<10x160xf32>, vector<5x160xf32> -> vector<5x160xf32>
    %c0_341 = arith.constant 0 : index
    %c0_342 = arith.constant 0 : index
    %292 = vector.load %arg9[%c0_341, %c0_342] : memref<160x80xf32, #tpu.memory_space<vmem>>, vector<160x80xf32>
    %cst_343 = arith.constant dense<0.000000e+00> : vector<5x80xf32>
    %293 = tpu.matmul %291, %292, %cst_343 {dimension_numbers = #tpu.dot_dimension_numbers<[1], [0], [0], [1], [0, 0, 1, 1], [], []>} : vector<5x160xf32>, vector<160x80xf32>, vector<5x80xf32> -> vector<5x80xf32>
    %c0_344 = arith.constant 0 : index
    %c0_345 = arith.constant 0 : index
    %294 = vector.load %arg18[%c0_344, %c0_345] : memref<5x80xf32, #tpu.memory_space<vmem>>, vector<5x80xf32>
    tpu.vector_store %arg18[%c0_344, %c0_345], %293 {strides = array<i32>} : memref<5x80xf32, #tpu.memory_space<vmem>>, vector<5x80xf32>,
    %cst_346 = arith.constant 0.000000e+00 : f32
    %295 = vector.broadcast %cst_346 : f32 to vector<1x120xf32>
    %c0_347 = arith.constant 0 : index
    %c0_348 = arith.constant 0 : index
    %296 = vector.load %arg18[%c0_347, %c0_348] : memref<5x80xf32, #tpu.memory_space<vmem>>, vector<1x80xf32>
    %c0_349 = arith.constant 0 : index
    %c0_350 = arith.constant 0 : index
    %c0_351 = arith.constant 0 : index
    %297 = vector.load %arg10[%c0_349, %c0_350, %c0_351] : memref<5x80x120xf32, #tpu.memory_space<vmem>>, vector<1x80x120xf32>
    %298 = vector.shape_cast %297 : vector<1x80x120xf32> to vector<80x120xf32>
    %cst_352 = arith.constant dense<0.000000e+00> : vector<1x120xf32>
    %299 = tpu.matmul %296, %298, %cst_352 {dimension_numbers = #tpu.dot_dimension_numbers<[1], [0], [0], [1], [0, 0, 1, 1], [], []>} : vector<1x80xf32>, vector<80x120xf32>, vector<1x120xf32> -> vector<1x120xf32>
    %300 = arith.addf %295, %299 : vector<1x120xf32>
    %c1_353 = arith.constant 1 : index
    %c0_354 = arith.constant 0 : index
    %301 = vector.load %arg18[%c1_353, %c0_354] : memref<5x80xf32, #tpu.memory_space<vmem>>, vector<1x80xf32>
    %c1_355 = arith.constant 1 : index
    %c0_356 = arith.constant 0 : index
    %c0_357 = arith.constant 0 : index
    %302 = vector.load %arg10[%c1_355, %c0_356, %c0_357] : memref<5x80x120xf32, #tpu.memory_space<vmem>>, vector<1x80x120xf32>
    %303 = vector.shape_cast %302 : vector<1x80x120xf32> to vector<80x120xf32>
    %cst_358 = arith.constant dense<0.000000e+00> : vector<1x120xf32>
    %304 = tpu.matmul %301, %303, %cst_358 {dimension_numbers = #tpu.dot_dimension_numbers<[1], [0], [0], [1], [0, 0, 1, 1], [], []>} : vector<1x80xf32>, vector<80x120xf32>, vector<1x120xf32> -> vector<1x120xf32>
    %305 = arith.addf %300, %304 : vector<1x120xf32>
    %c2_359 = arith.constant 2 : index
    %c0_360 = arith.constant 0 : index
    %306 = vector.load %arg18[%c2_359, %c0_360] : memref<5x80xf32, #tpu.memory_space<vmem>>, vector<1x80xf32>
    %c2_361 = arith.constant 2 : index
    %c0_362 = arith.constant 0 : index
    %c0_363 = arith.constant 0 : index
    %307 = vector.load %arg10[%c2_361, %c0_362, %c0_363] : memref<5x80x120xf32, #tpu.memory_space<vmem>>, vector<1x80x120xf32>
    %308 = vector.shape_cast %307 : vector<1x80x120xf32> to vector<80x120xf32>
    %cst_364 = arith.constant dense<0.000000e+00> : vector<1x120xf32>
    %309 = tpu.matmul %306, %308, %cst_364 {dimension_numbers = #tpu.dot_dimension_numbers<[1], [0], [0], [1], [0, 0, 1, 1], [], []>} : vector<1x80xf32>, vector<80x120xf32>, vector<1x120xf32> -> vector<1x120xf32>
    %310 = arith.addf %305, %309 : vector<1x120xf32>
    %c3_365 = arith.constant 3 : index
    %c0_366 = arith.constant 0 : index
    %311 = vector.load %arg18[%c3_365, %c0_366] : memref<5x80xf32, #tpu.memory_space<vmem>>, vector<1x80xf32>
    %c3_367 = arith.constant 3 : index
    %c0_368 = arith.constant 0 : index
    %c0_369 = arith.constant 0 : index
    %312 = vector.load %arg10[%c3_367, %c0_368, %c0_369] : memref<5x80x120xf32, #tpu.memory_space<vmem>>, vector<1x80x120xf32>
    %313 = vector.shape_cast %312 : vector<1x80x120xf32> to vector<80x120xf32>
    %cst_370 = arith.constant dense<0.000000e+00> : vector<1x120xf32>
    %314 = tpu.matmul %311, %313, %cst_370 {dimension_numbers = #tpu.dot_dimension_numbers<[1], [0], [0], [1], [0, 0, 1, 1], [], []>} : vector<1x80xf32>, vector<80x120xf32>, vector<1x120xf32> -> vector<1x120xf32>
    %315 = arith.addf %310, %314 : vector<1x120xf32>
    %c4_371 = arith.constant 4 : index
    %c0_372 = arith.constant 0 : index
    %316 = vector.load %arg18[%c4_371, %c0_372] : memref<5x80xf32, #tpu.memory_space<vmem>>, vector<1x80xf32>
    %c4_373 = arith.constant 4 : index
    %c0_374 = arith.constant 0 : index
    %c0_375 = arith.constant 0 : index
    %317 = vector.load %arg10[%c4_373, %c0_374, %c0_375] : memref<5x80x120xf32, #tpu.memory_space<vmem>>, vector<1x80x120xf32>
    %318 = vector.shape_cast %317 : vector<1x80x120xf32> to vector<80x120xf32>
    %cst_376 = arith.constant dense<0.000000e+00> : vector<1x120xf32>
    %319 = tpu.matmul %316, %318, %cst_376 {dimension_numbers = #tpu.dot_dimension_numbers<[1], [0], [0], [1], [0, 0, 1, 1], [], []>} : vector<1x80xf32>, vector<80x120xf32>, vector<1x120xf32> -> vector<1x120xf32>
    %320 = arith.addf %315, %319 : vector<1x120xf32>
    %c0_377 = arith.constant 0 : index
    %c0_378 = arith.constant 0 : index
    %321 = vector.load %arg11[%c0_377, %c0_378] : memref<1x120xf32, #tpu.memory_space<vmem>>, vector<1x120xf32>
    %322 = arith.addf %320, %321 : vector<1x120xf32>
    %323 = math.tanh %322 : vector<1x120xf32>
    %c0_379 = arith.constant 0 : index
    %c0_380 = arith.constant 0 : index
    %324 = vector.load %arg12[%c0_379, %c0_380] : memref<120x84xf32, #tpu.memory_space<vmem>>, vector<120x84xf32>
    %cst_381 = arith.constant dense<0.000000e+00> : vector<1x84xf32>
    %325 = tpu.matmul %323, %324, %cst_381 {dimension_numbers = #tpu.dot_dimension_numbers<[1], [0], [0], [1], [0, 0, 1, 1], [], []>} : vector<1x120xf32>, vector<120x84xf32>, vector<1x84xf32> -> vector<1x84xf32>
    %c0_382 = arith.constant 0 : index
    %c0_383 = arith.constant 0 : index
    %326 = vector.load %arg13[%c0_382, %c0_383] : memref<1x84xf32, #tpu.memory_space<vmem>>, vector<1x84xf32>
    %327 = arith.addf %325, %326 : vector<1x84xf32>
    %328 = math.tanh %327 : vector<1x84xf32>
    %c0_384 = arith.constant 0 : index
    %c0_385 = arith.constant 0 : index
    %329 = vector.load %arg14[%c0_384, %c0_385] : memref<84x10xf32, #tpu.memory_space<vmem>>, vector<84x10xf32>
    %cst_386 = arith.constant dense<0.000000e+00> : vector<1x10xf32>
    %330 = tpu.matmul %328, %329, %cst_386 {dimension_numbers = #tpu.dot_dimension_numbers<[1], [0], [0], [1], [0, 0, 1, 1], [], []>} : vector<1x84xf32>, vector<84x10xf32>, vector<1x10xf32> -> vector<1x10xf32>
    %c0_387 = arith.constant 0 : index
    %c0_388 = arith.constant 0 : index
    %331 = vector.load %arg15[%c0_387, %c0_388] : memref<1x10xf32, #tpu.memory_space<vmem>>, vector<1x10xf32>
    %332 = arith.addf %330, %331 : vector<1x10xf32>
    %cst_389 = arith.constant dense<0xFF800000> : vector<1xf32>
    %333 = vector.multi_reduction <maximumf>, %332, %cst_389 [1] : vector<1x10xf32> to vector<1xf32>
    %334 = vector.shape_cast %333 : vector<1xf32> to vector<1x1xf32>
    %335 = vector.broadcast %334 : vector<1x1xf32> to vector<1x10xf32>
    %336 = arith.subf %332, %335 : vector<1x10xf32>
    %337 = math.exp %336 : vector<1x10xf32>
    %cst_390 = arith.constant dense<0.000000e+00> : vector<1xf32>
    %338 = vector.multi_reduction <add>, %337, %cst_390 [1] : vector<1x10xf32> to vector<1xf32>
    %339 = vector.shape_cast %338 : vector<1xf32> to vector<1x1xf32>
    %340 = math.log %339 : vector<1x1xf32>
    %341 = vector.broadcast %340 : vector<1x1xf32> to vector<1x10xf32>
    %342 = arith.subf %336, %341 : vector<1x10xf32>
    %c0_391 = arith.constant 0 : index
    %c0_392 = arith.constant 0 : index
    %c0_393 = arith.constant 0 : index
    %343 = vector.load %arg16[%c0_391, %c0_392, %c0_393] : memref<1x1x10xf32, #tpu.memory_space<vmem>>, vector<1x1x10xf32>
    %344 = vector.shape_cast %343 : vector<1x1x10xf32> to vector<1x10xf32>
    %345 = vector.shape_cast %342 : vector<1x10xf32> to vector<1x1x10xf32>
    tpu.vector_store %arg16[%c0_391, %c0_392, %c0_393], %345 {strides = array<i32>} : memref<1x1x10xf32, #tpu.memory_space<vmem>>, vector<1x1x10xf32>,
    return
  }
  func.func @transform_0(%arg0: i32) -> (i32, i32, i32, i32) {
    %c0_i32 = arith.constant 0 : i32
    %c0_i32_0 = arith.constant 0 : i32
    %c0_i32_1 = arith.constant 0 : i32
    %c0_i32_2 = arith.constant 0 : i32
    return %arg0, %c0_i32, %c0_i32_0, %c0_i32_1 : i32, i32, i32, i32
  }
  func.func @transform_1(%arg0: i32) -> (i32, i32, i32) {
    %c0_i32 = arith.constant 0 : i32
    %c0_i32_0 = arith.constant 0 : i32
    %c0_i32_1 = arith.constant 0 : i32
    %c0_i32_2 = arith.constant 0 : i32
    return %c0_i32, %c0_i32_0, %c0_i32_1 : i32, i32, i32
  }
  func.func @transform_2(%arg0: i32) -> (i32, i32) {
    %c0_i32 = arith.constant 0 : i32
    %c0_i32_0 = arith.constant 0 : i32
    %c0_i32_1 = arith.constant 0 : i32
    return %c0_i32, %c0_i32_0 : i32, i32
  }
  func.func @transform_3(%arg0: i32) -> (i32, i32) {
    %c0_i32 = arith.constant 0 : i32
    %c0_i32_0 = arith.constant 0 : i32
    %c0_i32_1 = arith.constant 0 : i32
    return %c0_i32, %c0_i32_0 : i32, i32
  }
  func.func @transform_4(%arg0: i32) -> (i32, i32) {
    %c0_i32 = arith.constant 0 : i32
    %c0_i32_0 = arith.constant 0 : i32
    %c0_i32_1 = arith.constant 0 : i32
    return %c0_i32, %c0_i32_0 : i32, i32
  }
  func.func @transform_5(%arg0: i32) -> (i32, i32, i32) {
    %c0_i32 = arith.constant 0 : i32
    %c0_i32_0 = arith.constant 0 : i32
    %c0_i32_1 = arith.constant 0 : i32
    %c0_i32_2 = arith.constant 0 : i32
    return %c0_i32, %c0_i32_0, %c0_i32_1 : i32, i32, i32
  }
  func.func @transform_6(%arg0: i32) -> (i32, i32) {
    %c0_i32 = arith.constant 0 : i32
    %c0_i32_0 = arith.constant 0 : i32
    %c0_i32_1 = arith.constant 0 : i32
    return %c0_i32, %c0_i32_0 : i32, i32
  }
  func.func @transform_7(%arg0: i32) -> (i32, i32) {
    %c0_i32 = arith.constant 0 : i32
    %c0_i32_0 = arith.constant 0 : i32
    %c0_i32_1 = arith.constant 0 : i32
    return %c0_i32, %c0_i32_0 : i32, i32
  }
  func.func @transform_8(%arg0: i32) -> (i32, i32) {
    %c0_i32 = arith.constant 0 : i32
    %c0_i32_0 = arith.constant 0 : i32
    %c0_i32_1 = arith.constant 0 : i32
    return %c0_i32, %c0_i32_0 : i32, i32
  }
  func.func @transform_9(%arg0: i32) -> (i32, i32, i32) {
    %c0_i32 = arith.constant 0 : i32
    %c0_i32_0 = arith.constant 0 : i32
    %c0_i32_1 = arith.constant 0 : i32
    %c0_i32_2 = arith.constant 0 : i32
    return %c0_i32, %c0_i32_0, %c0_i32_1 : i32, i32, i32
  }
  func.func @transform_10(%arg0: i32) -> (i32, i32) {
    %c0_i32 = arith.constant 0 : i32
    %c0_i32_0 = arith.constant 0 : i32
    %c0_i32_1 = arith.constant 0 : i32
    return %c0_i32, %c0_i32_0 : i32, i32
  }
  func.func @transform_11(%arg0: i32) -> (i32, i32) {
    %c0_i32 = arith.constant 0 : i32
    %c0_i32_0 = arith.constant 0 : i32
    %c0_i32_1 = arith.constant 0 : i32
    return %c0_i32, %c0_i32_0 : i32, i32
  }
  func.func @transform_12(%arg0: i32) -> (i32, i32) {
    %c0_i32 = arith.constant 0 : i32
    %c0_i32_0 = arith.constant 0 : i32
    %c0_i32_1 = arith.constant 0 : i32
    return %c0_i32, %c0_i32_0 : i32, i32
  }
  func.func @transform_13(%arg0: i32) -> (i32, i32) {
    %c0_i32 = arith.constant 0 : i32
    %c0_i32_0 = arith.constant 0 : i32
    %c0_i32_1 = arith.constant 0 : i32
    return %c0_i32, %c0_i32_0 : i32, i32
  }
  func.func @transform_14(%arg0: i32) -> (i32, i32) {
    %c0_i32 = arith.constant 0 : i32
    %c0_i32_0 = arith.constant 0 : i32
    %c0_i32_1 = arith.constant 0 : i32
    return %c0_i32, %c0_i32_0 : i32, i32
  }
  func.func @transform_15(%arg0: i32) -> (i32, i32, i32) {
    %c0_i32 = arith.constant 0 : i32
    %c0_i32_0 = arith.constant 0 : i32
    %c0_i32_1 = arith.constant 0 : i32
    return %arg0, %c0_i32, %c0_i32_0 : i32, i32, i32
  }
}

</mosaic_0001>

<bundles_post_ra>
// kernel: lenet53_forward.1
= control target key start
LH: loop header
LB: loop body
LE: loop exit
PB: predicated region body
PF: predicated region fallthrough
CT: control target
= control target key end

     0   :  { %s9039_s0 = inlined_call_operand.hbm [shape: f32[2,1,32,32], index: 0, kind: input, shape index: {}]   ;;  %s9040_s1 = inlined_call_operand.hbm [shape: f32[25,28,168], index: 1, kind: input, shape index: {}]   ;;  %s9041_s2 = inlined_call_operand.hbm [shape: f32[1,168], index: 2, kind: input, shape index: {}]   ;;  %s9042_s3 = inlined_call_operand.hbm [shape: f32[14,28], index: 3, kind: input, shape index: {}]   ;;  %s9043_s4 = inlined_call_operand.hbm [shape: f32[168,84], index: 4, kind: input, shape index: {}]   ;;  %s9044_s5 = inlined_call_operand.hbm [shape: f32[25,60,160], index: 5, kind: input, shape index: {}]   ;;  %s9045_s6 = inlined_call_operand.hbm [shape: f32[1,160], index: 6, kind: input, shape index: {}]   ;;  %s9046_s7 = inlined_call_operand.hbm [shape: f32[5,10], index: 7, kind: input, shape index: {}]   ;;  %s9047_s8 = inlined_call_operand.hbm [shape: f32[160,80], index: 8, kind: input, shape index: {}]   ;;  %s9048_s9 = inlined_call_operand.hbm [shape: f32[5,80,120], index: 9, kind: input, shape index: {}]   ;;  %s9049_s10 = inlined_call_operand.hbm [shape: f32[1,120], index: 10, kind: input, shape index: {}]   ;;  %s9050_s11 = inlined_call_operand.vmem [shape: f32[120,84], index: 11, kind: input, shape index: {}]   ;;  %s9051_s12 = inlined_call_operand.hbm [shape: f32[1,84], index: 12, kind: input, shape index: {}]   ;;  %s9052_s13 = inlined_call_operand.vmem [shape: f32[84,10], index: 13, kind: input, shape index: {}]   ;;  %s9053_s14 = inlined_call_operand.hbm [shape: f32[1,10], index: 14, kind: input, shape index: {}]   ;;  %s9054_s15 = inlined_call_operand.hbm [shape: f32[2,1,10], index: 15, kind: output, shape index: {}]  }
   0x1   :  { %9065 = sst [smem:[#allocation74_spill]] %s9039_s0 }
   0x2   :  { %9066 = sst [smem:[#allocation75_spill]] %s9040_s1 }
   0x3   :  { %9067 = sst [smem:[#allocation76_spill]] %s9041_s2 }
   0x4   :  { %9068 = sst [smem:[#allocation77_spill]] %s9042_s3 }
   0x5   :  { %9069 = sst [smem:[#allocation78_spill]] %s9043_s4 }
   0x6   :  { %9070 = sst [smem:[#allocation79_spill]] %s9050_s11 }
   0x7   :  { %9071 = sst [smem:[#allocation80_spill]] %s9052_s13 }
   0x8   :  { %9072 = sst [smem:[#allocation81_spill]] %s9054_s15 }
   0x9   :  { %20 = vsyncpa [#allocation5], 0 }
   0xa   :  { %22 = vsyncpa [#allocation5 + $0x1], 0 }
   0xb   :  { %23 = vsyncpa [#allocation8], 0 }
   0xc   :  { %24 = vsyncpa [#allocation11], 0 }
   0xd   :  { %25 = vsyncpa [#allocation14], 0 }
   0xe   :  { %26 = vsyncpa [#allocation17], 0 }
   0xf   :  { %27 = vsyncpa [#allocation20], 0 }
  0x10   :  { %28 = vsyncpa [#allocation23], 0 }
  0x11   :  { %29 = vsyncpa [#allocation6], 0 }
  0x12   :  { %31 = vsyncpa [#allocation6 + $0x1], 0  ;;  %s7147_s18 = smov 0   ;;  %s7149_s19 = smov 0  }
  0x13   :  { %s7151_s20 = smov 0   ;;  %s7153_s21 = smov 0  }
  0x14 LB: > { %9073 = sst [smem:[#allocation34_spill]] %s7029_s18  ;;  %s7171_s25 = sadd.s32 4294967295, %s7041_s21   ;;  %s7041_s21 = sphi %s7153_s21, %s9177_s21   ;;  %s7037_s20 = sphi %s7151_s20, %s9176_s20   ;;  %s7033_s19 = sphi %s7149_s19, %s9175_s19   ;;  %s7029_s18 = sphi %s7147_s18, %s9174_s18  }
  0x15   : > { %s9074_s1 = sld [smem:[#allocation75_spill]]  ;;  %p5887_p0 = scmp.ge.s32.totalorder %s7041_s21, 1 }
  0x16   : > { %9075 = sst [smem:[#allocation35_spill]] %s7171_s25  ;;  %p58_p1 = scmp.eq.s32.totalorder %s7171_s25, 0 }
  0x17   : > { %p388_p2 = scmp.lt.s32.totalorder %s7041_s21, 3  ;;  %s7043_s27 = smov [#allocation7]  }
  0x18   : > { %s401_s28 = sshll.u32 %s7043_s27, 4  ;;  %s9078_s3 = sld [smem:[#allocation77_spill]]  ;;  %s402_s28 = int_to_ptr.vmem [resolvable:$true] %s401_s28 }
  0x19   : > { %p7176_p3 = pnand %p5887_p0, %p388_p2  ;;  %s7044_s22 = smov [#allocation10]  }
  0x1a   : > { %s427_s23 = sshll.u32 %s7044_s22, 4  ;;  %s7045_s27 = smov 256   ;;  %s428_s23 = int_to_ptr.vmem [resolvable:$true] %s427_s23 }
  0x1b   : > { %s399_s24 = sshll.u32 %s9074_s1, 4  ;;  %p6398_p4 = pneg %p7176_p3  ;;  %s400_s24 = int_to_ptr.hbm [resolvable:$true] %s399_s24 }
  0x1c   : > { %s9076_s26 = scalar_select %p7176_p3, 1, 0 }
  0x1d   : > { %p7188_p6 = pnand %p6398_p4, %p58_p1  ;;  %s7046_s1 = smov 16  }
  0x1e   : > { %9077 = sst [smem:[#allocation36_spill]] %s9076_s26  ;;  %s425_s16 = sshll.u32 %s9078_s3, 4  ;;  %s426_s16 = int_to_ptr.hbm [resolvable:$true] %s425_s16 }
  0x1f   : > { %6401 = dma.hbm_to_vmem [thread:$0]  (!%p7188_p6), %s400_s24, 25600, %s402_s28, [#allocation8], %s7045_s27, %s7045_s27, %s7046_s1  }
  0x20   : > { %s9063_s15 = smov 128   ;;  %s9064_s29 = smov 8  }
  0x21   : > { %6407 = dma.hbm_to_vmem [thread:$0]  (!%p7188_p6), %s426_s16, 256, %s428_s23, [#allocation11], %s9063_s15, %s9063_s15, %s9064_s29  }
  0x22   : > { %s453_s13 = sshll.u32 %s9044_s5, 4  ;;  %s7049_s11 = smov [#allocation13]   ;;  %s454_s13 = int_to_ptr.hbm [resolvable:$true] %s453_s13 }
  0x23   : > { %s455_s22 = sshll.u32 %s7049_s11, 4  ;;  %s480_s28 = sshll.u32 %s9046_s7, 4  ;;  %s456_s22 = int_to_ptr.vmem [resolvable:$true] %s455_s22  ;;  %s481_s28 = int_to_ptr.hbm [resolvable:$true] %s480_s28 }
  0x24   : > { %6413 = dma.hbm_to_vmem [thread:$0]  (!%p7188_p6), %s454_s13, 51200, %s456_s22, [#allocation14], %s7045_s27, %s7045_s27, %s7046_s1  }
  0x25   : > { %s7050_s0 = smov [#allocation16]   ;;  %s505_s3 = sshll.u32 %s9048_s9, 4  ;;  %s506_s3 = int_to_ptr.hbm [resolvable:$true] %s505_s3 }
  0x26   : > { %s482_s25 = sshll.u32 %s7050_s0, 4  ;;  %s535_s30 = sshll.u32 %s9051_s12, 4  ;;  %s483_s25 = int_to_ptr.vmem [resolvable:$true] %s482_s25  ;;  %s536_s30 = int_to_ptr.hbm [resolvable:$true] %s535_s30 }
  0x27   : > { %6419 = dma.hbm_to_vmem [thread:$0]  (!%p7188_p6), %s481_s28, 128, %s483_s25, [#allocation17]  }
  0x28   : > { %s7051_s26 = smov [#allocation19]   ;;  %s7052_s0 = smov [#allocation22]  }
  0x29   : > { %s507_s24 = sshll.u32 %s7051_s26, 4  ;;  %s537_s1 = sshll.u32 %s7052_s0, 4  ;;  %s508_s24 = int_to_ptr.vmem [resolvable:$true] %s507_s24  ;;  %s538_s1 = int_to_ptr.vmem [resolvable:$true] %s537_s1 }
  0x2a   : > { %6425 = dma.hbm_to_vmem [thread:$0]  (!%p7188_p6), %s506_s3, 6400, %s508_s24, [#allocation20], %s9063_s15, %s9063_s15, %s9064_s29  }
  0x2b   : > { %s9080_s2 = sld [smem:[#allocation76_spill]]  ;;  %s7053_s16 = smov [#allocation9]  }
  0x2c   : > { %6431 = dma.hbm_to_vmem [thread:$0]  (!%p7188_p6), %s536_s30, 16, %s538_s1, [#allocation23]  }
  0x2d   : > { %s9081_s4 = sld [smem:[#allocation78_spill]]  ;;  %s416_s11 = sshll.u32 %s7053_s16, 4  ;;  %s417_s11 = int_to_ptr.vmem [resolvable:$true] %s416_s11 }
  0x2e   : > { %s7054_s3 = smov [#allocation12]   ;;  %s468_s0 = sshll.u32 %s9045_s6, 4  ;;  %s469_s0 = int_to_ptr.hbm [resolvable:$true] %s468_s0 }
  0x2f   : > { %s441_s23 = sshll.u32 %s7054_s3, 4  ;;  %s491_s13 = sshll.u32 %s9047_s8, 4  ;;  %s442_s23 = int_to_ptr.vmem [resolvable:$true] %s441_s23  ;;  %s492_s13 = int_to_ptr.hbm [resolvable:$true] %s491_s13 }
  0x30   : > { %s7055_s18 = smov [#allocation15]   ;;  %s7056_s27 = smov [#allocation18]  }
  0x31   : > { %s414_s25 = sshll.u32 %s9080_s2, 4  ;;  %s493_s22 = sshll.u32 %s7056_s27, 4  ;;  %s415_s25 = int_to_ptr.hbm [resolvable:$true] %s414_s25  ;;  %s494_s22 = int_to_ptr.vmem [resolvable:$true] %s493_s22 }
  0x32   : > { %6404 = dma.hbm_to_vmem [thread:$0]  (!%p7188_p6), %s415_s25, 32, %s417_s11, [#allocation8]  }
  0x33   : > { %s439_s28 = sshll.u32 %s9081_s4, 4  ;;  %s470_s25 = sshll.u32 %s7055_s18, 4  ;;  %s440_s28 = int_to_ptr.hbm [resolvable:$true] %s439_s28  ;;  %s471_s25 = int_to_ptr.vmem [resolvable:$true] %s470_s25 }
  0x34   : > { %6410 = dma.hbm_to_vmem [thread:$0]  (!%p7188_p6), %s440_s28, 2688, %s442_s23, [#allocation11], %s9063_s15, %s9063_s15, %s9064_s29  }
  0x35   : > { %6416 = dma.hbm_to_vmem [thread:$0]  (!%p7188_p6), %s469_s0, 32, %s471_s25, [#allocation14]  }
  0x36   : > { %s520_s28 = sshll.u32 %s9049_s10, 4  ;;  %s550_s26 = sshll.u32 %s9053_s14, 4  ;;  %s521_s28 = int_to_ptr.hbm [resolvable:$true] %s520_s28  ;;  %s551_s26 = int_to_ptr.hbm [resolvable:$true] %s550_s26 }
  0x37   : > { %6422 = dma.hbm_to_vmem [thread:$0]  (!%p7188_p6), %s492_s13, 2560, %s494_s22, [#allocation17], %s9063_s15, %s9063_s15, %s9064_s29  }
  0x38   : > { %s7057_s24 = smov [#allocation21]   ;;  %s9082_s0 = sld [smem:[#allocation34_spill]] }
  0x39   : > { %s522_s30 = sshll.u32 %s7057_s24, 4  ;;  %s9083_s1 = sld [smem:[#allocation35_spill]]  ;;  %s523_s30 = int_to_ptr.vmem [resolvable:$true] %s522_s30 }
  0x3a   : > { %6428 = dma.hbm_to_vmem [thread:$0]  (!%p7188_p6), %s521_s28, 16, %s523_s30, [#allocation20]  }
  0x3b   : > { %s7058_s18 = smov [#allocation24]   ;;  %s5886_s25 = sadd.s32 4294967294, %s7041_s21  }
  0x3c   : > { %s552_s13 = sshll.u32 %s7058_s18, 4  ;;  %s7260_s27 = sadd.s32 1, %s7041_s21   ;;  %s553_s13 = int_to_ptr.vmem [resolvable:$true] %s552_s13 }
  0x3d   : > { %6434 = dma.hbm_to_vmem [thread:$0]  (!%p7188_p6), %s551_s26, 16, %s553_s13, [#allocation23]  }
  0x3e   : > { %s41_s22 = ssub.s32 %s7041_s21, %s7260_s27  ;;  %s44_s16 = sadd.s32 1, %s7037_s20 }
  0x3f   : > { %p42_p7 = scmp.eq.s32.totalorder %s41_s22, 0  ;;  %p51_p8 = scmp.ne.s32.totalorder %s7037_s20, %s7033_s19 }
  0x40   : > { %p52_p9 = scmp.eq.s32.totalorder %s7041_s21, 0  ;;  %p57_p10 = scmp.ne.s32.totalorder %s7033_s19, %s9082_s0 }
  0x41   : > { %s7271_s11 = scalar_select %p42_p7, %s7037_s20, %s44_s16  }
  0x42   : > { %p7273_p11 = por %p52_p9, %p51_p8  ;;  %p7279_p12 = por %p58_p1, %p57_p10 }
  0x43   : > { %p375_p13 = scmp.eq.s32.totalorder %s9083_s1, 1  ;;  %p381_p0 = scmp.eq.s32.totalorder %s5886_s25, 1 }
  0x44   : > { %p6455_p2 = scmp.lt.s32.totalorder %s7041_s21, 2  ;;  %s563_s3 = sand.u32 1, %s7037_s20  }
  0x45   : > { %p7286_p4 = por %p375_p13, %p51_p8  ;;  %p7290_p6 = por %p381_p0, %p57_p10 }
  0x46   : > { %s5901_s24 = sshll.u32 %s563_s3, 5  ;;  %s6341_s0 = sshll.u32 %s7041_s21, 5 }
  0x47   : > { %s9088_s13 = sld [smem:[#allocation74_spill]]  ;;  %s567_s16 = scalar_lea.vmem [#allocation4], %s5901_s24 }
  0x48   : > { %s575_s15 = sshll.u32 %s567_s16, 4  ;;  %p7300_p7 = pnand %p6455_p2, %p7273_p11  ;;  %s576_s15 = int_to_ptr.vmem [resolvable:$true] %s575_s15 }
  0x49   : > { %s564_s29 = scalar_lea.sflag [#allocation5], %s563_s3 }
  0x4a   : > { %p6925_p9 = pneg %p7300_p7 }
  0x4d   : > { %s572_s22 = scalar_lea.hbm %s9088_s13, %s6341_s0  ;;  %s6928_s30 = scalar_lea.hbm %s9088_s13, 64 }
  0x4e   : > { %s573_s1 = sshll.u32 %s572_s22, 4  ;;  %s574_s1 = int_to_ptr.hbm [resolvable:$true] %s573_s1 }
  0x4f   : > { %s6921_s2 = sshra.s32 %s574_s1, 4  ;;  %s6922_s2 = int_to_ptr.hbm [resolvable:$true] %s6921_s2 }
  0x50   : > { %s6923_s4 = scalar_lea.hbm %s6922_s2, 32  ;;  %p6929_p11 = scmp.lt.s32.totalorder %s6922_s2, %s9088_s13 }
  0x51   : > { %p6924_p8 = scmp.ne.s32.totalorder %s6922_s2, %s6923_s4  ;;  %p6930_p0 = scmp.lt.s32.totalorder %s6928_s30, %s6923_s4 }
  0x53   : > { %p6926_p10 = pnand %p6925_p9, %p6924_p8  ;;  %p6931_p2 = por %p6930_p0, %p6929_p11 }
  0x55   : > { %p6927_p13 = pneg %p6926_p10 }
  0x57   : > { %p6932_p5 = pnand %p6931_p2, %p6927_p13 }
  0x59   : > { %6935 = shalt.err (!%p6932_p5)
}
  0x5a   : > { %s9090_s3 = smov 8   ;;  %s9091_s22 = smov 128  }
  0x5b   : > { %6438 = dma.hbm_to_vmem [thread:$0]  (!%p7300_p7), %s574_s1, 512, %s576_s15, %s564_s29, %s9091_s22, %s9091_s22, %s9090_s3  }
  0x5c   : > { %587 = sbr.rel (%p7176_p3) target bundleno = 2506 (0x9ca), region = 80 }
  0x61   : > { %s7320_s24 = sand.u32 1, %s7033_s19  }
  0x62   : > { %s5905_s2 = sshll.u32 %s7320_s24, 5  ;;  %s590_s4 = scalar_lea.sflag [#allocation5], %s7320_s24 }
  0x63   : > { %s7324_s0 = scalar_lea.vmem [#allocation4], %s5905_s2 }
  0x64   : > { %6996 = dma.done.wait (%p7279_p12), %s590_s4, 512  }
  0x65   : > { %6998 = vsyncadd (%p7279_p12), %s590_s4, 4294966784  ;;  %s9093_s25 = sld [smem:[#allocation35_spill]] }
  0x66   : > { %7000 = dma.done.wait (%p58_p1), [#allocation8], 25632  }
  0x67   : > { %7002 = vsyncadd (%p58_p1), [#allocation8], 4294941664 }
  0x68   : > { %7004 = dma.done.wait (%p58_p1), [#allocation11], 2944  }
  0x69   : > { %7006 = vsyncadd (%p58_p1), [#allocation11], 4294964352 }
  0x6a   : > { %7008 = dma.done.wait (%p58_p1), [#allocation14], 51232  }
  0x6b   : > { %7010 = vsyncadd (%p58_p1), [#allocation14], 4294916064 }
  0x6c   : > { %7012 = dma.done.wait (%p58_p1), [#allocation17], 2688  }
  0x6d   : > { %7014 = vsyncadd (%p58_p1), [#allocation17], 4294964608 }
  0x6e   : > { %7016 = dma.done.wait (%p58_p1), [#allocation20], 6416  }
  0x6f   : > { %7018 = vsyncadd (%p58_p1), [#allocation20], 4294960880 }
  0x70   : > { %7020 = dma.done.wait (%p58_p1), [#allocation23], 32  }
  0x71   : > { %7022 = vsyncadd (%p58_p1), [#allocation23], 4294967264  ;;  %v7355_v0 = vld [vmem:[%s7324_s0] sm:$0xff]  ;;  %v7358_v1 = vld [vmem:[%s7324_s0 + $0x10] sm:$0xff]  ;;  %s7059_s15 = smov 127   ;;  %s7060_s29 = smov 126  }
  0x72   : > { %725 = vrot.lane.b32.xlu0 %v7355_v0, %s7059_s15  ;;  %729 = vrot.lane.b32.xlu1 %v7358_v1, %s7059_s15  ;;  %v7367_v2 = vld [vmem:[%s7324_s0 + $0x8] sm:$0xff]  ;;  %v7370_v3 = vld [vmem:[%s7324_s0 + $0x18] sm:$0xf]  ;;  %s7061_s17 = smov 125   ;;  %s7062_s1 = smov 124   ;;  %vm742_vm0 = vcmask 1043456  }
  0x73   : > { %888 = vrot.lane.b32.xlu2 %v7355_v0, %s7060_s29  ;;  %v711_v4 = vld [vmem:[#allocation7 + $0x38] sm:$0xf]  ;;  %v709_v5 = vld [vmem:[#allocation7 + $0x28] sm:$0xff]  ;;  %v719_v7 = vld [vmem:[#allocation7 + $0x70] sm:$0xf]  ;;  %vm733_vm1 = vcmask 228352  }
  0x74   : > { %5933 = vmatpush.msk.msra.mxu3 %vm742_vm0, %v711_v4  ;;  %v707_v6 = vld [vmem:[#allocation7 + $0x18] sm:$0xff]  ;;  %5918 = vmatpush.msk.msra.mxu0 %vm742_vm0, %v719_v7  ;;  %v717_v9 = vld [vmem:[#allocation7 + $0x60] sm:$0xff]  ;;  %v718_v10 = vld [vmem:[#allocation7 + $0x68] sm:$0xff]  ;;  %vm3213_vm2 = vcmask 326656   ;;  %vm3266_vm3 = vcmask 687104   ;;  %vm3268_vm4 = vcmask 685056  }
  0x75   : > { %v720_v8 = vld [vmem:[#allocation7 + $0x78] sm:$0xf]  ;;  %v710_v11 = vld [vmem:[#allocation7 + $0x30] sm:$0xf]  ;;  %v708_v14 = vld [vmem:[#allocation7 + $0x20] sm:$0xff]  ;;  %vm3311_vm5 = vcmask 490496  }
  0x76   : > { %5923 = vmatpush.msk.msra.mxu1 %vm742_vm0, %v720_v8  ;;  %863 = vmatpush.msra.mxu3 %v709_v5  ;;  %v715_v12 = vld [vmem:[#allocation7 + $0x50] sm:$0xff]  ;;  %v716_v13 = vld [vmem:[#allocation7 + $0x58] sm:$0xff]  ;;  %v705_v15 = vld [vmem:[#allocation7 + $0x8] sm:$0xff]  ;;  %s7063_s30 = smov 116   ;;  %s7064_s18 = smov 122   ;;  %vm5306_vm6 = vcmask 1041408  }
  0x77   : > { %6342 = vmatpush.msk.msra.mxu2 %vm742_vm0, %v710_v11  ;;  %762 = vmatpush.msra.mxu0 %v717_v9  ;;  %v706_v16 = vld [vmem:[#allocation7 + $0x10] sm:$0xff]  ;;  %v713_v17 = vld [vmem:[#allocation7 + $0x40] sm:$0xff]  ;;  %v714_v18 = vld [vmem:[#allocation7 + $0x48] sm:$0xff]  ;;  %s7065_s28 = smov 110   ;;  %s7066_s3 = smov 104   ;;  %vm5302_vm7 = vcmask 80896  }
  0x78   : > { %791 = vmatpush.msra.mxu1 %v718_v10  ;;  %864 = vmatpush.msra.mxu3 %v707_v6  ;;  %v7404_v19 = vld [vmem:[%s7324_s0 + $0x1] sm:$0xff]  ;;  %v7411_v20 = vld [vmem:[%s7324_s0 + $0x9] sm:$0xff]  ;;  %v7418_v21 = vld [vmem:[%s7324_s0 + $0x11] sm:$0xff]  ;;  %vm5373_vm8 = vcmask 261120   ;;  %s9168_s2 = sld [smem:[#allocation79_spill]]  ;;  %vm5417_vm9 = vcmask 651264  }
  0x79   : > { %6343 = vmatpush.msra.mxu2 %v708_v14  ;;  %763 = vmatpush.msra.mxu0 %v715_v12  ;;  %v7421_v22 = vld [vmem:[%s7324_s0 + $0x19] sm:$0xf]  ;;  %v704_v23 = vld [vmem:[#allocation7] sm:$0xff]  ;;  %v983_v26 = vld [vmem:[#allocation7 + $0xf0] sm:$0xf]  ;;  %vm5442_vm10 = vcmask 654336  }
  0x7a   : > { %727 = vrot.lane.b32.xlu0 %v7367_v2, %s7059_s15  ;;  %731 = vrot.lane.b32.xlu1 %v7370_v3, %s7059_s15  ;;  %v981_v27 = vld [vmem:[#allocation7 + $0xe0] sm:$0xff]  ;;  %v886_v28 = vld [vmem:[#allocation7 + $0xb0] sm:$0xf]  ;;  %v984_v33 = vld [vmem:[#allocation7 + $0xf8] sm:$0xf]  ;;  %vm5616_vm11 = vcmask 982016  }
  0x7b   : > { %890 = vrot.lane.b32.xlu2 %v7367_v2, %s7060_s29  ;;  %792 = vmatpush.msra.mxu1 %v716_v13  ;;  %v979_v29 = vld [vmem:[#allocation7 + $0xd0] sm:$0xff]  ;;  %v884_v30 = vld [vmem:[#allocation7 + $0xa0] sm:$0xff]  ;;  %v982_v35 = vld [vmem:[#allocation7 + $0xe8] sm:$0xff]  ;;  %vm5679_vm12 = vcmask 73728   ;;  %s699_s22 = scalar_lea.vmem [#allocation25], %s7320_s24 }
  0x7c   : > { %865 = vmatpush.msra.mxu3 %v705_v15  ;;  %6344 = vmatpush.msra.mxu2 %v706_v16  ;;  %v977_v31 = vld [vmem:[#allocation7 + $0xc0] sm:$0xff]  ;;  %v882_v34 = vld [vmem:[#allocation7 + $0x90] sm:$0xff]  ;;  %v980_v39 = vld [vmem:[#allocation7 + $0xd8] sm:$0xff]  ;;  %s5704_s16 = sshll.u32 %s699_s22, 4  ;;  %s5705_s16 = int_to_ptr.vmem [resolvable:$true] %s5704_s16 }
  0x7d   : > { %5934 = vmatmul.msk.f32.vlgmr.msra.gmra.mxu3 %vm733_vm1, %v7355_v0  ;;  %764 = vmatpush.msra.mxu0 %v713_v17  ;;  %v880_v36 = vld [vmem:[#allocation7 + $0x80] sm:$0xff]  ;;  %v887_v40 = vld [vmem:[#allocation7 + $0xb8] sm:$0xf]  ;;  %v978_v41 = vld [vmem:[#allocation7 + $0xc8] sm:$0xff] }
  0x7e   : > { %793 = vmatpush.msra.mxu1 %v714_v18  ;;  %6345 = vmatpush.msra.mxu2 %v704_v23  ;;  %v885_v42 = vld [vmem:[#allocation7 + $0xa8] sm:$0xff]  ;;  %v883_v43 = vld [vmem:[#allocation7 + $0x98] sm:$0xff]  ;;  %v1181_v49 = vld [vmem:[#allocation7 + $0x170] sm:$0xf] }
  0x7f   : > { %5930 = vmatmul.msk.f32.vlgmr.msra.gmra.mxu2 %vm733_vm1, %v7367_v2  ;;  %5938 = vmatpush.msk.msrb.mxu0 %vm742_vm0, %v886_v28  ;;  %v881_v44 = vld [vmem:[#allocation7 + $0x88] sm:$0xff]  ;;  %v1179_v50 = vld [vmem:[#allocation7 + $0x160] sm:$0xff]  ;;  %v1177_v53 = vld [vmem:[#allocation7 + $0x150] sm:$0xff] }
  0x80   : > { %5928 = vmatpush.msk.msrb.mxu1 %vm742_vm0, %v710_v11  ;;  %5948 = vmatpush.msk.msrb.mxu2 %vm742_vm0, %v983_v26  ;;  %v7480_v48 = vld [vmem:[%s7324_s0 + $0xa] sm:$0xff]  ;;  %v7490_v54 = vld [vmem:[%s7324_s0 + $0x2] sm:$0xff]  ;;  %v1182_v58 = vld [vmem:[#allocation7 + $0x178] sm:$0xf] }
  0x81   : > { %5953 = vmatpush.msk.msrb.mxu3 %vm742_vm0, %v984_v33  ;;  %923 = vmatpush.msrb.mxu0 %v884_v30  ;;  %v1080_v55 = vld [vmem:[#allocation7 + $0x130] sm:$0xf]  ;;  %v1175_v56 = vld [vmem:[#allocation7 + $0x140] sm:$0xff]  ;;  %v1180_v59 = vld [vmem:[#allocation7 + $0x168] sm:$0xff] }
  0x82   : > { %892 = vrot.lane.b32.xlu0 %v7358_v1, %s7060_s29  ;;  %894 = vrot.lane.b32.xlu1 %v7370_v3, %s7060_s29  ;;  %v1078_v57 = vld [vmem:[#allocation7 + $0x120] sm:$0xff]  ;;  %v1076_v61 = vld [vmem:[#allocation7 + $0x110] sm:$0xff]  ;;  %v1079_v4 = vld [vmem:[#allocation7 + $0x128] sm:$0xff] }
  0x83   : > { %985 = vrot.lane.b32.xlu2 %v7355_v0, %s7061_s17  ;;  %834 = vmatpush.msrb.mxu1 %v708_v14  ;;  %v1074_v63 = vld [vmem:[#allocation7 + $0x100] sm:$0xff]  ;;  %v1176_v5 = vld [vmem:[#allocation7 + $0x148] sm:$0xff]  ;;  %v7533_v8 = vld [vmem:[%s7324_s0 + $0x12] sm:$0xff] }
  0x84   : > { %1020 = vmatpush.msrb.mxu2 %v981_v27  ;;  %1049 = vmatpush.msrb.mxu3 %v982_v35  ;;  %v1075_v7 = vld [vmem:[#allocation7 + $0x108] sm:$0xff]  ;;  %v1371_v9 = vld [vmem:[#allocation7 + $0x1f0] sm:$0xf]  ;;  %v1369_v10 = vld [vmem:[#allocation7 + $0x1e0] sm:$0xff] }
  0x85   : > { %835 = vmatpush.msrb.mxu1 %v706_v16  ;;  %5935 = vmatmul.msk.f32.gmra.mxu3 %vm733_vm1, %v7367_v2  ;;  %v1367_v11 = vld [vmem:[#allocation7 + $0x1d0] sm:$0xff]  ;;  %v1365_v13 = vld [vmem:[#allocation7 + $0x1c0] sm:$0xff]  ;;  %v1372_v15 = vld [vmem:[#allocation7 + $0x1f8] sm:$0xf] }
  0x86   : > { %1021 = vmatpush.msrb.mxu2 %v979_v29  ;;  %924 = vmatpush.msrb.mxu0 %v882_v34  ;;  %v1274_v12 = vld [vmem:[#allocation7 + $0x1b0] sm:$0xf]  ;;  %v1272_v14 = vld [vmem:[#allocation7 + $0x1a0] sm:$0xff]  ;;  %v1370_v18 = vld [vmem:[#allocation7 + $0x1e8] sm:$0xff] }
  0x87   : > { %836 = vmatpush.msrb.mxu1 %v704_v23  ;;  %5931 = vmatmul.msk.f32.gmra.mxu2 %vm733_vm1, %v7358_v1  ;;  %v1275_v23 = vld [vmem:[#allocation7 + $0x1b8] sm:$0xf]  ;;  %v1366_v27 = vld [vmem:[#allocation7 + $0x1c8] sm:$0xff]  ;;  %v1565_v34 = vld [vmem:[#allocation7 + $0x270] sm:$0xf] }
  0x88   : > { %1022 = vmatpush.msrb.mxu2 %v977_v31  ;;  %925 = vmatpush.msrb.mxu0 %v880_v36  ;;  %v1271_v28 = vld [vmem:[#allocation7 + $0x198] sm:$0xff]  ;;  %v1269_v31 = vld [vmem:[#allocation7 + $0x188] sm:$0xff]  ;;  %v1563_v35 = vld [vmem:[#allocation7 + $0x260] sm:$0xff] }
  0x89   : > { %1050 = vmatpush.msrb.mxu3 %v980_v39  ;;  %v1468_v36 = vld [vmem:[#allocation7 + $0x230] sm:$0xf]  ;;  %v1559_v39 = vld [vmem:[#allocation7 + $0x240] sm:$0xff] }
  0x8a   : > { %987 = vrot.lane.b32.xlu0 %v7367_v2, %s7061_s17  ;;  %1082 = vrot.lane.b32.xlu1 %v7355_v0, %s7062_s1 }
  0x8b   : > { %989 = vrot.lane.b32.xlu2 %v7358_v1, %s7061_s17  ;;  %1051 = vmatpush.msrb.mxu3 %v978_v41  ;;  %v1464_v41 = vld [vmem:[#allocation7 + $0x210] sm:$0xff] }
  0x8c   : > { %5968 = vmatpush.msk.msra.mxu2 %vm742_vm0, %v1181_v49  ;;  %v1562_v49 = vld [vmem:[#allocation7 + $0x258] sm:$0xff] }
  0x8d   : > { %5936 = vmatmul.msk.f32.gmra.mxu3 %vm733_vm1, %v7358_v1 }
  0x8e   : > { %1214 = vmatpush.msra.mxu2 %v1179_v50  ;;  %5973 = vmatpush.msk.msra.mxu3 %vm742_vm0, %v1182_v58  ;;  %v1467_v50 = vld [vmem:[#allocation7 + $0x228] sm:$0xff] }
  0x8f   : > { %5932 = vmatmul.msk.f32.gmra.mxu2 %vm733_vm1, %v7370_v3 }
  0x90   : > { %1215 = vmatpush.msra.mxu2 %v1177_v53  ;;  %1243 = vmatpush.msra.mxu3 %v1180_v59  ;;  %v1465_v53 = vld [vmem:[#allocation7 + $0x218] sm:$0xff] }
  0x92   : > { %991 = vrot.lane.b32.xlu1 %v7370_v3, %s7061_s17  ;;  %1084 = vrot.lane.b32.xlu0 %v7367_v2, %s7062_s1  ;;  %v1081_v2 = vld [vmem:[#allocation7 + $0x138] sm:$0xf] }
  0x93   : > { %1086 = vrot.lane.b32.xlu2 %v7358_v1, %s7062_s1  ;;  %1216 = vmatpush.msra.mxu2 %v1175_v56  ;;  %v7509_v1 = vld [vmem:[%s7324_s0 + $0x1a] sm:$0xf]  ;;  %v7619_v56 = vld [vmem:[%s7324_s0 + $0x3] sm:$0xff] }
  0x95   : > { %5937 = vmatmul.msk.f32.gmra.mxu3 %vm733_vm1, %v7370_v3 }
  0x9a   : > { %1088 = vrot.lane.b32.xlu0 %v7370_v3, %s7062_s1  ;;  %1276 = vrot.lane.b32.xlu1 %v7404_v19, %s7059_s15  ;;  %v1178_v3 = vld [vmem:[#allocation7 + $0x158] sm:$0xff] }
  0x9b   : > { %1278 = vrot.lane.b32.xlu2 %v7411_v20, %s7059_s15  ;;  %1244 = vmatpush.msra.mxu3 %v1178_v3 }
  0x9d   : > { %1245 = vmatpush.msra.mxu3 %v1176_v5  ;;  %v1757_v5 = vld [vmem:[#allocation7 + $0x2e0] sm:$0xff] }
  0xa2   : > { %1280 = vrot.lane.b32.xlu0 %v7418_v21, %s7059_s15  ;;  %1282 = vrot.lane.b32.xlu1 %v7421_v22, %s7059_s15 }
  0xa3   : > { %1373 = vrot.lane.b32.xlu2 %v7404_v19, %s7060_s29 }
  0xaa   : > { %1375 = vrot.lane.b32.xlu0 %v7411_v20, %s7060_s29  ;;  %1470 = vrot.lane.b32.xlu1 %v7404_v19, %s7061_s17 }
  0xab   : > { %1377 = vrot.lane.b32.xlu2 %v7418_v21, %s7060_s29 }
  0xb2   : > { %1379 = vrot.lane.b32.xlu1 %v7421_v22, %s7060_s29  ;;  %1472 = vrot.lane.b32.xlu0 %v7411_v20, %s7061_s17 }
  0xb3   : > { %1474 = vrot.lane.b32.xlu2 %v7418_v21, %s7061_s17 }
  0xba   : > { %1567 = vrot.lane.b32.xlu1 %v7404_v19, %s7062_s1  ;;  %1476 = vrot.lane.b32.xlu0 %v7421_v22, %s7061_s17 }
  0xbb   : > { %1569 = vrot.lane.b32.xlu2 %v7411_v20, %s7062_s1 }
  0xc2   : > { %1571 = vrot.lane.b32.xlu0 %v7418_v21, %s7062_s1  ;;  %1573 = vrot.lane.b32.xlu1 %v7421_v22, %s7062_s1 }
  0xc3   : > { %1761 = vrot.lane.b32.xlu2 %v7490_v54, %s7059_s15 }
  0xca   : > { %1763 = vrot.lane.b32.xlu0 %v7480_v48, %s7059_s15  ;;  %1858 = vrot.lane.b32.xlu1 %v7490_v54, %s7060_s29 }
  0xcb   : > { %1765 = vrot.lane.b32.xlu2 %v7533_v8, %s7059_s15 }
  0xcd   : > { %v7457_v24 = vpop.permute.xlu2 %888 }
  0xd2   : > { %1860 = vrot.lane.b32.xlu0 %v7480_v48, %s7060_s29  ;;  %1767 = vrot.lane.b32.xlu1 %v7509_v1, %s7059_s15 }
  0xd3   : > { %1862 = vrot.lane.b32.xlu2 %v7533_v8, %s7060_s29 }
  0xd5   : > { %v7461_v25 = vpop.permute.xlu2 %890 }
  0xda   : > { %1864 = vrot.lane.b32.xlu0 %v7509_v1, %s7060_s29  ;;  %1955 = vrot.lane.b32.xlu1 %v7490_v54, %s7061_s17 }
  0xdb   : > { %1957 = vrot.lane.b32.xlu2 %v7480_v48, %s7061_s17 }
  0xdd   : > { %v986_v32 = vpop.permute.xlu2 %985 }
  0xde   : > { %5949 = vmatmul.msk.f32.vlgmr.msrb.gmra.mxu2 %vm733_vm1, %v986_v32  ;;  %5954 = vmatmul.msk.f32.vlgmr.msrb.gmra.mxu3 %vm733_vm1, %v986_v32 }
  0xdf   : > { %5988 = vmatpush.msk.msrb.mxu2 %vm742_vm0, %v1371_v9  ;;  %5993 = vmatpush.msk.msrb.mxu3 %vm742_vm0, %v1372_v15  ;;  %v1664_v9 = vld [vmem:[#allocation7 + $0x2a0] sm:$0xff] }
  0xe1   : > { %1408 = vmatpush.msrb.mxu2 %v1369_v10  ;;  %1437 = vmatpush.msrb.mxu3 %v1370_v18  ;;  %v1753_v10 = vld [vmem:[#allocation7 + $0x2c0] sm:$0xff] }
  0xe2   : > { %2052 = vrot.lane.b32.xlu0 %v7490_v54, %s7062_s1  ;;  %1959 = vrot.lane.b32.xlu1 %v7533_v8, %s7061_s17 }
  0xe3   : > { %1409 = vmatpush.msrb.mxu2 %v1367_v11  ;;  %2054 = vrot.lane.b32.xlu2 %v7480_v48, %s7062_s1  ;;  %v1662_v11 = vld [vmem:[#allocation7 + $0x290] sm:$0xff] }
  0xe4   : > { %v726_v37 = vpop.permute.xlu0 %725  ;;  %v730_v38 = vpop.permute.xlu1 %729 }
  0xe5   : > { %5919 = vmatmul.msk.f32.vlgmr.msra.gmra.mxu0 %vm733_vm1, %v726_v37  ;;  %5924 = vmatmul.msk.f32.vlgmr.msra.gmra.mxu1 %vm733_vm1, %v726_v37  ;;  %v990_v62 = vpop.permute.xlu2 %989  ;;  %v1561_v37 = vld [vmem:[#allocation7 + $0x250] sm:$0xff] }
  0xe6   : > { %5943 = vmatpush.msk.msra.mxu1 %vm742_vm0, %v887_v40  ;;  %5958 = vmatpush.msk.msra.mxu0 %vm742_vm0, %v1080_v55  ;;  %v1463_v55 = vld [vmem:[#allocation7 + $0x208] sm:$0xff] }
  0xe7   : > { %1410 = vmatpush.msrb.mxu2 %v1365_v13 }
  0xe8   : > { %952 = vmatpush.msra.mxu1 %v885_v42  ;;  %1117 = vmatpush.msra.mxu0 %v1078_v57  ;;  %v1566_v42 = vld [vmem:[#allocation7 + $0x278] sm:$0xf] }
  0xea   : > { %953 = vmatpush.msra.mxu1 %v883_v43  ;;  %1118 = vmatpush.msra.mxu0 %v1076_v61  ;;  %v7638_v61 = vld [vmem:[%s7324_s0 + $0x1b] sm:$0xf] }
  0xeb   : > { %1961 = vrot.lane.b32.xlu0 %v7509_v1, %s7061_s17  ;;  %2056 = vrot.lane.b32.xlu1 %v7533_v8, %s7062_s1 }
  0xec   : > { %v728_v45 = vpop.permute.xlu0 %727  ;;  %954 = vmatpush.msra.mxu1 %v881_v44  ;;  %v732_v46 = vpop.permute.xlu1 %731  ;;  %1119 = vmatpush.msra.mxu0 %v1074_v63  ;;  %v1564_v44 = vld [vmem:[#allocation7 + $0x268] sm:$0xff]  ;;  %v1759_v63 = vld [vmem:[#allocation7 + $0x2f0] sm:$0xf] }
  0xed   : > { %5920 = vmatmul.msk.f32.gmra.mxu0 %vm733_vm1, %v728_v45  ;;  %5925 = vmatmul.msk.f32.gmra.mxu1 %vm733_vm1, %v728_v45  ;;  %v1087_v17 = vpop.permute.xlu2 %1086  ;;  %v1462_v45 = vld [vmem:[#allocation7 + $0x200] sm:$0xff] }
  0xee   : > { %2058 = vrot.lane.b32.xlu2 %v7509_v1, %s7062_s1 }
  0xf3   : > { %2246 = vrot.lane.b32.xlu0 %v7619_v56, %s7059_s15 }
  0xf4   : > { %v7475_v47 = vpop.permute.xlu0 %892  ;;  %v7485_v51 = vpop.permute.xlu1 %894 }
  0xf5   : > { %5921 = vmatmul.msk.f32.gmra.mxu0 %vm733_vm1, %v730_v38  ;;  %5926 = vmatmul.msk.f32.gmra.mxu1 %vm733_vm1, %v730_v38  ;;  %v7571_v29 = vpop.permute.xlu2 %1278  ;;  %v1466_v38 = vld [vmem:[#allocation7 + $0x220] sm:$0xff] }
  0xfb   : > { %2252 = vrot.lane.b32.xlu0 %v7638_v61, %s7059_s15 }
  0xfc   : > { %v988_v52 = vpop.permute.xlu0 %987  ;;  %v7498_v60 = vpop.permute.xlu1 %1082 }
  0xfd   : > { %5922 = vmatmul.msk.f32.gmra.mxu0 %vm733_vm1, %v732_v46  ;;  %5927 = vmatmul.msk.f32.gmra.mxu1 %vm733_vm1, %v732_v46  ;;  %v1374_v32 = vpop.permute.xlu2 %1373  ;;  %v7607_v46 = vld [vmem:[%s7324_s0 + $0xb] sm:$0xff] }
  0xfe   : > { %5950 = vmatmul.msk.f32.gmra.mxu2 %vm733_vm1, %v988_v52  ;;  %5955 = vmatmul.msk.f32.gmra.mxu3 %vm733_vm1, %v988_v52 }
  0xff   : > { %2248 = vrot.lane.b32.xlu1 %v7607_v46, %s7059_s15 }
 0x100   : > { %v7631_v59 = vpop.f32.mrf.mxu3 }
 0x102   : > { %v7647_v3 = vpop.f32.mrf.mxu2 }
 0x103   : > { %2440 = vrot.lane.b32.xlu0 %v7619_v56, %s7061_s17 }
 0x104   : > { %v992_v6 = vpop.permute.xlu1 %991  ;;  %v1085_v16 = vpop.permute.xlu0 %1084 }
 0x105   : > { %5929 = vmatmul.msk.f32.vlgmr.msrb.gmra.mxu1 %vm733_vm1, %v7355_v0  ;;  %5939 = vmatmul.msk.f32.vlgmr.msrb.gmra.mxu0 %vm733_vm1, %v7457_v24  ;;  %v1077_v0 = vld [vmem:[#allocation7 + $0x118] sm:$0xff]  ;;  %v1378_v43 = vpop.permute.xlu2 %1377 }
 0x106   : > { %5951 = vmatmul.msk.f32.gmra.mxu2 %vm733_vm1, %v990_v62  ;;  %5956 = vmatmul.msk.f32.gmra.mxu3 %vm733_vm1, %v990_v62 }
 0x107   : > { %5963 = vmatpush.msk.msrb.mxu1 %vm742_vm0, %v1081_v2  ;;  %5978 = vmatpush.msk.msrb.mxu0 %vm742_vm0, %v1274_v12  ;;  %v1760_v12 = vld [vmem:[#allocation7 + $0x2f8] sm:$0xf] }
 0x108   : > { %2343 = vrot.lane.b32.xlu1 %v7619_v56, %s7060_s29 }
 0x109   : > { %1146 = vmatpush.msrb.mxu1 %v1079_v4  ;;  %1311 = vmatpush.msrb.mxu0 %v1272_v14  ;;  %v7649_v4 = vpop.f32.mrf.mxu3 }
 0x10a   : > { %v7676_v18 = vpop.f32.mrf.mxu2 }
 0x10b   : > { %1147 = vmatpush.msrb.mxu1 %v1077_v0  ;;  %v7656_v0 = vld [vmem:[%s7324_s0 + $0x13] sm:$0xff]  ;;  %2349 = vrot.lane.b32.xlu0 %v7638_v61, %s7060_s29 }
 0x10c   : > { %v1089_v26 = vpop.permute.xlu0 %1088  ;;  %v7573_v30 = vpop.permute.xlu1 %1276  ;;  %2250 = vrot.lane.b32.xlu2 %v7656_v0, %s7059_s15 }
 0x10d   : > { %5940 = vmatmul.msk.f32.gmra.mxu0 %vm733_vm1, %v7461_v25  ;;  %5944 = vmatmul.msk.f32.vlgmr.msra.gmra.mxu1 %vm733_vm1, %v7457_v24  ;;  %v1368_v24 = vld [vmem:[#allocation7 + $0x1d8] sm:$0xff]  ;;  %v7627_v58 = vpop.permute.xlu2 %1474 }
 0x10e   : > { %5952 = vmatmul.msk.f32.gmra.mxu2 %vm733_vm1, %v992_v6  ;;  %5957 = vmatmul.msk.f32.gmra.mxu3 %vm733_vm1, %v992_v6  ;;  %v1666_v6 = vld [vmem:[#allocation7 + $0x2b0] sm:$0xf] }
 0x10f   : > { %1148 = vmatpush.msrb.mxu1 %v1075_v7  ;;  %1438 = vmatpush.msrb.mxu3 %v1368_v24  ;;  %v1755_v7 = vld [vmem:[#allocation7 + $0x2d0] sm:$0xff]  ;;  %v1665_v24 = vld [vmem:[#allocation7 + $0x2a8] sm:$0xff] }
 0x110   : > { %2347 = vrot.lane.b32.xlu1 %v7656_v0, %s7060_s29 }
 0x111   : > { %5983 = vmatpush.msk.msra.mxu1 %vm742_vm0, %v1275_v23  ;;  %1439 = vmatpush.msrb.mxu3 %v1366_v27  ;;  %v1756_v23 = vld [vmem:[#allocation7 + $0x2d8] sm:$0xff] }
 0x113   : > { %2537 = vrot.lane.b32.xlu0 %v7619_v56, %s7062_s1 }
 0x114   : > { %v7588_v33 = vpop.permute.xlu1 %1282  ;;  %2345 = vrot.lane.b32.xlu2 %v7607_v46, %s7060_s29 }
 0x115   : > { %5941 = vmatmul.msk.f32.gmra.mxu0 %vm733_vm1, %v7475_v47  ;;  %5945 = vmatmul.msk.f32.gmra.mxu1 %vm733_vm1, %v7461_v25  ;;  %v1273_v25 = vld [vmem:[#allocation7 + $0x1a8] sm:$0xff]  ;;  %v1570_v2 = vpop.permute.xlu2 %1569 }
 0x116   : > { %5969 = vmatmul.msk.f32.vlgmr.msra.gmra.mxu2 %vm733_vm1, %v7404_v19  ;;  %5974 = vmatmul.msk.f32.vlgmr.msra.gmra.mxu3 %vm733_vm1, %v7404_v19  ;;  %v1270_v19 = vld [vmem:[#allocation7 + $0x190] sm:$0xff] }
 0x117   : > { %1312 = vmatpush.msrb.mxu0 %v1270_v19  ;;  %1340 = vmatpush.msra.mxu1 %v1273_v25  ;;  %v7678_v19 = vpop.f32.mrf.mxu3  ;;  %v1754_v25 = vld [vmem:[#allocation7 + $0x2c8] sm:$0xff] }
 0x118   : > { %6008 = vmatpush.msk.msra.mxu2 %vm742_vm0, %v1565_v34  ;;  %6013 = vmatpush.msk.msra.mxu3 %vm742_vm0, %v1566_v42  ;;  %v1949_v42 = vld [vmem:[#allocation7 + $0x350] sm:$0xff] }
 0x119   : > { %1341 = vmatpush.msra.mxu1 %v1271_v28  ;;  %2444 = vrot.lane.b32.xlu1 %v7656_v0, %s7061_s17 }
 0x11a   : > { %1602 = vmatpush.msra.mxu2 %v1563_v35  ;;  %1631 = vmatpush.msra.mxu3 %v1564_v44  ;;  %v1854_v44 = vld [vmem:[#allocation7 + $0x320] sm:$0xff] }
 0x11b   : > { %1342 = vmatpush.msra.mxu1 %v1269_v31  ;;  %v7699_v31 = vpop.f32.mrf.mxu2  ;;  %2543 = vrot.lane.b32.xlu0 %v7638_v61, %s7062_s1 }
 0x11c   : > { %v7599_v40 = vpop.permute.xlu1 %1470  ;;  %1603 = vmatpush.msra.mxu2 %v1561_v37  ;;  %1632 = vmatpush.msra.mxu3 %v1562_v49 }
 0x11d   : > { %5942 = vmatmul.msk.f32.gmra.mxu0 %vm733_vm1, %v7485_v51  ;;  %5946 = vmatmul.msk.f32.gmra.mxu1 %vm733_vm1, %v7475_v47  ;;  %v1469_v47 = vld [vmem:[#allocation7 + $0x238] sm:$0xf]  ;;  %v1762_v34 = vpop.permute.xlu2 %1761 }
 0x11e   : > { %5970 = vmatmul.msk.f32.gmra.mxu2 %vm733_vm1, %v7411_v20  ;;  %5975 = vmatmul.msk.f32.gmra.mxu3 %vm733_vm1, %v7411_v20  ;;  %v1268_v20 = vld [vmem:[#allocation7 + $0x180] sm:$0xff] }
 0x11f   : > { %1313 = vmatpush.msrb.mxu0 %v1268_v20  ;;  %1604 = vmatpush.msra.mxu2 %v1559_v39  ;;  %v1667_v20 = vld [vmem:[#allocation7 + $0x2b8] sm:$0xf] }
 0x120   : > { %2442 = vrot.lane.b32.xlu2 %v7607_v46, %s7061_s17 }
 0x121   : > { %2539 = vrot.lane.b32.xlu1 %v7607_v46, %s7062_s1 }
 0x124   : > { %v1380_v52 = vpop.permute.xlu1 %1379 }
 0x125   : > { %5947 = vmatmul.msk.f32.gmra.mxu1 %vm733_vm1, %v7485_v51  ;;  %5959 = vmatmul.msk.f32.vlgmr.msra.gmra.mxu0 %vm733_vm1, %v7498_v60  ;;  %v1560_v51 = vld [vmem:[#allocation7 + $0x248] sm:$0xff] }
 0x126   : > { %5971 = vmatmul.msk.f32.gmra.mxu2 %vm733_vm1, %v7418_v21  ;;  %5976 = vmatmul.msk.f32.gmra.mxu3 %vm733_vm1, %v7418_v21  ;;  %v7584_v21 = vpop.permute.xlu0 %1280 }
 0x127   : > { %5998 = vmatpush.msk.msra.mxu0 %vm742_vm0, %v1468_v36  ;;  %1633 = vmatpush.msra.mxu3 %v1560_v51  ;;  %v1953_v36 = vld [vmem:[#allocation7 + $0x370] sm:$0xf]  ;;  %v1954_v51 = vld [vmem:[#allocation7 + $0x378] sm:$0xf] }
 0x128   : > { %2446 = vrot.lane.b32.xlu2 %v7638_v61, %s7061_s17 }
 0x129   : > { %1505 = vmatpush.msra.mxu0 %v1466_v38 }
 0x12b   : > { %1506 = vmatpush.msra.mxu0 %v1464_v41  ;;  %v1856_v41 = vld [vmem:[#allocation7 + $0x330] sm:$0xf] }
 0x12d   : > { %5960 = vmatmul.msk.f32.gmra.mxu0 %vm733_vm1, %v1085_v16  ;;  %5964 = vmatmul.msk.f32.vlgmr.msrb.gmra.mxu1 %vm733_vm1, %v7498_v60  ;;  %v1568_v60 = vpop.permute.xlu1 %1567 }
 0x12e   : > { %5972 = vmatmul.msk.f32.gmra.mxu2 %vm733_vm1, %v7421_v22  ;;  %5977 = vmatmul.msk.f32.gmra.mxu3 %vm733_vm1, %v7421_v22  ;;  %v1376_v22 = vpop.permute.xlu0 %1375 }
 0x12f   : > { %1507 = vmatpush.msra.mxu0 %v1462_v45  ;;  %6003 = vmatpush.msk.msrb.mxu1 %vm742_vm0, %v1469_v47  ;;  %v1947_v45 = vld [vmem:[#allocation7 + $0x340] sm:$0xff] }
 0x130   : > { %2541 = vrot.lane.b32.xlu2 %v7656_v0, %s7062_s1 }
 0x131   : > { %1534 = vmatpush.msrb.mxu1 %v1467_v50  ;;  %v1852_v50 = vld [vmem:[#allocation7 + $0x310] sm:$0xff] }
 0x133   : > { %1535 = vmatpush.msrb.mxu1 %v1465_v53 }
 0x135   : > { %5961 = vmatmul.msk.f32.gmra.mxu0 %vm733_vm1, %v1087_v17  ;;  %5965 = vmatmul.msk.f32.gmra.mxu1 %vm733_vm1, %v1085_v16  ;;  %v1758_v16 = vld [vmem:[#allocation7 + $0x2e8] sm:$0xff] }
 0x136   : > { %5989 = vmatmul.msk.f32.vlgmr.msrb.gmra.mxu2 %vm733_vm1, %v1374_v32  ;;  %5994 = vmatmul.msk.f32.vlgmr.msrb.gmra.mxu3 %vm733_vm1, %v1374_v32  ;;  %v7623_v57 = vpop.permute.xlu0 %1472 }
 0x137   : > { %1536 = vmatpush.msrb.mxu1 %v1463_v55  ;;  %6028 = vmatpush.msk.msrb.mxu2 %vm742_vm0, %v1759_v63 }
 0x138   : > { %6033 = vmatpush.msk.msrb.mxu3 %vm742_vm0, %v1760_v12  ;;  %v1853_v12 = vld [vmem:[#allocation7 + $0x318] sm:$0xff] }
 0x139   : > { %1796 = vmatpush.msrb.mxu2 %v1757_v5  ;;  %v1950_v5 = vld [vmem:[#allocation7 + $0x358] sm:$0xff] }
 0x13a   : > { %1825 = vmatpush.msrb.mxu3 %v1758_v16 }
 0x13b   : > { %1797 = vmatpush.msrb.mxu2 %v1755_v7 }
 0x13c   : > { %1826 = vmatpush.msrb.mxu3 %v1756_v23 }
 0x13d   : > { %5962 = vmatmul.msk.f32.gmra.mxu0 %vm733_vm1, %v1089_v26  ;;  %5966 = vmatmul.msk.f32.gmra.mxu1 %vm733_vm1, %v1087_v17  ;;  %v1660_v17 = vld [vmem:[#allocation7 + $0x280] sm:$0xff] }
 0x13e   : > { %5990 = vmatmul.msk.f32.gmra.mxu2 %vm733_vm1, %v1376_v22  ;;  %5995 = vmatmul.msk.f32.gmra.mxu3 %vm733_vm1, %v1376_v22  ;;  %v7644_v62 = vpop.permute.xlu0 %1476 }
 0x13f   : > { %1798 = vmatpush.msrb.mxu2 %v1753_v10  ;;  %1827 = vmatpush.msrb.mxu3 %v1754_v25 }
 0x145   : > { %5967 = vmatmul.msk.f32.gmra.mxu1 %vm733_vm1, %v1089_v26  ;;  %5979 = vmatmul.msk.f32.vlgmr.msrb.gmra.mxu0 %vm733_vm1, %v7573_v30  ;;  %v1663_v26 = vld [vmem:[#allocation7 + $0x298] sm:$0xff] }
 0x146   : > { %5991 = vmatmul.msk.f32.gmra.mxu2 %vm733_vm1, %v1378_v43  ;;  %5996 = vmatmul.msk.f32.gmra.mxu3 %vm733_vm1, %v1378_v43  ;;  %v1572_v15 = vpop.permute.xlu0 %1571 }
 0x147   : > { %6018 = vmatpush.msk.msrb.mxu0 %vm742_vm0, %v1666_v6  ;;  %v1855_v6 = vld [vmem:[#allocation7 + $0x328] sm:$0xff] }
 0x149   : > { %1699 = vmatpush.msrb.mxu0 %v1664_v9  ;;  %v1948_v9 = vld [vmem:[#allocation7 + $0x348] sm:$0xff] }
 0x14b   : > { %1700 = vmatpush.msrb.mxu0 %v1662_v11 }
 0x14d   : > { %5980 = vmatmul.msk.f32.gmra.mxu0 %vm733_vm1, %v7571_v29  ;;  %5984 = vmatmul.msk.f32.vlgmr.msra.gmra.mxu1 %vm733_vm1, %v7573_v30  ;;  %v1661_v30 = vld [vmem:[#allocation7 + $0x288] sm:$0xff] }
 0x14e   : > { %5992 = vmatmul.msk.f32.gmra.mxu2 %vm733_vm1, %v1380_v52  ;;  %5997 = vmatmul.msk.f32.gmra.mxu3 %vm733_vm1, %v1380_v52  ;;  %v1764_v39 = vpop.permute.xlu0 %1763 }
 0x14f   : > { %1701 = vmatpush.msrb.mxu0 %v1660_v17  ;;  %6023 = vmatpush.msk.msra.mxu1 %vm742_vm0, %v1667_v20  ;;  %v1851_v17 = vld [vmem:[#allocation7 + $0x308] sm:$0xff] }
 0x150   : > { %v7771_v20 = vld [vmem:[%s7324_s0 + $0x4] sm:$0xff] }
 0x151   : > { %1728 = vmatpush.msra.mxu1 %v1665_v24  ;;  %2731 = vrot.lane.b32.xlu1 %v7771_v20, %s7059_s15 }
 0x152   : > { %2828 = vrot.lane.b32.xlu0 %v7771_v20, %s7060_s29 }
 0x153   : > { %1729 = vmatpush.msra.mxu1 %v1663_v26 }
 0x155   : > { %5981 = vmatmul.msk.f32.gmra.mxu0 %vm733_vm1, %v7584_v21  ;;  %5985 = vmatmul.msk.f32.gmra.mxu1 %vm733_vm1, %v7571_v29  ;;  %v1574_v29 = vpop.permute.xlu1 %1573 }
 0x156   : > { %6009 = vmatmul.msk.f32.vlgmr.msra.gmra.mxu2 %vm733_vm1, %v1568_v60  ;;  %6014 = vmatmul.msk.f32.vlgmr.msra.gmra.mxu3 %vm733_vm1, %v1568_v60  ;;  %v1850_v60 = vld [vmem:[#allocation7 + $0x300] sm:$0xff]  ;;  %v7764_v16 = vpop.permute.xlu0 %1860 }
 0x157   : > { %1730 = vmatpush.msra.mxu1 %v1661_v30  ;;  %6048 = vmatpush.msk.msra.mxu2 %vm742_vm0, %v1953_v36  ;;  %v2151_v36 = vld [vmem:[#allocation7 + $0x3f0] sm:$0xf] }
 0x158   : > { %6053 = vmatpush.msk.msra.mxu3 %vm742_vm0, %v1954_v51  ;;  %v2145_v51 = vld [vmem:[#allocation7 + $0x3c0] sm:$0xff] }
 0x15d   : > { %5982 = vmatmul.msk.f32.gmra.mxu0 %vm733_vm1, %v7588_v33  ;;  %5986 = vmatmul.msk.f32.gmra.mxu1 %vm733_vm1, %v7584_v21  ;;  %v7701_v21 = vpop.f32.mrf.mxu3  ;;  %v7735_v43 = vpop.permute.xlu1 %1858 }
 0x15e   : > { %6010 = vmatmul.msk.f32.gmra.mxu2 %vm733_vm1, %v1570_v2  ;;  %6015 = vmatmul.msk.f32.gmra.mxu3 %vm733_vm1, %v1570_v2  ;;  %v1857_v2 = vld [vmem:[#allocation7 + $0x338] sm:$0xf]  ;;  %v7794_v30 = vpop.permute.xlu0 %1864 }
 0x161   : > { %v1024_v35 = vpop.f32.mrf.mxu2 }
 0x162   : > { %v7667_v13 = vpop.f32.mrf.mxu0  ;;  %v7669_v14 = vpop.f32.mrf.mxu1 }
 0x165   : > { %5987 = vmatmul.msk.f32.gmra.mxu1 %vm733_vm1, %v7588_v33  ;;  %5999 = vmatmul.msk.f32.vlgmr.msra.gmra.mxu0 %vm733_vm1, %v7599_v40  ;;  %v7719_v22 = vpop.f32.mrf.mxu3  ;;  %v1768_v10 = vpop.permute.xlu1 %1767 }
 0x166   : > { %6011 = vmatmul.msk.f32.gmra.mxu2 %vm733_vm1, %v1572_v15  ;;  %6016 = vmatmul.msk.f32.gmra.mxu3 %vm733_vm1, %v1572_v15 }
 0x167   : > { %6038 = vmatpush.msk.msra.mxu0 %vm742_vm0, %v1856_v41 }
 0x169   : > { %1893 = vmatpush.msra.mxu0 %v1854_v44  ;;  %v2050_v44 = vld [vmem:[#allocation7 + $0x3b0] sm:$0xf] }
 0x16a   : > { %v7687_v27 = vpop.f32.mrf.mxu0  ;;  %v7689_v28 = vpop.f32.mrf.mxu1 }
 0x16b   : > { %1894 = vmatpush.msra.mxu0 %v1852_v50  ;;  %v2048_v50 = vld [vmem:[#allocation7 + $0x3a0] sm:$0xff] }
 0x16d   : > { %6000 = vmatmul.msk.f32.gmra.mxu0 %vm733_vm1, %v7623_v57  ;;  %6004 = vmatmul.msk.f32.vlgmr.msrb.gmra.mxu1 %vm733_vm1, %v7599_v40  ;;  %v1951_v40 = vld [vmem:[#allocation7 + $0x360] sm:$0xff] }
 0x16e   : > { %6012 = vmatmul.msk.f32.gmra.mxu2 %vm733_vm1, %v1574_v29  ;;  %6017 = vmatmul.msk.f32.gmra.mxu3 %vm733_vm1, %v1574_v29  ;;  %v1956_v29 = vpop.permute.xlu1 %1955 }
 0x16f   : > { %1990 = vmatpush.msra.mxu2 %v1951_v40  ;;  %1895 = vmatpush.msra.mxu0 %v1850_v60 }
 0x170   : > { %6043 = vmatpush.msk.msrb.mxu1 %vm742_vm0, %v1857_v2  ;;  %v842_v2 = vadd.f32 %v7647_v3, %v7687_v27  ;;  %v2051_v3 = vld [vmem:[#allocation7 + $0x3b8] sm:$0xf]  ;;  %v2049_v27 = vld [vmem:[#allocation7 + $0x3a8] sm:$0xff] }
 0x171   : > { %1991 = vmatpush.msra.mxu2 %v1949_v42  ;;  %v2149_v42 = vld [vmem:[#allocation7 + $0x3e0] sm:$0xff] }
 0x172   : > { %v7707_v32 = vpop.f32.mrf.mxu0  ;;  %v7709_v33 = vpop.f32.mrf.mxu1  ;;  %1922 = vmatpush.msrb.mxu1 %v1855_v6 }
 0x173   : > { %1992 = vmatpush.msra.mxu2 %v1947_v45  ;;  %v2147_v45 = vld [vmem:[#allocation7 + $0x3d0] sm:$0xff] }
 0x174   : > { %1923 = vmatpush.msrb.mxu1 %v1853_v12 }
 0x175   : > { %6001 = vmatmul.msk.f32.gmra.mxu0 %vm733_vm1, %v7627_v58  ;;  %6005 = vmatmul.msk.f32.gmra.mxu1 %vm733_vm1, %v7623_v57  ;;  %v1766_v57 = vpop.permute.xlu2 %1765 }
 0x176   : > { %6029 = vmatmul.msk.f32.vlgmr.msrb.gmra.mxu2 %vm733_vm1, %v1762_v34  ;;  %6034 = vmatmul.msk.f32.vlgmr.msrb.gmra.mxu3 %vm733_vm1, %v1762_v34  ;;  %v1960_v6 = vpop.permute.xlu1 %1959 }
 0x177   : > { %1924 = vmatpush.msrb.mxu1 %v1851_v17  ;;  %6068 = vmatpush.msk.msrb.mxu2 %vm742_vm0, %v2151_v36  ;;  %v2047_v36 = vld [vmem:[#allocation7 + $0x398] sm:$0xff] }
 0x179   : > { %2184 = vmatpush.msrb.mxu2 %v2149_v42 }
 0x17a   : > { %v7723_v37 = vpop.f32.mrf.mxu0  ;;  %v7725_v38 = vpop.f32.mrf.mxu1 }
 0x17b   : > { %2185 = vmatpush.msrb.mxu2 %v2147_v45 }
 0x17d   : > { %6002 = vmatmul.msk.f32.gmra.mxu0 %vm733_vm1, %v7644_v62  ;;  %6006 = vmatmul.msk.f32.gmra.mxu1 %vm733_vm1, %v7627_v58  ;;  %v1952_v58 = vld [vmem:[#allocation7 + $0x368] sm:$0xff]  ;;  %v7777_v23 = vpop.permute.xlu2 %1862 }
 0x17e   : > { %6030 = vmatmul.msk.f32.gmra.mxu2 %vm733_vm1, %v1764_v39  ;;  %6035 = vmatmul.msk.f32.gmra.mxu3 %vm733_vm1, %v1764_v39 }
 0x17f   : > { %2019 = vmatpush.msra.mxu3 %v1952_v58  ;;  %2186 = vmatpush.msrb.mxu2 %v2145_v51 }
 0x181   : > { %v7739_v47 = vpop.f32.mrf.mxu2  ;;  %v7741_v49 = vpop.f32.mrf.mxu3  ;;  %2020 = vmatpush.msra.mxu3 %v1950_v5 }
 0x182   : > { %v838_v52 = vpop.f32.mrf.mxu1  ;;  %v927_v53 = vpop.f32.mrf.mxu0 }
 0x183   : > { %v839_v55 = vadd.f32 %v838_v52, %v7667_v13  ;;  %2021 = vmatpush.msra.mxu3 %v1948_v9  ;;  %v7816_v52 = vpop.permute.xlu0 %2052  ;;  %v2150_v9 = vld [vmem:[#allocation7 + $0x3e8] sm:$0xff] }
 0x185   : > { %v968_v63 = vadd.f32 %v927_v53, %v839_v55  ;;  %6007 = vmatmul.msk.f32.gmra.mxu1 %vm733_vm1, %v7644_v62  ;;  %6019 = vmatmul.msk.f32.vlgmr.msrb.gmra.mxu0 %vm733_vm1, %v7490_v54  ;;  %v1958_v41 = vpop.permute.xlu2 %1957  ;;  %v2046_v55 = vld [vmem:[#allocation7 + $0x390] sm:$0xff] }
 0x186   : > { %6031 = vmatmul.msk.f32.gmra.mxu2 %vm733_vm1, %v1766_v57  ;;  %6036 = vmatmul.msk.f32.gmra.mxu3 %vm733_vm1, %v1766_v57  ;;  %v2152_v57 = vld [vmem:[#allocation7 + $0x3f8] sm:$0xf] }
 0x187   : > { %v7753_v7 = vadd.f32 %v1024_v35, %v968_v63  ;;  %6058 = vmatpush.msk.msrb.mxu0 %vm742_vm0, %v2050_v44  ;;  %6073 = vmatpush.msk.msrb.mxu3 %vm742_vm0, %v2152_v57  ;;  %v868_v63 = vadd.f32 %v7631_v59, %v7669_v14  ;;  %v7837_v59 = vld [vmem:[%s7324_s0 + $0x1c] sm:$0xf] }
 0x188   : > { %v2148_v14 = vld [vmem:[#allocation7 + $0x3d8] sm:$0xff]  ;;  %2737 = vrot.lane.b32.xlu0 %v7837_v59, %s7059_s15 }
 0x189   : > { %v7756_v62 = vpop.f32.mrf.mxu2  ;;  %v7758_v11 = vpop.f32.mrf.mxu3  ;;  %2087 = vmatpush.msrb.mxu0 %v2048_v50  ;;  %2213 = vmatpush.msrb.mxu3 %v2150_v9 }
 0x18a   : > { %v7760_v13 = vpop.f32.mrf.mxu0  ;;  %v7762_v15 = vpop.f32.mrf.mxu1 }
 0x18b   : > { %2088 = vmatpush.msrb.mxu0 %v2046_v55  ;;  %v970_v12 = vadd.f32 %v7760_v13, %v842_v2  ;;  %v969_v17 = vadd.f32 %v7762_v15, %v868_v63  ;;  %2214 = vmatpush.msrb.mxu3 %v2148_v14  ;;  %v1962_v50 = vpop.permute.xlu0 %1961  ;;  %v2045_v55 = vld [vmem:[#allocation7 + $0x388] sm:$0xff]  ;;  %v874_v63 = vadd.f32 %v7678_v19, %v7709_v33  ;;  %v2337_v14 = vld [vmem:[#allocation7 + $0x450] sm:$0xff] }
 0x18d   : > { %6020 = vmatmul.msk.f32.gmra.mxu0 %vm733_vm1, %v7480_v48  ;;  %6024 = vmatmul.msk.f32.vlgmr.msra.gmra.mxu1 %vm733_vm1, %v7490_v54  ;;  %v1066_v13 = vadd.f32 %v7719_v22, %v969_v17 }
 0x18e   : > { %6032 = vmatmul.msk.f32.gmra.mxu2 %vm733_vm1, %v1768_v10  ;;  %6037 = vmatmul.msk.f32.gmra.mxu3 %vm733_vm1, %v1768_v10  ;;  %v2044_v10 = vld [vmem:[#allocation7 + $0x380] sm:$0xff] }
 0x18f   : > { %2089 = vmatpush.msrb.mxu0 %v2044_v10  ;;  %6063 = vmatpush.msk.msra.mxu1 %vm742_vm0, %v2051_v3  ;;  %v2244_v3 = vld [vmem:[#allocation7 + $0x430] sm:$0xf] }
 0x190   : > { %2925 = vrot.lane.b32.xlu0 %v7771_v20, %s7061_s17 }
 0x191   : > { %v7781_v24 = vpop.f32.mrf.mxu2  ;;  %v7783_v25 = vpop.f32.mrf.mxu3  ;;  %2116 = vmatpush.msra.mxu1 %v2049_v27  ;;  %v2335_v27 = vld [vmem:[#allocation7 + $0x440] sm:$0xff] }
 0x192   : > { %v7785_v54 = vpop.f32.mrf.mxu0  ;;  %v7787_v26 = vpop.f32.mrf.mxu1 }
 0x193   : > { %2117 = vmatpush.msra.mxu1 %v2047_v36 }
 0x195   : > { %6021 = vmatmul.msk.f32.gmra.mxu0 %vm733_vm1, %v7533_v8  ;;  %6025 = vmatmul.msk.f32.gmra.mxu1 %vm733_vm1, %v7480_v48  ;;  %v7809_v48 = vld [vmem:[%s7324_s0 + $0x14] sm:$0xff] }
 0x196   : > { %6049 = vmatmul.msk.f32.vlgmr.msra.gmra.mxu2 %vm733_vm1, %v1956_v29  ;;  %6054 = vmatmul.msk.f32.vlgmr.msra.gmra.mxu3 %vm733_vm1, %v1956_v29 }
 0x197   : > { %2735 = vrot.lane.b32.xlu1 %v7809_v48, %s7059_s15  ;;  %2118 = vmatpush.msra.mxu1 %v2045_v55 }
 0x198   : > { %2929 = vrot.lane.b32.xlu0 %v7809_v48, %s7061_s17 }
 0x199   : > { %v1218_v34 = vpop.f32.mrf.mxu2  ;;  %v7797_v35 = vpop.f32.mrf.mxu3 }
 0x19a   : > { %v7799_v39 = vpop.f32.mrf.mxu0  ;;  %v7801_v40 = vpop.f32.mrf.mxu1 }
 0x19d   : > { %6022 = vmatmul.msk.f32.gmra.mxu0 %vm733_vm1, %v7509_v1  ;;  %6026 = vmatmul.msk.f32.gmra.mxu1 %vm733_vm1, %v7533_v8 }
 0x19e   : > { %6050 = vmatmul.msk.f32.gmra.mxu2 %vm733_vm1, %v1958_v41  ;;  %6055 = vmatmul.msk.f32.gmra.mxu3 %vm733_vm1, %v1958_v41  ;;  %v845_v41 = vadd.f32 %v7676_v18, %v7707_v32 }
 0x19f   : > { %2832 = vrot.lane.b32.xlu1 %v7809_v48, %s7060_s29 }
 0x1a0   : > { %v972_v51 = vadd.f32 %v7785_v54, %v845_v41  ;;  %3026 = vrot.lane.b32.xlu0 %v7809_v48, %s7062_s1 }
 0x1a1   : > { %v1221_v53 = vpop.f32.mrf.mxu2  ;;  %v7818_v8 = vpop.f32.mrf.mxu3 }
 0x1a2   : > { %v7820_v58 = vpop.f32.mrf.mxu1  ;;  %v1121_v60 = vpop.f32.mrf.mxu0 }
 0x1a3   : > { %v1162_v5 = vadd.f32 %v1121_v60, %v7753_v7  ;;  %v2146_v7 = vld [vmem:[#allocation7 + $0x3c8] sm:$0xff] }
 0x1a4   : > { %2215 = vmatpush.msrb.mxu3 %v2146_v7 }
 0x1a5   : > { %v7830_v29 = vadd.f32 %v1218_v34, %v1162_v5  ;;  %6027 = vmatmul.msk.f32.gmra.mxu1 %vm733_vm1, %v7509_v1  ;;  %6039 = vmatmul.msk.f32.vlgmr.msra.gmra.mxu0 %vm733_vm1, %v7735_v43  ;;  %v1067_v1 = vadd.f32 %v7739_v47, %v970_v12  ;;  %v871_v47 = vadd.f32 %v7649_v4, %v7689_v28  ;;  %v7866_v4 = vld [vmem:[%s7324_s0 + $0xc] sm:$0xff]  ;;  %v2339_v12 = vld [vmem:[#allocation7 + $0x460] sm:$0xff]  ;;  %s5694_s0 = scalar_lea.sflag [#allocation6], %s7320_s24 }
 0x1a6   : > { %6051 = vmatmul.msk.f32.gmra.mxu2 %vm733_vm1, %v1960_v6  ;;  %6056 = vmatmul.msk.f32.gmra.mxu3 %vm733_vm1, %v1960_v6  ;;  %v1069_v28 = vadd.f32 %v7756_v62, %v972_v51  ;;  %v2336_v51 = vld [vmem:[#allocation7 + $0x448] sm:$0xff] }
 0x1a7   : > { %v971_v57 = vadd.f32 %v7787_v26, %v871_v47  ;;  %2733 = vrot.lane.b32.xlu2 %v7866_v4, %s7059_s15  ;;  %2927 = vrot.lane.b32.xlu1 %v7866_v4, %s7061_s17 }
 0x1a8   : > { %6078 = vmatpush.msk.msra.mxu0 %vm742_vm0, %v2244_v3  ;;  %v2438_v3 = vld [vmem:[#allocation7 + $0x4b0] sm:$0xf] }
 0x1a9   : > { %v1224_v15 = vpop.f32.mrf.mxu2  ;;  %v7846_v34 = vpop.f32.mrf.mxu3  ;;  %v1068_v32 = vadd.f32 %v7741_v49, %v971_v57  ;;  %v973_v49 = vadd.f32 %v7801_v40, %v874_v63 }
 0x1aa   : > { %v1124_v42 = vpop.f32.mrf.mxu0  ;;  %v1150_v44 = vpop.f32.mrf.mxu1 }
 0x1ab   : > { %v1164_v45 = vadd.f32 %v1124_v42, %v1067_v1  ;;  %v1163_v22 = vadd.f32 %v1150_v44, %v1066_v13  ;;  %v2240_v13 = vld [vmem:[#allocation7 + $0x410] sm:$0xff]  ;;  %v2340_v42 = vld [vmem:[#allocation7 + $0x468] sm:$0xff]  ;;  %v2238_v44 = vld [vmem:[#allocation7 + $0x400] sm:$0xff] }
 0x1ad   : > { %v7856_v60 = vadd.f32 %v1221_v53, %v1164_v45  ;;  %v7859_v18 = vadd.f32 %v7797_v35, %v1163_v22  ;;  %6040 = vmatmul.msk.f32.gmra.mxu0 %vm733_vm1, %v7764_v16  ;;  %6044 = vmatmul.msk.f32.vlgmr.msrb.gmra.mxu1 %vm733_vm1, %v7735_v43  ;;  %v848_v43 = vadd.f32 %v7699_v31, %v7723_v37  ;;  %v2245_v45 = vld [vmem:[#allocation7 + $0x438] sm:$0xf] }
 0x1ae   : > { %6052 = vmatmul.msk.f32.gmra.mxu2 %vm733_vm1, %v1962_v50  ;;  %6057 = vmatmul.msk.f32.gmra.mxu3 %vm733_vm1, %v1962_v50  ;;  %v1070_v31 = vadd.f32 %v7758_v11, %v973_v49  ;;  %v2338_v22 = vld [vmem:[#allocation7 + $0x458] sm:$0xff]  ;;  %v2243_v50 = vld [vmem:[#allocation7 + $0x428] sm:$0xff] }
 0x1af   : > { %v974_v62 = vadd.f32 %v7799_v39, %v848_v43  ;;  %2830 = vrot.lane.b32.xlu2 %v7866_v4, %s7060_s29  ;;  %3024 = vrot.lane.b32.xlu1 %v7866_v4, %s7062_s1 }
 0x1b0   : > { %6083 = vmatpush.msk.msrb.mxu1 %vm742_vm0, %v2245_v45  ;;  %v2532_v45 = vld [vmem:[#allocation7 + $0x4d8] sm:$0xff] }
 0x1b1   : > { %v1227_v54 = vpop.f32.mrf.mxu2  ;;  %v7876_v26 = vpop.f32.mrf.mxu3  ;;  %v1071_v19 = vadd.f32 %v7781_v24, %v974_v62 }
 0x1b2   : > { %v1127_v35 = vpop.f32.mrf.mxu0  ;;  %v1153_v53 = vpop.f32.mrf.mxu1  ;;  %2310 = vmatpush.msrb.mxu1 %v2243_v50 }
 0x1b3   : > { %v1166_v2 = vadd.f32 %v1127_v35, %v1069_v28  ;;  %v1165_v5 = vadd.f32 %v1153_v53, %v1068_v32  ;;  %v2241_v32 = vld [vmem:[#allocation7 + $0x418] sm:$0xff]  ;;  %v2239_v35 = vld [vmem:[#allocation7 + $0x408] sm:$0xff] }
 0x1b4   : > { %2311 = vmatpush.msrb.mxu1 %v2241_v32 }
 0x1b5   : > { %v7886_v6 = vadd.f32 %v1224_v15, %v1166_v2  ;;  %v7889_v9 = vadd.f32 %v7818_v8, %v1165_v5  ;;  %6041 = vmatmul.msk.f32.gmra.mxu0 %vm733_vm1, %v7777_v23  ;;  %6045 = vmatmul.msk.f32.gmra.mxu1 %vm733_vm1, %v7764_v16  ;;  %v2341_v16 = vld [vmem:[#allocation7 + $0x470] sm:$0xf]  ;;  %v2342_v15 = vld [vmem:[#allocation7 + $0x478] sm:$0xf] }
 0x1b6   : > { %6069 = vmatmul.msk.f32.vlgmr.msrb.gmra.mxu2 %vm733_vm1, %v7619_v56  ;;  %6074 = vmatmul.msk.f32.vlgmr.msrb.gmra.mxu3 %vm733_vm1, %v7619_v56  ;;  %v877_v56 = vadd.f32 %v7701_v21, %v7725_v38  ;;  %v7924_v21 = vpop.permute.xlu2 %2054  ;;  %v7926_v38 = vpop.permute.xlu1 %2056 }
 0x1b7   : > { %6088 = vmatpush.msk.msra.mxu2 %vm742_vm0, %v2341_v16  ;;  %2834 = vrot.lane.b32.xlu2 %v7837_v59, %s7060_s29 }
 0x1b8   : > { %v975_v11 = vadd.f32 %v7820_v58, %v877_v56  ;;  %v2242_v58 = vld [vmem:[#allocation7 + $0x420] sm:$0xff]  ;;  %6093 = vmatpush.msk.msra.mxu3 %vm742_vm0, %v2342_v15  ;;  %3028 = vrot.lane.b32.xlu1 %v7837_v59, %s7062_s1 }
 0x1b9   : > { %v1412_v33 = vpop.f32.mrf.mxu2  ;;  %v7905_v37 = vpop.f32.mrf.mxu3  ;;  %2378 = vmatpush.msra.mxu2 %v2339_v12  ;;  %2281 = vmatpush.msra.mxu0 %v2242_v58 }
 0x1ba   : > { %v1130_v39 = vpop.f32.mrf.mxu0  ;;  %v1156_v40 = vpop.f32.mrf.mxu1  ;;  %2407 = vmatpush.msra.mxu3 %v2340_v42  ;;  %2312 = vmatpush.msrb.mxu1 %v2239_v35 }
 0x1bb   : > { %v1168_v8 = vadd.f32 %v1130_v39, %v1071_v19  ;;  %v1167_v10 = vadd.f32 %v1156_v40, %v1070_v31  ;;  %2379 = vmatpush.msra.mxu2 %v2337_v14  ;;  %2282 = vmatpush.msra.mxu0 %v2240_v13  ;;  %v2531_v14 = vld [vmem:[#allocation7 + $0x4d0] sm:$0xff] }
 0x1bc   : > { %2408 = vmatpush.msra.mxu3 %v2338_v22 }
 0x1bd   : > { %v7913_v24 = vadd.f32 %v1227_v54, %v1168_v8  ;;  %v7916_v17 = vadd.f32 %v7846_v34, %v1167_v10  ;;  %6042 = vmatmul.msk.f32.gmra.mxu0 %vm733_vm1, %v7794_v30  ;;  %6046 = vmatmul.msk.f32.gmra.mxu1 %vm733_vm1, %v7777_v23  ;;  %v1072_v23 = vadd.f32 %v7783_v25, %v975_v11  ;;  %v2533_v10 = vld [vmem:[#allocation7 + $0x4e0] sm:$0xff] }
 0x1be   : > { %6070 = vmatmul.msk.f32.gmra.mxu2 %vm733_vm1, %v7607_v46  ;;  %6075 = vmatmul.msk.f32.gmra.mxu3 %vm733_vm1, %v7607_v46  ;;  %v7956_v55 = vpop.permute.xlu1 %2248 }
 0x1bf   : > { %2380 = vmatpush.msra.mxu2 %v2335_v27  ;;  %2283 = vmatpush.msra.mxu0 %v2238_v44  ;;  %v2439_v44 = vld [vmem:[#allocation7 + $0x4b8] sm:$0xf] }
 0x1c0   : > { %3022 = vrot.lane.b32.xlu2 %v7771_v20, %s7062_s1  ;;  %2409 = vmatpush.msra.mxu3 %v2336_v51 }
 0x1c1   : > { %v1415_v7 = vpop.f32.mrf.mxu2  ;;  %v1444_v1 = vpop.f32.mrf.mxu3 }
 0x1c2   : > { %v1159_v46 = vpop.f32.mrf.mxu1  ;;  %v1315_v34 = vpop.f32.mrf.mxu0 }
 0x1c3   : > { %v1169_v36 = vadd.f32 %v1159_v46, %v1072_v23  ;;  %v1356_v41 = vadd.f32 %v1315_v34, %v7830_v29  ;;  %v7951_v29 = vpop.permute.xlu2 %2058  ;;  %v2434_v23 = vld [vmem:[#allocation7 + $0x490] sm:$0xff]  ;;  %v2534_v34 = vld [vmem:[#allocation7 + $0x4e8] sm:$0xff] }
 0x1c5   : > { %v7941_v25 = vadd.f32 %v7876_v26, %v1169_v36  ;;  %v7943_v47 = vadd.f32 %v1412_v33, %v1356_v41  ;;  %6047 = vmatmul.msk.f32.gmra.mxu1 %vm733_vm1, %v7794_v30  ;;  %6059 = vmatmul.msk.f32.vlgmr.msrb.gmra.mxu0 %vm733_vm1, %v7816_v52  ;;  %v7958_v30 = vpop.permute.xlu0 %2246  ;;  %v2432_v36 = vld [vmem:[#allocation7 + $0x480] sm:$0xff] }
 0x1c6   : > { %6071 = vmatmul.msk.f32.gmra.mxu2 %vm733_vm1, %v7656_v0  ;;  %6076 = vmatmul.msk.f32.gmra.mxu3 %vm733_vm1, %v7656_v0  ;;  %v2344_v19 = vpop.permute.xlu1 %2343 }
 0x1c7   : > { %6098 = vmatpush.msk.msrb.mxu0 %vm742_vm0, %v2438_v3  ;;  %v2636_v3 = vld [vmem:[#allocation7 + $0x530] sm:$0xf] }
 0x1c8   : > { %2931 = vrot.lane.b32.xlu2 %v7837_v59, %s7061_s17 }
 0x1c9   : > { %v1418_v57 = vpop.f32.mrf.mxu2  ;;  %v1447_v28 = vpop.f32.mrf.mxu3 }
 0x1ca   : > { %v1318_v54 = vpop.f32.mrf.mxu0  ;;  %v1344_v26 = vpop.f32.mrf.mxu1 }
 0x1cb   : > { %v1358_v0 = vadd.f32 %v1318_v54, %v7856_v60  ;;  %v1357_v43 = vadd.f32 %v1344_v26, %v7859_v18  ;;  %v7977_v60 = vpop.permute.xlu2 %2250  ;;  %v2433_v26 = vld [vmem:[#allocation7 + $0x488] sm:$0xff] }
 0x1cd   : > { %v7964_v53 = vadd.f32 %v1415_v7, %v1358_v0  ;;  %v7967_v63 = vadd.f32 %v7905_v37, %v1357_v43  ;;  %6060 = vmatmul.msk.f32.gmra.mxu0 %vm733_vm1, %v7924_v21  ;;  %6064 = vmatmul.msk.f32.vlgmr.msra.gmra.mxu1 %vm733_vm1, %v7816_v52  ;;  %v7983_v31 = vpop.permute.xlu0 %2252  ;;  %v2536_v7 = vld [vmem:[#allocation7 + $0x4f8] sm:$0xf] }
 0x1ce   : > { %6072 = vmatmul.msk.f32.gmra.mxu2 %vm733_vm1, %v7638_v61  ;;  %6077 = vmatmul.msk.f32.gmra.mxu3 %vm733_vm1, %v7638_v61  ;;  %v2348_v46 = vpop.permute.xlu1 %2347 }
 0x1cf   : > { %6113 = vmatpush.msk.msrb.mxu3 %vm742_vm0, %v2536_v7  ;;  %6103 = vmatpush.msk.msra.mxu1 %vm742_vm0, %v2439_v44  ;;  %v2726_v44 = vld [vmem:[#allocation7 + $0x558] sm:$0xff] }
 0x1d1   : > { %v1421_v18 = vpop.f32.mrf.mxu2  ;;  %v1450_v2 = vpop.f32.mrf.mxu3  ;;  %2601 = vmatpush.msrb.mxu3 %v2534_v34 }
 0x1d2   : > { %v1321_v5 = vpop.f32.mrf.mxu0  ;;  %v1347_v62 = vpop.f32.mrf.mxu1 }
 0x1d3   : > { %v1360_v49 = vadd.f32 %v1321_v5, %v7886_v6  ;;  %v1359_v52 = vadd.f32 %v1347_v62, %v7889_v9  ;;  %v2535_v9 = vld [vmem:[#allocation7 + $0x4f0] sm:$0xf]  ;;  %v2346_v8 = vpop.permute.xlu2 %2345  ;;  %2602 = vmatpush.msrb.mxu3 %v2532_v45 }
 0x1d4   : > { %6108 = vmatpush.msk.msrb.mxu2 %vm742_vm0, %v2535_v9 }
 0x1d5   : > { %v7985_v33 = vadd.f32 %v1418_v57, %v1360_v49  ;;  %v7987_v61 = vadd.f32 %v1444_v1, %v1359_v52  ;;  %6061 = vmatmul.msk.f32.gmra.mxu0 %vm733_vm1, %v7926_v38  ;;  %6065 = vmatmul.msk.f32.gmra.mxu1 %vm733_vm1, %v7924_v21  ;;  %v2529_v21 = vld [vmem:[#allocation7 + $0x4c0] sm:$0xff] }
 0x1d6   : > { %6089 = vmatmul.msk.f32.vlgmr.msra.gmra.mxu2 %vm733_vm1, %v2344_v19  ;;  %6094 = vmatmul.msk.f32.vlgmr.msra.gmra.mxu3 %vm733_vm1, %v2344_v19 }
 0x1d7   : > { %2572 = vmatpush.msrb.mxu2 %v2533_v10 }
 0x1d9   : > { %v1606_v6 = vpop.f32.mrf.mxu2  ;;  %v7995_v37 = vpop.f32.mrf.mxu3  ;;  %2573 = vmatpush.msrb.mxu2 %v2531_v14  ;;  %v2725_v14 = vld [vmem:[#allocation7 + $0x550] sm:$0xff] }
 0x1da   : > { %v1324_v16 = vpop.f32.mrf.mxu0  ;;  %v1350_v39 = vpop.f32.mrf.mxu1 }
 0x1db   : > { %v1362_v40 = vadd.f32 %v1324_v16, %v7913_v24  ;;  %v1361_v56 = vadd.f32 %v1350_v39, %v7916_v17  ;;  %v8009_v24 = vpop.permute.xlu0 %2440  ;;  %v2436_v17 = vld [vmem:[#allocation7 + $0x4a0] sm:$0xff]  ;;  %2574 = vmatpush.msrb.mxu2 %v2529_v21  ;;  %v8039_v35 = vpop.permute.xlu2 %2442 }
 0x1dc   : > { %2475 = vmatpush.msrb.mxu0 %v2436_v17 }
 0x1dd   : > { %v8000_v12 = vadd.f32 %v1421_v18, %v1362_v40  ;;  %v8002_v11 = vadd.f32 %v1447_v28, %v1361_v56  ;;  %6062 = vmatmul.msk.f32.gmra.mxu0 %vm733_vm1, %v7951_v29  ;;  %6066 = vmatmul.msk.f32.gmra.mxu1 %vm733_vm1, %v7926_v38 }
 0x1de   : > { %6090 = vmatmul.msk.f32.gmra.mxu2 %vm733_vm1, %v2346_v8  ;;  %6095 = vmatmul.msk.f32.gmra.mxu3 %vm733_vm1, %v2346_v8 }
 0x1df   : > { %2476 = vmatpush.msrb.mxu0 %v2434_v23 }
 0x1e1   : > { %v1609_v58 = vpop.f32.mrf.mxu2  ;;  %v1638_v27 = vpop.f32.mrf.mxu3  ;;  %2477 = vmatpush.msrb.mxu0 %v2432_v36  ;;  %v2637_v36 = vld [vmem:[#allocation7 + $0x538] sm:$0xf] }
 0x1e2   : > { %v1353_v38 = vpop.f32.mrf.mxu1  ;;  %v1509_v1 = vpop.f32.mrf.mxu0 }
 0x1e3   : > { %v1363_v13 = vadd.f32 %v1353_v38, %v7941_v25  ;;  %v1550_v15 = vadd.f32 %v1509_v1, %v7943_v47  ;;  %v2437_v25 = vld [vmem:[#allocation7 + $0x4a8] sm:$0xff]  ;;  %v2350_v22 = vpop.permute.xlu0 %2349 }
 0x1e4   : > { %v2530_v47 = vld [vmem:[#allocation7 + $0x4c8] sm:$0xff]  ;;  %2504 = vmatpush.msra.mxu1 %v2437_v25 }
 0x1e5   : > { %v8016_v41 = vadd.f32 %v1450_v2, %v1363_v13  ;;  %v8018_v42 = vadd.f32 %v1606_v6, %v1550_v15  ;;  %6067 = vmatmul.msk.f32.gmra.mxu1 %vm733_vm1, %v7951_v29  ;;  %6079 = vmatmul.msk.f32.vlgmr.msra.gmra.mxu0 %vm733_vm1, %v7958_v30  ;;  %v2435_v29 = vld [vmem:[#allocation7 + $0x498] sm:$0xff]  ;;  %v8056_v6 = vpop.permute.xlu2 %2446  ;;  %v2728_v13 = vld [vmem:[#allocation7 + $0x568] sm:$0xff]  ;;  %v2630_v15 = vld [vmem:[#allocation7 + $0x500] sm:$0xff] }
 0x1e6   : > { %6091 = vmatmul.msk.f32.gmra.mxu2 %vm733_vm1, %v2348_v46  ;;  %6096 = vmatmul.msk.f32.gmra.mxu3 %vm733_vm1, %v2348_v46 }
 0x1e7   : > { %2603 = vmatpush.msrb.mxu3 %v2530_v47  ;;  %2505 = vmatpush.msra.mxu1 %v2435_v29  ;;  %v2633_v47 = vld [vmem:[#allocation7 + $0x518] sm:$0xff] }
 0x1e8   : > { %6118 = vmatpush.msk.msra.mxu0 %vm742_vm0, %v2636_v3 }
 0x1e9   : > { %v1612_v50 = vpop.f32.mrf.mxu2  ;;  %v1641_v51 = vpop.f32.mrf.mxu3  ;;  %2506 = vmatpush.msra.mxu1 %v2433_v26 }
 0x1ea   : > { %v1512_v57 = vpop.f32.mrf.mxu0  ;;  %v1538_v28 = vpop.f32.mrf.mxu1 }
 0x1eb   : > { %v1552_v32 = vadd.f32 %v1512_v57, %v7964_v53  ;;  %v1551_v54 = vadd.f32 %v1538_v28, %v7967_v63  ;;  %v8042_v53 = vpop.permute.xlu1 %2444  ;;  %v2538_v52 = vpop.permute.xlu0 %2537  ;;  %v2631_v57 = vld [vmem:[#allocation7 + $0x508] sm:$0xff] }
 0x1ed   : > { %v8029_v0 = vadd.f32 %v1609_v58, %v1552_v32  ;;  %v8032_v43 = vadd.f32 %v7995_v37, %v1551_v54  ;;  %6080 = vmatmul.msk.f32.gmra.mxu0 %vm733_vm1, %v7956_v55  ;;  %6084 = vmatmul.msk.f32.vlgmr.msrb.gmra.mxu1 %vm733_vm1, %v7958_v30  ;;  %v2632_v58 = vld [vmem:[#allocation7 + $0x510] sm:$0xff]  ;;  %v2542_v1 = vpop.permute.xlu2 %2541 }
 0x1ee   : > { %6092 = vmatmul.msk.f32.gmra.mxu2 %vm733_vm1, %v2350_v22  ;;  %6097 = vmatmul.msk.f32.gmra.mxu3 %vm733_vm1, %v2350_v22 }
 0x1ef   : > { %6123 = vmatpush.msk.msrb.mxu1 %vm742_vm0, %v2637_v36 }
 0x1f1   : > { %v1615_v63 = vpop.f32.mrf.mxu2  ;;  %v1644_v18 = vpop.f32.mrf.mxu3 }
 0x1f2   : > { %v1515_v2 = vpop.f32.mrf.mxu0  ;;  %v1541_v5 = vpop.f32.mrf.mxu1 }
 0x1f3   : > { %v1554_v62 = vadd.f32 %v1515_v2, %v7985_v33  ;;  %v1553_v49 = vadd.f32 %v1541_v5, %v7987_v61  ;;  %v2729_v61 = vld [vmem:[#allocation7 + $0x570] sm:$0xf]  ;;  %v2540_v56 = vpop.permute.xlu1 %2539  ;;  %v2544_v29 = vpop.permute.xlu0 %2543 }
 0x1f4   : > { %6128 = vmatpush.msk.msra.mxu2 %vm742_vm0, %v2729_v61 }
 0x1f5   : > { %v8046_v19 = vadd.f32 %v1612_v50, %v1554_v62  ;;  %v8048_v30 = vadd.f32 %v1638_v27, %v1553_v49  ;;  %6081 = vmatmul.msk.f32.gmra.mxu0 %vm733_vm1, %v7977_v60  ;;  %6085 = vmatmul.msk.f32.gmra.mxu1 %vm733_vm1, %v7956_v55  ;;  %v2727_v55 = vld [vmem:[#allocation7 + $0x560] sm:$0xff]  ;;  %v2730_v27 = vld [vmem:[#allocation7 + $0x578] sm:$0xf] }
 0x1f6   : > { %6109 = vmatmul.msk.f32.vlgmr.msrb.gmra.mxu2 %vm733_vm1, %v2538_v52  ;;  %6114 = vmatmul.msk.f32.vlgmr.msrb.gmra.mxu3 %vm733_vm1, %v2538_v52  ;;  %v2923_v52 = vld [vmem:[#allocation7 + $0x5f0] sm:$0xf] }
 0x1f7   : > { %2766 = vmatpush.msra.mxu2 %v2727_v55  ;;  %6133 = vmatpush.msk.msra.mxu3 %vm742_vm0, %v2730_v27  ;;  %v2917_v55 = vld [vmem:[#allocation7 + $0x5c0] sm:$0xff] }
 0x1f8   : > { %v2820_v27 = vld [vmem:[#allocation7 + $0x580] sm:$0xff] }
 0x1f9   : > { %v1800_v33 = vpop.f32.mrf.mxu2  ;;  %v8058_v37 = vpop.f32.mrf.mxu3  ;;  %2767 = vmatpush.msra.mxu2 %v2725_v14  ;;  %2795 = vmatpush.msra.mxu3 %v2728_v13  ;;  %v2924_v14 = vld [vmem:[#allocation7 + $0x5f8] sm:$0xf] }
 0x1fa   : > { %v1518_v9 = vpop.f32.mrf.mxu0  ;;  %v1544_v16 = vpop.f32.mrf.mxu1 }
 0x1fb   : > { %v1556_v39 = vadd.f32 %v1518_v9, %v8000_v12  ;;  %v1555_v40 = vadd.f32 %v1544_v16, %v8002_v11  ;;  %v2634_v12 = vld [vmem:[#allocation7 + $0x520] sm:$0xff]  ;;  %2796 = vmatpush.msra.mxu3 %v2726_v44  ;;  %v2732_v2 = vpop.permute.xlu1 %2731 }
 0x1fc   : > { %v2723_v11 = vld [vmem:[#allocation7 + $0x540] sm:$0xff]  ;;  %2669 = vmatpush.msra.mxu0 %v2634_v12 }
 0x1fd   : > { %v8063_v8 = vadd.f32 %v1615_v63, %v1556_v39  ;;  %v8065_v10 = vadd.f32 %v1641_v51, %v1555_v40  ;;  %6082 = vmatmul.msk.f32.gmra.mxu0 %vm733_vm1, %v7983_v31  ;;  %6086 = vmatmul.msk.f32.gmra.mxu1 %vm733_vm1, %v7977_v60  ;;  %v2921_v9 = vld [vmem:[#allocation7 + $0x5e0] sm:$0xff]  ;;  %v2826_v39 = vld [vmem:[#allocation7 + $0x5b0] sm:$0xf] }
 0x1fe   : > { %6110 = vmatmul.msk.f32.gmra.mxu2 %vm733_vm1, %v2540_v56  ;;  %6115 = vmatmul.msk.f32.gmra.mxu3 %vm733_vm1, %v2540_v56  ;;  %v2919_v40 = vld [vmem:[#allocation7 + $0x5d0] sm:$0xff]  ;;  %v2824_v56 = vld [vmem:[#allocation7 + $0x5a0] sm:$0xff] }
 0x1ff   : > { %2768 = vmatpush.msra.mxu2 %v2723_v11  ;;  %2670 = vmatpush.msra.mxu0 %v2632_v58  ;;  %v2922_v58 = vld [vmem:[#allocation7 + $0x5e8] sm:$0xff] }
 0x201   : > { %v1803_v17 = vpop.f32.mrf.mxu2  ;;  %v1832_v21 = vpop.f32.mrf.mxu3  ;;  %2671 = vmatpush.msra.mxu0 %v2630_v15  ;;  %6148 = vmatpush.msk.msrb.mxu2 %vm742_vm0, %v2923_v52 }
 0x202   : > { %v1547_v23 = vpop.f32.mrf.mxu1  ;;  %v1703_v7 = vpop.f32.mrf.mxu0 }
 0x203   : > { %v1557_v60 = vadd.f32 %v1547_v23, %v8016_v41  ;;  %v1744_v38 = vadd.f32 %v1703_v7, %v8018_v42  ;;  %v2635_v41 = vld [vmem:[#allocation7 + $0x528] sm:$0xff]  ;;  %v2734_v61 = vpop.permute.xlu2 %2733  ;;  %2960 = vmatpush.msrb.mxu2 %v2921_v9  ;;  %v2827_v7 = vld [vmem:[#allocation7 + $0x5b8] sm:$0xf] }
 0x204   : > { %v2724_v42 = vld [vmem:[#allocation7 + $0x548] sm:$0xff]  ;;  %2698 = vmatpush.msrb.mxu1 %v2635_v41 }
 0x205   : > { %v8077_v46 = vadd.f32 %v1644_v18, %v1557_v60  ;;  %v8079_v34 = vadd.f32 %v1800_v33, %v1744_v38  ;;  %6087 = vmatmul.msk.f32.gmra.mxu1 %vm733_vm1, %v7983_v31  ;;  %6099 = vmatmul.msk.f32.vlgmr.msrb.gmra.mxu0 %vm733_vm1, %v8009_v24  ;;  %v2920_v60 = vld [vmem:[#allocation7 + $0x5d8] sm:$0xff]  ;;  %v2825_v38 = vld [vmem:[#allocation7 + $0x5a8] sm:$0xff] }
 0x206   : > { %6111 = vmatmul.msk.f32.gmra.mxu2 %vm733_vm1, %v2542_v1  ;;  %6116 = vmatmul.msk.f32.gmra.mxu3 %vm733_vm1, %v2542_v1  ;;  %v2918_v1 = vld [vmem:[#allocation7 + $0x5c8] sm:$0xff] }
 0x207   : > { %2797 = vmatpush.msra.mxu3 %v2724_v42  ;;  %2699 = vmatpush.msrb.mxu1 %v2633_v47  ;;  %v2821_v41 = vld [vmem:[#allocation7 + $0x588] sm:$0xff] }
 0x208   : > { %6138 = vmatpush.msk.msrb.mxu0 %vm742_vm0, %v2826_v39  ;;  %2961 = vmatpush.msrb.mxu2 %v2919_v40 }
 0x209   : > { %v1806_v45 = vpop.f32.mrf.mxu2  ;;  %v1835_v25 = vpop.f32.mrf.mxu3  ;;  %2700 = vmatpush.msrb.mxu1 %v2631_v57  ;;  %6153 = vmatpush.msk.msrb.mxu3 %vm742_vm0, %v2924_v14 }
 0x20a   : > { %v1706_v31 = vpop.f32.mrf.mxu0  ;;  %v1732_v22 = vpop.f32.mrf.mxu1  ;;  %2863 = vmatpush.msrb.mxu0 %v2824_v56  ;;  %2962 = vmatpush.msrb.mxu2 %v2917_v55  ;;  %v3015_v56 = vld [vmem:[#allocation7 + $0x608] sm:$0xff] }
 0x20b   : > { %v1746_v50 = vadd.f32 %v1706_v31, %v8029_v0  ;;  %v1745_v51 = vadd.f32 %v1732_v22, %v8032_v43  ;;  %2989 = vmatpush.msrb.mxu3 %v2922_v58  ;;  %v2831_v42 = vpop.permute.xlu2 %2830 }
 0x20d   : > { %v8090_v28 = vadd.f32 %v1803_v17, %v1746_v50  ;;  %v8093_v32 = vadd.f32 %v8058_v37, %v1745_v51  ;;  %6100 = vmatmul.msk.f32.gmra.mxu0 %vm733_vm1, %v8039_v35  ;;  %6104 = vmatmul.msk.f32.vlgmr.msra.gmra.mxu1 %vm733_vm1, %v8009_v24 }
 0x20e   : > { %6112 = vmatmul.msk.f32.gmra.mxu2 %vm733_vm1, %v2544_v29  ;;  %6117 = vmatmul.msk.f32.gmra.mxu3 %vm733_vm1, %v2544_v29 }
 0x20f   : > { %6143 = vmatpush.msk.msra.mxu1 %vm742_vm0, %v2827_v7  ;;  %2990 = vmatpush.msrb.mxu3 %v2920_v60 }
 0x211   : > { %v1809_v54 = vpop.f32.mrf.mxu2  ;;  %v1838_v26 = vpop.f32.mrf.mxu3  ;;  %2892 = vmatpush.msra.mxu1 %v2825_v38  ;;  %2991 = vmatpush.msrb.mxu3 %v2918_v1 }
 0x212   : > { %v1709_v0 = vpop.f32.mrf.mxu0  ;;  %v1735_v43 = vpop.f32.mrf.mxu1 }
 0x213   : > { %v1748_v63 = vadd.f32 %v1709_v0, %v8046_v19  ;;  %v1747_v18 = vadd.f32 %v1735_v43, %v8048_v30  ;;  %v2835_v50 = vpop.permute.xlu2 %2834 }
 0x215   : > { %v8103_v5 = vadd.f32 %v1806_v45, %v1748_v63  ;;  %v8105_v62 = vadd.f32 %v1832_v21, %v1747_v18  ;;  %6101 = vmatmul.msk.f32.gmra.mxu0 %vm733_vm1, %v8042_v53  ;;  %6105 = vmatmul.msk.f32.gmra.mxu1 %vm733_vm1, %v8039_v35  ;;  %v2736_v21 = vpop.permute.xlu1 %2735  ;;  %v3016_v18 = vld [vmem:[#allocation7 + $0x610] sm:$0xff] }
 0x216   : > { %6129 = vmatmul.msk.f32.vlgmr.msra.gmra.mxu2 %vm733_vm1, %v2732_v2  ;;  %6134 = vmatmul.msk.f32.vlgmr.msra.gmra.mxu3 %vm733_vm1, %v2732_v2 }
 0x219   : > { %v8113_v24 = vpop.f32.mrf.mxu2  ;;  %v8115_v49 = vpop.f32.mrf.mxu3 }
 0x21a   : > { %v1712_v19 = vpop.f32.mrf.mxu0  ;;  %v1738_v30 = vpop.f32.mrf.mxu1 }
 0x21b   : > { %v1750_v33 = vadd.f32 %v1712_v19, %v8063_v8  ;;  %v1749_v37 = vadd.f32 %v1738_v30, %v8065_v10  ;;  %v8130_v8 = vpop.permute.xlu0 %2828  ;;  %v3023_v63 = vpop.permute.xlu2 %3022  ;;  %v3014_v19 = vld [vmem:[#allocation7 + $0x600] sm:$0xff]  ;;  %v3021_v30 = vld [vmem:[#allocation7 + $0x638] sm:$0xf] }
 0x21d   : > { %v8120_v35 = vadd.f32 %v1809_v54, %v1750_v33  ;;  %v8122_v16 = vadd.f32 %v1835_v25, %v1749_v37  ;;  %6102 = vmatmul.msk.f32.gmra.mxu0 %vm733_vm1, %v8056_v6  ;;  %6106 = vmatmul.msk.f32.gmra.mxu1 %vm733_vm1, %v8042_v53  ;;  %v2822_v53 = vld [vmem:[#allocation7 + $0x590] sm:$0xff]  ;;  %v2833_v25 = vpop.permute.xlu1 %2832  ;;  %v3019_v33 = vld [vmem:[#allocation7 + $0x628] sm:$0xff] }
 0x21e   : > { %6130 = vmatmul.msk.f32.gmra.mxu2 %vm733_vm1, %v2734_v61  ;;  %6135 = vmatmul.msk.f32.gmra.mxu3 %vm733_vm1, %v2734_v61  ;;  %v3017_v61 = vld [vmem:[#allocation7 + $0x618] sm:$0xff] }
 0x21f   : > { %2864 = vmatpush.msrb.mxu0 %v2822_v53 }
 0x221   : > { %v8133_v10 = vpop.f32.mrf.mxu2  ;;  %v8135_v3 = vpop.f32.mrf.mxu3  ;;  %2865 = vmatpush.msrb.mxu0 %v2820_v27 }
 0x222   : > { %v1741_v12 = vpop.f32.mrf.mxu1  ;;  %v8137_v11 = vpop.f32.mrf.mxu0 }
 0x223   : > { %v1751_v17 = vadd.f32 %v1741_v12, %v8077_v46  ;;  %v2738_v15 = vpop.permute.xlu0 %2737  ;;  %v2932_v40 = vpop.permute.xlu2 %2931 }
 0x225   : > { %v8141_v23 = vadd.f32 %v1838_v26, %v1751_v17  ;;  %6107 = vmatmul.msk.f32.gmra.mxu1 %vm733_vm1, %v8056_v6  ;;  %6119 = vmatmul.msk.f32.vlgmr.msra.gmra.mxu0 %vm733_vm1, %v7771_v20  ;;  %v2823_v6 = vld [vmem:[#allocation7 + $0x598] sm:$0xff]  ;;  %v2928_v54 = vpop.permute.xlu1 %2927  ;;  %v3018_v26 = vld [vmem:[#allocation7 + $0x620] sm:$0xff] }
 0x226   : > { %6131 = vmatmul.msk.f32.gmra.mxu2 %vm733_vm1, %v2736_v21  ;;  %6136 = vmatmul.msk.f32.gmra.mxu3 %vm733_vm1, %v2736_v21 }
 0x227   : > { %2893 = vmatpush.msra.mxu1 %v2823_v6 }
 0x229   : > { %v8150_v13 = vpop.f32.mrf.mxu2  ;;  %v8156_v44 = vpop.f32.mrf.mxu3  ;;  %2894 = vmatpush.msra.mxu1 %v2821_v41 }
 0x22a   : > { %v8152_v46 = vpop.f32.mrf.mxu0  ;;  %v8154_v36 = vpop.f32.mrf.mxu1 }
 0x22b   : > { %v2926_v22 = vpop.permute.xlu0 %2925 }
 0x22d   : > { %6120 = vmatmul.msk.f32.gmra.mxu0 %vm733_vm1, %v7866_v4  ;;  %6124 = vmatmul.msk.f32.vlgmr.msrb.gmra.mxu1 %vm733_vm1, %v7771_v20  ;;  %v3025_v38 = vpop.permute.xlu1 %3024 }
 0x22e   : > { %6132 = vmatmul.msk.f32.gmra.mxu2 %vm733_vm1, %v2738_v15  ;;  %6137 = vmatmul.msk.f32.gmra.mxu3 %vm733_vm1, %v2738_v15 }
 0x22f   : > { %6163 = vmatpush.msk.msrb.mxu1 %vm742_vm0, %v3021_v30 }
 0x231   : > { %v8164_v45 = vpop.f32.mrf.mxu2  ;;  %v8174_v20 = vpop.f32.mrf.mxu3  ;;  %3086 = vmatpush.msrb.mxu1 %v3019_v33 }
 0x232   : > { %v8166_v47 = vpop.f32.mrf.mxu0  ;;  %v8168_v31 = vpop.f32.mrf.mxu1 }
 0x233   : > { %3087 = vmatpush.msrb.mxu1 %v3017_v61 }
 0x235   : > { %6121 = vmatmul.msk.f32.gmra.mxu0 %vm733_vm1, %v7809_v48  ;;  %6125 = vmatmul.msk.f32.gmra.mxu1 %vm733_vm1, %v7866_v4  ;;  %v3020_v4 = vld [vmem:[#allocation7 + $0x630] sm:$0xf] }
 0x236   : > { %6149 = vmatmul.msk.f32.vlgmr.msrb.gmra.mxu2 %vm733_vm1, %v2926_v22  ;;  %6154 = vmatmul.msk.f32.vlgmr.msrb.gmra.mxu3 %vm733_vm1, %v2926_v22 }
 0x237   : > { %6158 = vmatpush.msk.msra.mxu0 %vm742_vm0, %v3020_v4  ;;  %3088 = vmatpush.msrb.mxu1 %v3015_v56 }
 0x239   : > { %v8178_v51 = vpop.f32.mrf.mxu2  ;;  %v8190_v0 = vpop.f32.mrf.mxu3  ;;  %3057 = vmatpush.msra.mxu0 %v3018_v26 }
 0x23a   : > { %v8180_v29 = vpop.f32.mrf.mxu0  ;;  %v8182_v57 = vpop.f32.mrf.mxu1 }
 0x23b   : > { %3058 = vmatpush.msra.mxu0 %v3016_v18 }
 0x23d   : > { %6122 = vmatmul.msk.f32.gmra.mxu0 %vm733_vm1, %v7837_v59  ;;  %6126 = vmatmul.msk.f32.gmra.mxu1 %vm733_vm1, %v7809_v48  ;;  %v2930_v48 = vpop.permute.xlu0 %2929 }
 0x23e   : > { %6150 = vmatmul.msk.f32.gmra.mxu2 %vm733_vm1, %v2928_v54  ;;  %6155 = vmatmul.msk.f32.gmra.mxu3 %vm733_vm1, %v2928_v54  ;;  %v3029_v54 = vpop.permute.xlu1 %3028 }
 0x23f   : > { %3059 = vmatpush.msra.mxu0 %v3014_v19 }
 0x241   : > { %v8193_v43 = vpop.f32.mrf.mxu2  ;;  %v8206_v37 = vpop.f32.mrf.mxu3 }
 0x242   : > { %v8195_v2 = vpop.f32.mrf.mxu1  ;;  %v8197_v52 = vpop.f32.mrf.mxu0 }
 0x245   : > { %6127 = vmatmul.msk.f32.gmra.mxu1 %vm733_vm1, %v7837_v59  ;;  %6139 = vmatmul.msk.f32.vlgmr.msrb.gmra.mxu0 %vm733_vm1, %v8130_v8  ;;  %v3027_v41 = vpop.permute.xlu0 %3026 }
 0x246   : > { %6151 = vmatmul.msk.f32.gmra.mxu2 %vm733_vm1, %v2930_v48  ;;  %6156 = vmatmul.msk.f32.gmra.mxu3 %vm733_vm1, %v2930_v48 }
 0x249   : > { %v8212_v59 = vpop.f32.mrf.mxu2  ;;  %v8223_v14 = vpop.f32.mrf.mxu3 }
 0x24a   : > { %v8208_v9 = vpop.f32.mrf.mxu0  ;;  %v8210_v39 = vpop.f32.mrf.mxu1 }
 0x24d   : > { %6140 = vmatmul.msk.f32.gmra.mxu0 %vm733_vm1, %v2831_v42  ;;  %6144 = vmatmul.msk.f32.vlgmr.msra.gmra.mxu1 %vm733_vm1, %v8130_v8 }
 0x24e   : > { %6152 = vmatmul.msk.f32.gmra.mxu2 %vm733_vm1, %v2932_v40  ;;  %6157 = vmatmul.msk.f32.gmra.mxu3 %vm733_vm1, %v2932_v40 }
 0x251   : > { %v8227_v12 = vpop.f32.mrf.mxu2  ;;  %v8235_v21 = vpop.f32.mrf.mxu3 }
 0x252   : > { %v8219_v55 = vpop.f32.mrf.mxu0  ;;  %v8221_v53 = vpop.f32.mrf.mxu1 }
 0x255   : > { %6141 = vmatmul.msk.f32.gmra.mxu0 %vm733_vm1, %v2833_v25  ;;  %6145 = vmatmul.msk.f32.gmra.mxu1 %vm733_vm1, %v2831_v42 }
 0x259   : > { %v8237_v58 = vpop.f32.mrf.mxu2  ;;  %v8245_v60 = vpop.f32.mrf.mxu3 }
 0x25a   : > { %v8229_v17 = vpop.f32.mrf.mxu0  ;;  %v8231_v8 = vpop.f32.mrf.mxu1  ;;  %9094 = vst [vmem:[#allocation37_spill] sm:$0xff] %v8245_v60 }
 0x25d   : > { %6142 = vmatmul.msk.f32.gmra.mxu0 %vm733_vm1, %v2835_v50  ;;  %6146 = vmatmul.msk.f32.gmra.mxu1 %vm733_vm1, %v2833_v25 }
 0x261   : > { %v8247_v1 = vpop.f32.mrf.mxu2  ;;  %v8255_v42 = vpop.f32.mrf.mxu3 }
 0x262   : > { %v8239_v27 = vpop.f32.mrf.mxu1  ;;  %v8241_v7 = vpop.f32.mrf.mxu0  ;;  %9096 = vst [vmem:[#allocation39_spill] sm:$0xff] %v8255_v42 }
 0x265   : > { %6147 = vmatmul.msk.f32.gmra.mxu1 %vm733_vm1, %v2835_v50  ;;  %6159 = vmatmul.msk.f32.vlgmr.msra.gmra.mxu0 %vm733_vm1, %v3023_v63 }
 0x269   : > { %v8261_v50 = vpop.f32.mrf.mxu2  ;;  %v8269_v18 = vpop.f32.mrf.mxu3 }
 0x26a   : > { %v8249_v15 = vpop.f32.mrf.mxu0  ;;  %v8251_v6 = vpop.f32.mrf.mxu1  ;;  %9097 = vst [vmem:[#allocation40_spill] sm:$0xff] %v8269_v18 }
 0x26b   : > { %9095 = vst [vmem:[#allocation38_spill] sm:$0xff] %v8251_v6 }
 0x26d   : > { %6160 = vmatmul.msk.f32.gmra.mxu0 %vm733_vm1, %v3025_v38  ;;  %6164 = vmatmul.msk.f32.vlgmr.msrb.gmra.mxu1 %vm733_vm1, %v3023_v63 }
 0x271   : > { %v8271_v63 = vpop.f32.mrf.mxu2  ;;  %v8279_v30 = vpop.f32.mrf.mxu3 }
 0x272   : > { %v8257_v25 = vpop.f32.mrf.mxu0  ;;  %v8259_v22 = vpop.f32.mrf.mxu1  ;;  %9100 = vst [vmem:[#allocation43_spill] sm:$0xff] %v8279_v30 }
 0x275   : > { %6161 = vmatmul.msk.f32.gmra.mxu0 %vm733_vm1, %v3027_v41  ;;  %6165 = vmatmul.msk.f32.gmra.mxu1 %vm733_vm1, %v3025_v38 }
 0x279   : > { %v8282_v33 = vpop.f32.mrf.mxu2  ;;  %v8288_v56 = vpop.f32.mrf.mxu3 }
 0x27a   : > { %v8265_v4 = vpop.f32.mrf.mxu0  ;;  %v8267_v26 = vpop.f32.mrf.mxu1  ;;  %9101 = vst [vmem:[#allocation44_spill] sm:$0xff] %v8282_v33 }
 0x27b   : > { %9103 = vst [vmem:[#allocation46_spill] sm:$0xff] %v8288_v56 }
 0x27d   : > { %6162 = vmatmul.msk.f32.gmra.mxu0 %vm733_vm1, %v3029_v54  ;;  %6166 = vmatmul.msk.f32.gmra.mxu1 %vm733_vm1, %v3027_v41 }
 0x281   : > { %v8290_v38 = vpop.f32.mrf.mxu2  ;;  %v8296_v42 = vpop.f32.mrf.mxu3 }
 0x282   : > { %v8275_v48 = vpop.f32.mrf.mxu1  ;;  %v8277_v19 = vpop.f32.mrf.mxu0  ;;  %9104 = vst [vmem:[#allocation47_spill] sm:$0xff] %v8290_v38 }
 0x283   : > { %9098 = vst [vmem:[#allocation41_spill] sm:$0xff] %v8275_v48 }
 0x284   : > { %9099 = vst [vmem:[#allocation42_spill] sm:$0xff] %v8277_v19 }
 0x285   : > { %6167 = vmatmul.msk.f32.gmra.mxu1 %vm733_vm1, %v3029_v54  ;;  %9106 = vst [vmem:[#allocation49_spill] sm:$0xff] %v8296_v42 }
 0x289   : > { %v8302_v54 = vpop.f32.mrf.mxu2 }
 0x28a   : > { %v8284_v61 = vpop.f32.mrf.mxu0  ;;  %v8286_v40 = vpop.f32.mrf.mxu1  ;;  %9108 = vst [vmem:[#allocation51_spill] sm:$0xff] %v8302_v54 }
 0x28b   : > { %9102 = vst [vmem:[#allocation45_spill] sm:$0xff] %v8286_v40  ;;  %v8308_v40 = vpop.f32.mrf.mxu3 }
 0x28c   : > { %9111 = vst [vmem:[#allocation54_spill] sm:$0xff] %v8308_v40 }
 0x291   : > { %v8310_v56 = vpop.f32.mrf.mxu2 }
 0x292   : > { %v8292_v60 = vpop.f32.mrf.mxu0  ;;  %v8294_v41 = vpop.f32.mrf.mxu1  ;;  %9112 = vst [vmem:[#allocation55_spill] sm:$0xff] %v8310_v56 }
 0x293   : > { %9105 = vst [vmem:[#allocation48_spill] sm:$0xff] %v8294_v41  ;;  %v8316_v41 = vpop.f32.mrf.mxu3 }
 0x294   : > { %9115 = vst [vmem:[#allocation58_spill] sm:$0xff] %v8316_v41 }
 0x299   : > { %v8318_v42 = vpop.f32.mrf.mxu2 }
 0x29a   : > { %v8298_v18 = vpop.f32.mrf.mxu0  ;;  %v8300_v30 = vpop.f32.mrf.mxu1  ;;  %9116 = vst [vmem:[#allocation59_spill] sm:$0xff] %v8318_v42 }
 0x29b   : > { %9107 = vst [vmem:[#allocation50_spill] sm:$0xff] %v8300_v30  ;;  %v8324_v54 = vpop.f32.mrf.mxu3 }
 0x29c   : > { %9119 = vst [vmem:[#allocation62_spill] sm:$0xff] %v8324_v54 }
 0x2a2   : > { %v8304_v33 = vpop.f32.mrf.mxu1  ;;  %v8306_v6 = vpop.f32.mrf.mxu0 }
 0x2a3   : > { %9109 = vst [vmem:[#allocation52_spill] sm:$0xff] %v8304_v33  ;;  %v8326_v33 = vpop.f32.mrf.mxu2  ;;  %v8332_v56 = vpop.f32.mrf.mxu3 }
 0x2a4   : > { %9110 = vst [vmem:[#allocation53_spill] sm:$0xff] %v8306_v6 }
 0x2a5   : > { %9120 = vst [vmem:[#allocation63_spill] sm:$0xff] %v8326_v33 }
 0x2a6   : > { %9123 = vst [vmem:[#allocation66_spill] sm:$0xff] %v8332_v56  ;;  %v1942_v56 = vadd.f32 %v8166_v47, %v8103_v5 }
 0x2aa   : > { %v8312_v38 = vpop.f32.mrf.mxu0  ;;  %v8314_v19 = vpop.f32.mrf.mxu1 }
 0x2ab   : > { %9113 = vst [vmem:[#allocation56_spill] sm:$0xff] %v8312_v38  ;;  %v8338_v41 = vpop.f32.mrf.mxu2 }
 0x2ac   : > { %9114 = vst [vmem:[#allocation57_spill] sm:$0xff] %v8314_v19 }
 0x2b2   : > { %v8320_v48 = vpop.f32.mrf.mxu0  ;;  %v8322_v30 = vpop.f32.mrf.mxu1 }
 0x2b3   : > { %9117 = vst [vmem:[#allocation60_spill] sm:$0xff] %v8320_v48  ;;  %v8346_v54 = vpop.f32.mrf.mxu2 }
 0x2b4   : > { %9118 = vst [vmem:[#allocation61_spill] sm:$0xff] %v8322_v30  ;;  %v8344_v30 = vpop.f32.mrf.mxu3 }
 0x2b5   : > { %9128 = vst [vmem:[#allocation71_spill] sm:$0xff] %v8344_v30  ;;  %v1938_v30 = vadd.f32 %v8137_v11, %v8079_v34  ;;  %v1941_v11 = vadd.f32 %v8168_v31, %v8105_v62 }
 0x2ba   : > { %v8328_v6 = vpop.f32.mrf.mxu0  ;;  %v8330_v40 = vpop.f32.mrf.mxu1 }
 0x2bb   : > { %9121 = vst [vmem:[#allocation64_spill] sm:$0xff] %v8328_v6 }
 0x2bc   : > { %9122 = vst [vmem:[#allocation65_spill] sm:$0xff] %v8330_v40  ;;  %v2039_v40 = vadd.f32 %v8150_v13, %v1942_v56  ;;  %v1945_v13 = vadd.f32 %v8195_v2, %v8141_v23  ;;  %v2038_v23 = vadd.f32 %v8135_v3, %v1941_v11 }
 0x2be   : > { %v2042_v2 = vadd.f32 %v8174_v20, %v1945_v13  ;;  %v9140_v13 = vld [vmem:[#allocation43_spill] sm:$0xff] }
 0x2c0   : > { %v2139_v3 = vadd.f32 %v8239_v27, %v2042_v2 }
 0x2c2   : > { %v8334_v38 = vpop.f32.mrf.mxu1  ;;  %v8336_v19 = vpop.f32.mrf.mxu0 }
 0x2c3   : > { %9124 = vst [vmem:[#allocation67_spill] sm:$0xff] %v8334_v38  ;;  %v8354_v38 = vpop.f32.mrf.mxu3 }
 0x2c4   : > { %9125 = vst [vmem:[#allocation68_spill] sm:$0xff] %v8336_v19  ;;  %v1940_v19 = vadd.f32 %v8152_v46, %v8090_v28  ;;  %v2136_v28 = vadd.f32 %v8219_v55, %v2039_v40  ;;  %v2035_v46 = vadd.f32 %v8113_v24, %v1938_v30  ;;  %v1939_v24 = vadd.f32 %v8154_v36, %v8093_v32 }
 0x2c6   : > { %v2037_v5 = vadd.f32 %v8133_v10, %v1940_v19  ;;  %v2132_v10 = vadd.f32 %v8197_v52, %v2035_v46 }
 0x2c8   : > { %v2229_v32 = vadd.f32 %v8178_v51, %v2132_v10 }
 0x2ca   : > { %v8340_v42 = vpop.f32.mrf.mxu0  ;;  %v8342_v48 = vpop.f32.mrf.mxu1  ;;  %v2326_v20 = vadd.f32 %v8241_v7, %v2229_v32  ;;  %v9145_v32 = vld [vmem:[#allocation37_spill] sm:$0xff] }
 0x2cb   : > { %9126 = vst [vmem:[#allocation69_spill] sm:$0xff] %v8340_v42  ;;  %v1944_v42 = vadd.f32 %v8180_v29, %v8120_v35  ;;  %v1943_v35 = vadd.f32 %v8182_v57, %v8122_v16  ;;  %v2134_v29 = vadd.f32 %v8208_v9, %v2037_v5  ;;  %v8383_v55 = vpop.f32.mrf.mxu3 }
 0x2cc   : > { %9127 = vst [vmem:[#allocation70_spill] sm:$0xff] %v8342_v48  ;;  %v8360_v48 = vpop.f32.mrf.mxu2  ;;  %v2423_v27 = vadd.f32 %v8237_v58, %v2326_v20  ;;  %v9133_v58 = vld [vmem:[#allocation51_spill] sm:$0xff] }
 0x2cd   : > { %v2041_v47 = vadd.f32 %v8164_v45, %v1944_v42  ;;  %v2233_v45 = vadd.f32 %v8212_v59, %v2136_v28  ;;  %v2040_v16 = vadd.f32 %v8156_v44, %v1943_v35  ;;  %v2231_v57 = vadd.f32 %v8193_v43, %v2134_v29  ;;  %v9136_v28 = vld [vmem:[#allocation47_spill] sm:$0xff]  ;;  %v9138_v29 = vld [vmem:[#allocation60_spill] sm:$0xff] }
 0x2ce   : > { %v9137_v35 = vld [vmem:[#allocation55_spill] sm:$0xff] }
 0x2cf   : > { %v2138_v34 = vadd.f32 %v8229_v17, %v2041_v47  ;;  %v2330_v62 = vadd.f32 %v8257_v25, %v2233_v45  ;;  %v2137_v36 = vadd.f32 %v8231_v8, %v2040_v16  ;;  %v2328_v44 = vadd.f32 %v8249_v15, %v2231_v57  ;;  %v9135_v47 = vld [vmem:[#allocation40_spill] sm:$0xff]  ;;  %v9142_v16 = vld [vmem:[#allocation50_spill] sm:$0xff] }
 0x2d0   : > { %v2135_v17 = vadd.f32 %v8221_v53, %v2038_v23  ;;  %v2236_v53 = vadd.f32 %v8235_v21, %v2139_v3  ;;  %v9132_v21 = vld [vmem:[#allocation42_spill] sm:$0xff]  ;;  %v9141_v45 = vld [vmem:[#allocation44_spill] sm:$0xff]  ;;  %v9148_v3 = vld [vmem:[#allocation53_spill] sm:$0xff] }
 0x2d1   : > { %v2235_v9 = vadd.f32 %v8227_v12, %v2138_v34  ;;  %v2036_v12 = vadd.f32 %v8115_v49, %v1939_v24  ;;  %v2427_v42 = vadd.f32 %v8261_v50, %v2330_v62  ;;  %v2234_v51 = vadd.f32 %v8223_v14, %v2137_v36  ;;  %v9139_v34 = vld [vmem:[#allocation39_spill] sm:$0xff]  ;;  %v9144_v23 = vld [vmem:[#allocation64_spill] sm:$0xff] }
 0x2d2   : > { %v8348_v33 = vpop.f32.mrf.mxu0  ;;  %v8350_v6 = vpop.f32.mrf.mxu1  ;;  %v2425_v8 = vadd.f32 %v8247_v1, %v2328_v44  ;;  %v2232_v49 = vadd.f32 %v8206_v37, %v2135_v17  ;;  %v2520_v40 = vadd.f32 %v9132_v21, %v2423_v27  ;;  %v9146_v44 = vld [vmem:[#allocation48_spill] sm:$0xff] }
 0x2d3   : > { %9129 = vst [vmem:[#allocation72_spill] sm:$0xff] %v8348_v33  ;;  %v2332_v43 = vadd.f32 %v8265_v4, %v2235_v9  ;;  %v2133_v25 = vadd.f32 %v8210_v39, %v2036_v12  ;;  %v2524_v4 = vadd.f32 %v8292_v60, %v2427_v42  ;;  %v2331_v7 = vadd.f32 %v8267_v26, %v2234_v51  ;;  %v8419_v19 = vpop.f32.mrf.mxu3  ;;  %v9134_v26 = vld [vmem:[#allocation38_spill] sm:$0xff]  ;;  %v9143_v9 = vld [vmem:[#allocation56_spill] sm:$0xff] }
 0x2d4   : > { %9130 = vst [vmem:[#allocation73_spill] sm:$0xff] %v8350_v6  ;;  %v8391_v31 = vpop.f32.mrf.mxu2  ;;  %v2522_v50 = vadd.f32 %v8284_v61, %v2425_v8  ;;  %v2329_v1 = vadd.f32 %v8259_v22, %v2232_v49  ;;  %v2617_v24 = vadd.f32 %v9141_v45, %v2520_v40  ;;  %v9147_v12 = vld [vmem:[#allocation52_spill] sm:$0xff]  ;;  %v9155_v40 = vld [vmem:[#allocation59_spill] sm:$0xff] }
 0x2d5   : > { %v2429_v15 = vadd.f32 %v8271_v63, %v2332_v43  ;;  %v2230_v14 = vadd.f32 %v8190_v0, %v2133_v25  ;;  %v9131_v63 = vld [vmem:[#allocation41_spill] sm:$0xff]  ;;  %v2621_v56 = vadd.f32 %v9133_v58, %v2524_v4  ;;  %v9150_v4 = vld [vmem:[#allocation54_spill] sm:$0xff] }
 0x2d6   : > { %v2333_v60 = vadd.f32 %v9131_v63, %v2236_v53  ;;  %v2619_v46 = vadd.f32 %v9136_v28, %v2522_v50  ;;  %v2426_v11 = vadd.f32 %v9139_v34, %v2329_v1  ;;  %v2714_v20 = vadd.f32 %v9148_v3, %v2617_v24  ;;  %v9149_v25 = vld [vmem:[#allocation45_spill] sm:$0xff]  ;;  %v9151_v53 = vld [vmem:[#allocation63_spill] sm:$0xff]  ;;  %v9154_v63 = vld [vmem:[#allocation58_spill] sm:$0xff] }
 0x2d7   : > { %v2526_v39 = vadd.f32 %v8298_v18, %v2429_v15  ;;  %v2327_v5 = vadd.f32 %v9134_v26, %v2230_v14  ;;  %v2428_v18 = vadd.f32 %v9135_v47, %v2331_v7  ;;  %v2718_v22 = vadd.f32 %v9138_v29, %v2621_v56  ;;  %v9153_v14 = vld [vmem:[#allocation49_spill] sm:$0xff]  ;;  %v9163_v24 = vld [vmem:[#allocation71_spill] sm:$0xff]  ;;  %v9165_v3 = vld [vmem:[#allocation62_spill] sm:$0xff] }
 0x2d8   : > { %v2430_v10 = vadd.f32 %v9140_v13, %v2333_v60  ;;  %v2716_v62 = vadd.f32 %v9143_v9, %v2619_v46  ;;  %v2523_v43 = vadd.f32 %v9146_v44, %v2426_v11  ;;  %v2811_v58 = vadd.f32 %v9155_v40, %v2714_v20  ;;  %v9157_v26 = vld [vmem:[#allocation69_spill] sm:$0xff] }
 0x2d9   : > { %v2623_v0 = vadd.f32 %v9137_v35, %v2526_v39  ;;  %v2525_v57 = vadd.f32 %v9142_v16, %v2428_v18  ;;  %v2424_v36 = vadd.f32 %v9145_v32, %v2327_v5  ;;  %v2815_v42 = vadd.f32 %v8338_v41, %v2718_v22  ;;  %v9156_v41 = vld [vmem:[#allocation65_spill] sm:$0xff]  ;;  %v9158_v18 = vld [vmem:[#allocation46_spill] sm:$0xff]  ;;  %v9161_v22 = vld [vmem:[#allocation68_spill] sm:$0xff] }
 0x2da   : > { %v8365_v33 = vpop.f32.mrf.mxu0  ;;  %v8367_v6 = vpop.f32.mrf.mxu1  ;;  %v2527_v17 = vadd.f32 %v9147_v12, %v2430_v10  ;;  %v2813_v27 = vadd.f32 %v9151_v53, %v2716_v62  ;;  %v9152_v50 = vld [vmem:[#allocation72_spill] sm:$0xff]  ;;  %v2620_v1 = vadd.f32 %v9153_v14, %v2523_v43  ;;  %v9159_v46 = vld [vmem:[#allocation61_spill] sm:$0xff]  ;;  %v2908_v34 = vadd.f32 %v9161_v22, %v2811_v58 }
 0x2db   : > { %v2720_v2 = vadd.f32 %v9144_v23, %v2623_v0  ;;  %v2521_v51 = vadd.f32 %v9149_v25, %v2424_v36  ;;  %v2622_v49 = vadd.f32 %v9150_v4, %v2525_v57  ;;  %v2912_v39 = vadd.f32 %v9152_v50, %v2815_v42  ;;  %v2999_v21 = vpop.f32.mrf.mxu3  ;;  %v3110_v13 = vld [vmem:[#allocation9] sm:$0x3]  ;;  %v3198_v22 = vld [vmem:[#allocation12 + $0x30] sm:$0xff] }
 0x2dc   : > { %v2970_v61 = vpop.f32.mrf.mxu2  ;;  %v2624_v60 = vadd.f32 %v9154_v63, %v2527_v17  ;;  %v2910_v5 = vadd.f32 %v9157_v26, %v2813_v27  ;;  %v2717_v35 = vadd.f32 %v9159_v46, %v2620_v1  ;;  %v9162_v10 = vld [vmem:[#allocation57_spill] sm:$0xff]  ;;  %v3112_v32 = vperm.slane %v3110_v13, 0  ;;  %v9167_v27 = vld [vmem:[#allocation70_spill] sm:$0xff]  ;;  %v3200_v46 = vld [vmem:[#allocation12 + $0x40] sm:$0xff] }
 0x2dd   : > { %v2817_v7 = vadd.f32 %v8346_v54, %v2720_v2  ;;  %v2719_v56 = vadd.f32 %v9156_v41, %v2622_v49  ;;  %v2618_v28 = vadd.f32 %v9158_v18, %v2521_v51  ;;  %v9160_v54 = vld [vmem:[#allocation67_spill] sm:$0xff]  ;;  %v3009_v11 = vadd.f32 %v2970_v61, %v2912_v39  ;;  %v9166_v42 = vld [vmem:[#allocation73_spill] sm:$0xff] }
 0x2de   : > { %v2721_v0 = vadd.f32 %v9160_v54, %v2624_v60  ;;  %v3007_v57 = vadd.f32 %v8391_v31, %v2910_v5  ;;  %v3005_v43 = vadd.f32 %v8360_v48, %v2908_v34  ;;  %v3206_v49 = vld [vmem:[#allocation12 + $0x70] sm:$0xff]  ;;  %v3113_v1 = vperm.slane %v3110_v13, 1  ;;  %v3211_v34 = vld [vmem:[#allocation12 + $0x98] sm:$0xff]  ;;  %v3197_v13 = vld [vmem:[#allocation12 + $0x28] sm:$0xff] }
 0x2df   : > { %v2914_v47 = vadd.f32 %v8365_v33, %v2817_v7  ;;  %v2715_v45 = vadd.f32 %v9162_v10, %v2618_v28  ;;  %v2816_v16 = vadd.f32 %v9163_v24, %v2719_v56  ;;  %v9164_v33 = vld [vmem:[#allocation66_spill] sm:$0xff]  ;;  %v3201_v28 = vld [vmem:[#allocation12 + $0x48] sm:$0xff]  ;;  %v3196_v24 = vld [vmem:[#allocation12 + $0x20] sm:$0xff] }
 0x2e0   : > { %v2814_v23 = vadd.f32 %v9164_v33, %v2717_v35  ;;  %v2818_v2 = vadd.f32 %v8354_v38, %v2721_v0  ;;  %v3207_v38 = vld [vmem:[#allocation12 + $0x78] sm:$0xff]  ;;  %v3202_v5 = vld [vmem:[#allocation12 + $0x50] sm:$0xff]  ;;  %v3212_v0 = vld [vmem:[#allocation12 + $0xa0] sm:$0xff] }
 0x2e1   : > { %v2913_v61 = vadd.f32 %v8367_v6, %v2816_v16  ;;  %v2812_v20 = vadd.f32 %v9165_v3, %v2715_v45  ;;  %3220 = vmatpush.msrb.mxu0 %v3207_v38  ;;  %v3132_v54 = vld [vmem:[#allocation10] sm:$0xff]  ;;  %v3208_v33 = vld [vmem:[#allocation12 + $0x80] sm:$0xff]  ;;  %v3282_v3 = vld [vmem:[#allocation13 + $0x50] sm:$0xff] }
 0x2e2   : > { %v8395_v52 = vpop.f32.mrf.mxu1  ;;  %v8397_v59 = vpop.f32.mrf.mxu0  ;;  %v2911_v25 = vadd.f32 %v9166_v42, %v2814_v23  ;;  %v3210_v10 = vld [vmem:[#allocation12 + $0x90] sm:$0xff]  ;;  %v3278_v42 = vld [vmem:[#allocation13 + $0x30] sm:$0xff] }
 0x2e3   : > { %v2915_v31 = vadd.f32 %v8395_v52, %v2818_v2  ;;  %v3102_v51 = vadd.f32 %v8397_v59, %v3005_v43  ;;  %v3002_v53 = vpop.f32.mrf.mxu3  ;;  %v2909_v48 = vadd.f32 %v9167_v27, %v2812_v20  ;;  %v3010_v7 = vadd.f32 %v2999_v21, %v2913_v61  ;;  %3221 = vmatpush.msrb.mxu0 %v3206_v49  ;;  %v3204_v59 = vld [vmem:[#allocation12 + $0x60] sm:$0xff]  ;;  %v3203_v21 = vld [vmem:[#allocation12 + $0x58] sm:$0xff]  ;;  %v3194_v23 = vld [vmem:[#allocation12 + $0x10] sm:$0xff] }
 0x2e4   : > { %v2973_v29 = vpop.f32.mrf.mxu2  ;;  %v3008_v50 = vadd.f32 %v8419_v19, %v2911_v25  ;;  %v3193_v2 = vld [vmem:[#allocation12 + $0x8] sm:$0xff] }
 0x2e5   : > { %v3011_v9 = vadd.f32 %v2973_v29, %v2914_v47  ;;  %v3116_v39 = vadd.f32 %v3112_v32, %v3102_v51  ;;  %v3012_v14 = vadd.f32 %v3002_v53, %v2915_v31  ;;  %v3006_v60 = vadd.f32 %v8383_v55, %v2909_v48  ;;  %v3280_v20 = vld [vmem:[#allocation13 + $0x40] sm:$0xff]  ;;  %v3274_v31 = vld [vmem:[#allocation13 + $0x10] sm:$0xff] }
 0x2e6   : > { %v3276_v25 = vld [vmem:[#allocation13 + $0x20] sm:$0xff] }
 0x2e7   : > { %v3272_v51 = vld [vmem:[#allocation13] sm:$0xff] }
 0x2ea   : > { %v3064_v30 = vpop.f32.mrf.mxu0  ;;  %v8424_v37 = vpop.f32.mrf.mxu1 }
 0x2eb   : > { %v3104_v12 = vadd.f32 %v3064_v30, %v3007_v57  ;;  %v3205_v30 = vld [vmem:[#allocation12 + $0x68] sm:$0xff]  ;;  %v3103_v19 = vadd.f32 %v8424_v37, %v3006_v60  ;;  %v3199_v37 = vld [vmem:[#allocation12 + $0x38] sm:$0xff] }
 0x2ec   : > { %3222 = vmatpush.msrb.mxu0 %v3205_v30  ;;  %v3209_v57 = vld [vmem:[#allocation12 + $0x88] sm:$0xff] }
 0x2ed   : > { %v3118_v6 = vadd.f32 %v3112_v32, %v3104_v12  ;;  %v3286_v12 = vld [vmem:[#allocation13 + $0x70] sm:$0xf]  ;;  %v3297_v60 = vld [vmem:[#allocation13 + $0xc0] sm:$0xff] }
 0x2ee   : > { %3223 = vmatpush.msrb.mxu0 %v3204_v59  ;;  %v3304_v59 = vld [vmem:[#allocation13 + $0xf8] sm:$0xf] }
 0x2ef   : > { %6179 = vmatpush.msk.msra.mxu1 %vm742_vm0, %v3304_v59  ;;  %v3521_v59 = vld [vmem:[#allocation13 + $0x1f8] sm:$0xf] }
 0x2f0   : > { %3224 = vmatpush.msrb.mxu0 %v3203_v21  ;;  %v3293_v21 = vld [vmem:[#allocation13 + $0xa0] sm:$0xff] }
 0x2f2   : > { %v3067_v8 = vpop.f32.mrf.mxu0  ;;  %v3093_v15 = vpop.f32.mrf.mxu1  ;;  %3225 = vmatpush.msrb.mxu0 %v3202_v5  ;;  %v3289_v5 = vld [vmem:[#allocation13 + $0x80] sm:$0xff] }
 0x2f3   : > { %v3106_v62 = vadd.f32 %v3067_v8, %v3009_v11  ;;  %v3105_v40 = vadd.f32 %v3093_v15, %v3008_v50  ;;  %v3117_v15 = vadd.f32 %v3113_v1, %v3103_v19  ;;  %v3296_v19 = vld [vmem:[#allocation13 + $0xb8] sm:$0xff] }
 0x2f4   : > { %3226 = vmatpush.msrb.mxu0 %v3201_v28 }
 0x2f5   : > { %v3120_v8 = vadd.f32 %v3112_v32, %v3106_v62  ;;  %v3119_v18 = vadd.f32 %v3113_v1, %v3105_v40  ;;  %v3195_v62 = vld [vmem:[#allocation12 + $0x18] sm:$0xff] }
 0x2f6   : > { %3227 = vmatpush.msrb.mxu0 %v3200_v46  ;;  %v3295_v40 = vld [vmem:[#allocation13 + $0xb0] sm:$0xff] }
 0x2f7   : > { %v3435_v46 = vld [vmem:[#allocation13 + $0x150] sm:$0xff] }
 0x2f8   : > { %3228 = vmatpush.msrb.mxu0 %v3199_v37  ;;  %v3433_v37 = vld [vmem:[#allocation13 + $0x140] sm:$0xff] }
 0x2fa   : > { %v3070_v36 = vpop.f32.mrf.mxu0  ;;  %v3096_v44 = vpop.f32.mrf.mxu1  ;;  %3229 = vmatpush.msrb.mxu0 %v3198_v22 }
 0x2fb   : > { %v3108_v17 = vadd.f32 %v3070_v36, %v3011_v9  ;;  %v3107_v52 = vadd.f32 %v3096_v44, %v3010_v7  ;;  %v3133_v9 = vld [vmem:[#allocation10 + $0x8] sm:$0x3f] }
 0x2fc   : > { %3230 = vmatpush.msrb.mxu0 %v3197_v13  ;;  %v3440_v13 = vld [vmem:[#allocation13 + $0x178] sm:$0xf] }
 0x2fd   : > { %v3122_v4 = vadd.f32 %v3112_v32, %v3108_v17  ;;  %v3121_v56 = vadd.f32 %v3113_v1, %v3107_v52  ;;  %v3192_v32 = vld [vmem:[#allocation12] sm:$0xff]  ;;  %v3284_v17 = vld [vmem:[#allocation13 + $0x60] sm:$0xff]  ;;  %v3299_v52 = vld [vmem:[#allocation13 + $0xd0] sm:$0xff] }
 0x2fe   : > { %3231 = vmatpush.msrb.mxu0 %v3196_v24  ;;  %v3285_v24 = vld [vmem:[#allocation13 + $0x68] sm:$0xff] }
 0x2ff   : > { %6525 = vtanh.f32 %v3122_v4 }
 0x300   : > { %6527 = vtanh.f32 %v3120_v8  ;;  %3232 = vmatpush.msrb.mxu0 %v3195_v62  ;;  %v3283_v62 = vld [vmem:[#allocation13 + $0x58] sm:$0xff] }
 0x301   : > { %6529 = vtanh.f32 %v3118_v6 }
 0x302   : > { %v3099_v63 = vpop.f32.mrf.mxu1  ;;  %6531 = vtanh.f32 %v3116_v39  ;;  %3233 = vmatpush.msrb.mxu0 %v3194_v23  ;;  %v3303_v39 = vld [vmem:[#allocation13 + $0xf0] sm:$0xf]  ;;  %v3436_v23 = vld [vmem:[#allocation13 + $0x158] sm:$0xff] }
 0x303   : > { %v3109_v58 = vadd.f32 %v3099_v63, %v3012_v14  ;;  %v3301_v14 = vld [vmem:[#allocation13 + $0xe0] sm:$0xff]  ;;  %v3302_v63 = vld [vmem:[#allocation13 + $0xe8] sm:$0xff] }
 0x304   : > { %3234 = vmatpush.msrb.mxu0 %v3193_v2  ;;  %3354 = vmatpush.msra.mxu1 %v3302_v63  ;;  %v3516_v2 = vld [vmem:[#allocation13 + $0x1d0] sm:$0xff]  ;;  %v3602_v63 = vld [vmem:[#allocation13 + $0x278] sm:$0xf] }
 0x305   : > { %v6526_v41 = vpop.eup %6525  ;;  %v3123_v26 = vadd.f32 %v3113_v1, %v3109_v58  ;;  %v3300_v58 = vld [vmem:[#allocation13 + $0xd8] sm:$0xff] }
 0x306   : > { %6168 = vmatpush.msk.msra.mxu2 %vm742_vm0, %v6526_v41  ;;  %v6528_v47 = vpop.eup %6527  ;;  %3235 = vmatpush.msrb.mxu0 %v3192_v32  ;;  %v3298_v41 = vld [vmem:[#allocation13 + $0xc8] sm:$0xff]  ;;  %v3597_v32 = vld [vmem:[#allocation13 + $0x250] sm:$0xff] }
 0x307   : > { %6533 = vtanh.f32 %v3123_v26  ;;  %v6530_v55 = vpop.eup %6529  ;;  %3355 = vmatpush.msra.mxu1 %v3300_v58  ;;  %v3294_v26 = vld [vmem:[#allocation13 + $0xa8] sm:$0xff] }
 0x308   : > { %3159 = vmatpush.msra.mxu2 %v6528_v47  ;;  %6535 = vtanh.f32 %v3121_v56  ;;  %v6532_v35 = vpop.eup %6531  ;;  %v3291_v56 = vld [vmem:[#allocation13 + $0x90] sm:$0xff]  ;;  %v3292_v47 = vld [vmem:[#allocation13 + $0x98] sm:$0xff]  ;;  %v3600_v58 = vld [vmem:[#allocation13 + $0x268] sm:$0xff] }
 0x309   : > { %6537 = vtanh.f32 %v3119_v18  ;;  %3356 = vmatpush.msra.mxu1 %v3298_v41  ;;  %v3290_v18 = vld [vmem:[#allocation13 + $0x88] sm:$0xff]  ;;  %v3517_v41 = vld [vmem:[#allocation13 + $0x1d8] sm:$0xff] }
 0x30a   : > { %3160 = vmatpush.msra.mxu2 %v6530_v55  ;;  %6539 = vtanh.f32 %v3117_v15  ;;  %v3439_v55 = vld [vmem:[#allocation13 + $0x170] sm:$0xf]  ;;  %v3437_v15 = vld [vmem:[#allocation13 + $0x160] sm:$0xff] }
 0x30b   : > { %3357 = vmatpush.msra.mxu1 %v3296_v19  ;;  %6188 = vmatpush.msk.msra.mxu0 %vm742_vm0, %v3439_v55  ;;  %v3598_v19 = vld [vmem:[#allocation13 + $0x258] sm:$0xff]  ;;  %v3676_v55 = vld [vmem:[#allocation13 + $0x2b0] sm:$0xff] }
 0x30c   : > { %3161 = vmatpush.msra.mxu2 %v6532_v35 }
 0x30d   : > { %v6534_v29 = vpop.eup %6533  ;;  %6169 = vmatmul.msk.f32.vlgmr.msra.gmra.mxu2 %vm733_vm1, %v3132_v54  ;;  %3358 = vmatpush.msra.mxu1 %v3294_v26  ;;  %v3515_v26 = vld [vmem:[#allocation13 + $0x1c8] sm:$0xff] }
 0x30e   : > { %6171 = vmatpush.msk.msra.mxu3 %vm742_vm0, %v6534_v29  ;;  %v6536_v11 = vpop.eup %6535  ;;  %3254 = vmatpush.msrb.mxu2 %v3212_v0  ;;  %v3429_v0 = vld [vmem:[#allocation13 + $0x120] sm:$0xff]  ;;  %v3427_v29 = vld [vmem:[#allocation13 + $0x110] sm:$0xff] }
 0x30f   : > { %v6538_v45 = vpop.eup %6537  ;;  %3359 = vmatpush.msra.mxu1 %v3292_v47  ;;  %3464 = vmatpush.msra.mxu0 %v3437_v15  ;;  %v3678_v47 = vld [vmem:[#allocation13 + $0x2c0] sm:$0xff]  ;;  %v3511_v15 = vld [vmem:[#allocation13 + $0x1a8] sm:$0xff] }
 0x310   : > { %3182 = vmatpush.msra.mxu3 %v6536_v11  ;;  %3255 = vmatpush.msrb.mxu2 %v3211_v34  ;;  %v6540_v16 = vpop.eup %6539  ;;  %v3425_v34 = vld [vmem:[#allocation13 + $0x100] sm:$0xff]  ;;  %v3287_v11 = vld [vmem:[#allocation13 + $0x78] sm:$0xf] }
 0x311   : > { %3360 = vmatpush.msra.mxu1 %v3290_v18  ;;  %3465 = vmatpush.msra.mxu0 %v3435_v46  ;;  %v3513_v18 = vld [vmem:[#allocation13 + $0x1b8] sm:$0xff]  ;;  %v3592_v46 = vld [vmem:[#allocation13 + $0x228] sm:$0xff] }
 0x312   : > { %3183 = vmatpush.msra.mxu3 %v6538_v45  ;;  %3256 = vmatpush.msrb.mxu2 %v3210_v10  ;;  %v3520_v10 = vld [vmem:[#allocation13 + $0x1f0] sm:$0xf] }
 0x313   : > { %3466 = vmatpush.msra.mxu0 %v3433_v37  ;;  %6191 = vmatpush.msk.msrb.mxu1 %vm742_vm0, %v3440_v13  ;;  %v3601_v45 = vld [vmem:[#allocation13 + $0x270] sm:$0xf]  ;;  %v3674_v37 = vld [vmem:[#allocation13 + $0x2a0] sm:$0xff]  ;;  %v3588_v13 = vld [vmem:[#allocation13 + $0x208] sm:$0xff] }
 0x314   : > { %3184 = vmatpush.msra.mxu3 %v6540_v16  ;;  %3257 = vmatpush.msrb.mxu2 %v3209_v57  ;;  %v3438_v16 = vld [vmem:[#allocation13 + $0x168] sm:$0xff]  ;;  %v3518_v57 = vld [vmem:[#allocation13 + $0x1e0] sm:$0xff] }
 0x315   : > { %6172 = vmatmul.msk.f32.vlgmr.msra.gmra.mxu3 %vm733_vm1, %v3132_v54  ;;  %6170 = vmatmul.msk.f32.gmra.mxu2 %vm733_vm1, %v3133_v9  ;;  %v3431_v54 = vld [vmem:[#allocation13 + $0x130] sm:$0xff] }
 0x316   : > { %3258 = vmatpush.msrb.mxu2 %v3208_v33  ;;  %6176 = vmatpush.msk.msrb.mxu3 %vm742_vm0, %v3303_v39  ;;  %v3426_v39 = vld [vmem:[#allocation13 + $0x108] sm:$0xff] }
 0x317   : > { %3467 = vmatpush.msra.mxu0 %v3431_v54  ;;  %3487 = vmatpush.msrb.mxu1 %v3438_v16 }
 0x318   : > { %6182 = vmatpush.msk.msra.mxu2 %vm742_vm0, %v3286_v12  ;;  %3331 = vmatpush.msrb.mxu3 %v3301_v14  ;;  %v3595_v12 = vld [vmem:[#allocation13 + $0x240] sm:$0xff] }
 0x319   : > { %3468 = vmatpush.msra.mxu0 %v3429_v0  ;;  %3488 = vmatpush.msrb.mxu1 %v3436_v23  ;;  %v3506_v14 = vld [vmem:[#allocation13 + $0x180] sm:$0xff]  ;;  %v3509_v0 = vld [vmem:[#allocation13 + $0x198] sm:$0xff] }
 0x31a   : > { %3387 = vmatpush.msra.mxu2 %v3284_v17  ;;  %3332 = vmatpush.msrb.mxu3 %v3299_v52  ;;  %v3279_v17 = vld [vmem:[#allocation13 + $0x38] sm:$0xff]  ;;  %v3587_v52 = vld [vmem:[#allocation13 + $0x200] sm:$0xff] }
 0x31b   : > { %3469 = vmatpush.msra.mxu0 %v3427_v29  ;;  %v3590_v29 = vld [vmem:[#allocation13 + $0x218] sm:$0xff] }
 0x31c   : > { %3388 = vmatpush.msra.mxu2 %v3282_v3  ;;  %3333 = vmatpush.msrb.mxu3 %v3297_v60  ;;  %v3432_v3 = vld [vmem:[#allocation13 + $0x138] sm:$0xff]  ;;  %v3684_v60 = vld [vmem:[#allocation13 + $0x2f0] sm:$0xf] }
 0x31d   : > { %6173 = vmatmul.msk.f32.gmra.mxu3 %vm733_vm1, %v3133_v9  ;;  %3470 = vmatpush.msra.mxu0 %v3425_v34  ;;  %v3599_v9 = vld [vmem:[#allocation13 + $0x260] sm:$0xff]  ;;  %v3672_v34 = vld [vmem:[#allocation13 + $0x290] sm:$0xff] }
 0x31e   : > { %3389 = vmatpush.msra.mxu2 %v3280_v20  ;;  %3334 = vmatpush.msrb.mxu3 %v3295_v40  ;;  %v3512_v20 = vld [vmem:[#allocation13 + $0x1b0] sm:$0xff]  ;;  %v3519_v40 = vld [vmem:[#allocation13 + $0x1e8] sm:$0xff] }
 0x320   : > { %3390 = vmatpush.msra.mxu2 %v3278_v42  ;;  %3335 = vmatpush.msrb.mxu3 %v3293_v21  ;;  %v3593_v42 = vld [vmem:[#allocation13 + $0x230] sm:$0xff]  ;;  %v3682_v21 = vld [vmem:[#allocation13 + $0x2e0] sm:$0xff] }
 0x322   : > { %3391 = vmatpush.msra.mxu2 %v3276_v25  ;;  %3336 = vmatpush.msrb.mxu3 %v3291_v56  ;;  %v3277_v25 = vld [vmem:[#allocation13 + $0x28] sm:$0xff]  ;;  %v3680_v56 = vld [vmem:[#allocation13 + $0x2d0] sm:$0xff] }
 0x324   : > { %3392 = vmatpush.msra.mxu2 %v3274_v31  ;;  %3337 = vmatpush.msrb.mxu3 %v3289_v5  ;;  %v3430_v31 = vld [vmem:[#allocation13 + $0x128] sm:$0xff] }
 0x325   : > { %v3596_v5 = vld [vmem:[#allocation13 + $0x248] sm:$0xff] }
 0x326   : > { %3393 = vmatpush.msra.mxu2 %v3272_v51  ;;  %6185 = vmatpush.msk.msra.mxu3 %vm742_vm0, %v3287_v11  ;;  %v3510_v51 = vld [vmem:[#allocation13 + $0x1a0] sm:$0xff]  ;;  %v3507_v11 = vld [vmem:[#allocation13 + $0x188] sm:$0xff] }
 0x328   : > { %3410 = vmatpush.msra.mxu3 %v3285_v24  ;;  %v3757_v24 = vld [vmem:[#allocation13 + $0x340] sm:$0xff] }
 0x32a   : > { %3411 = vmatpush.msra.mxu3 %v3283_v62  ;;  %v3753_v62 = vld [vmem:[#allocation13 + $0x320] sm:$0xff] }
 0x390   : > { %v3163_v36 = vpop.f32.mrf.mxu2 }
 0x391   : > { %3236 = vmatmul.f32.vlgmr.msrb.gmra.mxu0 %v3163_v36  ;;  %v3281_v36 = vld [vmem:[#allocation13 + $0x48] sm:$0xff] }
 0x392   : > { %6200 = vmatpush.msk.msrb.mxu0 %vm742_vm0, %v3601_v45  ;;  %3412 = vmatpush.msra.mxu3 %v3281_v36  ;;  %v3670_v45 = vld [vmem:[#allocation13 + $0x280] sm:$0xff]  ;;  %v3685_v36 = vld [vmem:[#allocation13 + $0x2f8] sm:$0xf] }
 0x394   : > { %3626 = vmatpush.msrb.mxu0 %v3599_v9  ;;  %3413 = vmatpush.msra.mxu3 %v3279_v17  ;;  %v3762_v17 = vld [vmem:[#allocation13 + $0x368] sm:$0xff] }
 0x396   : > { %3627 = vmatpush.msrb.mxu0 %v3597_v32  ;;  %3414 = vmatpush.msra.mxu3 %v3277_v25  ;;  %v3840_v25 = vld [vmem:[#allocation13 + $0x3d0] sm:$0xff] }
 0x398   : > { %v3186_v44 = vpop.f32.mrf.mxu3  ;;  %v3166_v43 = vpop.f32.mrf.mxu2  ;;  %3628 = vmatpush.msrb.mxu0 %v3595_v12  ;;  %v3683_v12 = vld [vmem:[#allocation13 + $0x2e8] sm:$0xff] }
 0x399   : > { %6174 = vmatmul.msk.f32.vlgmr.msrb.gmra.mxu2 %vm3213_vm2, %v3186_v44  ;;  %3239 = vmatmul.f32.gmra.mxu0 %v3166_v43  ;;  %v3434_v43 = vld [vmem:[#allocation13 + $0x148] sm:$0xff] }
 0x39a   : > { %6194 = vmatpush.msk.msrb.mxu2 %vm742_vm0, %v3520_v10  ;;  %3489 = vmatpush.msrb.mxu1 %v3434_v43  ;;  %v3759_v10 = vld [vmem:[#allocation13 + $0x350] sm:$0xff] }
 0x39b   : > { %3629 = vmatpush.msrb.mxu0 %v3593_v42  ;;  %v3844_v43 = vld [vmem:[#allocation13 + $0x3f0] sm:$0xf]  ;;  %v3760_v42 = vld [vmem:[#allocation13 + $0x358] sm:$0xff] }
 0x39c   : > { %3545 = vmatpush.msrb.mxu2 %v3518_v57  ;;  %3490 = vmatpush.msrb.mxu1 %v3432_v3  ;;  %v3755_v57 = vld [vmem:[#allocation13 + $0x330] sm:$0xff]  ;;  %v3842_v3 = vld [vmem:[#allocation13 + $0x3e0] sm:$0xff] }
 0x39e   : > { %3546 = vmatpush.msrb.mxu2 %v3516_v2  ;;  %3491 = vmatpush.msrb.mxu1 %v3430_v31  ;;  %v3749_v2 = vld [vmem:[#allocation13 + $0x300] sm:$0xff]  ;;  %v3921_v31 = vld [vmem:[#allocation13 + $0x450] sm:$0xff] }
 0x3a0   : > { %v3189_v61 = vpop.f32.mrf.mxu3 }
 0x3a1   : > { %6175 = vmatmul.msk.f32.gmra.mxu2 %vm3213_vm2, %v3189_v61  ;;  %v3514_v61 = vld [vmem:[#allocation13 + $0x1c0] sm:$0xff] }
 0x3a2   : > { %3547 = vmatpush.msrb.mxu2 %v3514_v61  ;;  %v3925_v61 = vld [vmem:[#allocation13 + $0x470] sm:$0xf] }
 0x3a4   : > { %3548 = vmatpush.msrb.mxu2 %v3512_v20  ;;  %v3923_v20 = vld [vmem:[#allocation13 + $0x460] sm:$0xff] }
 0x3a6   : > { %3549 = vmatpush.msrb.mxu2 %v3510_v51 }
 0x40e   : > { %v3237_v8 = vpop.f32.mrf.mxu0 }
 0x416   : > { %v3240_v49 = vpop.f32.mrf.mxu0 }
 0x41c   : > { %v3260_v4 = vpop.f32.mrf.mxu2 }
 0x41d   : > { %v3261_v38 = vadd.f32 %v3260_v4, %v3237_v8  ;;  %v3591_v8 = vld [vmem:[#allocation13 + $0x220] sm:$0xff]  ;;  %v3275_v4 = vld [vmem:[#allocation13 + $0x18] sm:$0xff] }
 0x41e   : > { %3630 = vmatpush.msrb.mxu0 %v3591_v8  ;;  %3415 = vmatpush.msra.mxu3 %v3275_v4  ;;  %v3919_v4 = vld [vmem:[#allocation13 + $0x440] sm:$0xff] }
 0x41f   : > { %3267 = vst.msk [vmem:[#allocation2] sm:$0xff] %vm3266_vm3, %v3261_v38  ;;  %v3428_v38 = vld [vmem:[#allocation13 + $0x118] sm:$0xff] }
 0x420   : > { %3492 = vmatpush.msrb.mxu1 %v3428_v38  ;;  %v3679_v38 = vld [vmem:[#allocation13 + $0x2c8] sm:$0xff] }
 0x422   : > { %3493 = vmatpush.msrb.mxu1 %v3426_v39  ;;  %v3917_v39 = vld [vmem:[#allocation13 + $0x430] sm:$0xff] }
 0x424   : > { %v3263_v53 = vpop.f32.mrf.mxu2 }
 0x425   : > { %v3264_v27 = vadd.f32 %v3263_v53, %v3240_v49  ;;  %v3508_v49 = vld [vmem:[#allocation13 + $0x190] sm:$0xff] }
 0x426   : > { %v8482_v48 = vld [vmem:[#allocation2] sm:$0xff]  ;;  %3550 = vmatpush.msrb.mxu2 %v3508_v49 }
 0x427   : > { %3269 = vst.msk [vmem:[#allocation2 + $0x8] sm:$0x3f] %vm3268_vm4, %v3264_v27  ;;  %3441 = vrot.lane.b32.xlu1 %v8482_v48, %s7063_s30  ;;  %3307 = vrot.lane.b32.xlu2 %v8482_v48, %s7064_s18  ;;  %v3589_v53 = vld [vmem:[#allocation13 + $0x210] sm:$0xff]  ;;  %v3273_v27 = vld [vmem:[#allocation13 + $0x8] sm:$0xff] }
 0x428   : > { %6183 = vmatmul.msk.f32.vlgmr.msra.gmra.mxu2 %vm3311_vm5, %v8482_v48  ;;  %3631 = vmatpush.msrb.mxu0 %v3589_v53  ;;  %v3758_v49 = vld [vmem:[#allocation13 + $0x348] sm:$0xff]  ;;  %v3838_v53 = vld [vmem:[#allocation13 + $0x3c0] sm:$0xff] }
 0x429   : > { %3416 = vmatpush.msra.mxu3 %v3273_v27  ;;  %3551 = vmatpush.msrb.mxu2 %v3506_v14  ;;  %v3677_v27 = vld [vmem:[#allocation13 + $0x2b8] sm:$0xff] }
 0x42a   : > { %3632 = vmatpush.msrb.mxu0 %v3587_v52  ;;  %v3756_v14 = vld [vmem:[#allocation13 + $0x338] sm:$0xff]  ;;  %v3836_v52 = vld [vmem:[#allocation13 + $0x3b0] sm:$0xff] }
 0x42b   : > { %6206 = vmatpush.msk.msra.mxu2 %vm742_vm0, %v3684_v60  ;;  %v3834_v60 = vld [vmem:[#allocation13 + $0x3a0] sm:$0xff] }
 0x42d   : > { %3707 = vmatpush.msra.mxu2 %v3682_v21 }
 0x42e   : > { %v8490_v7 = vld [vmem:[#allocation2 + $0x8] sm:$0x3]  ;;  %v8522_v50 = vld [vmem:[#allocation2 + $0xa] sm:$0x3]  ;;  %v8561_v33 = vld [vmem:[#allocation2 + $0xc] sm:$0x3] }
 0x42f   : > { %3524 = vrot.lane.b32.xlu1 %v8490_v7, %s7065_s28  ;;  %3443 = vrot.lane.b32.xlu2 %v8490_v7, %s7063_s30  ;;  %v8500_v6 = vld [vmem:[#allocation2 + $0x1] sm:$0xff]  ;;  %v8508_v30 = vld [vmem:[#allocation2 + $0x9] sm:$0x3]  ;;  %v4478_v35 = vld [vmem:[#allocation2 + $0xb] sm:$0x3] }
 0x430   : > { %3309 = vrot.lane.b32.xlu0 %v8490_v7, %s7064_s18  ;;  %6184 = vmatmul.msk.f32.gmra.mxu2 %vm3311_vm5, %v8490_v7  ;;  %v8532_v1 = vld [vmem:[#allocation2 + $0x2] sm:$0xff] }
 0x431   : > { %v4477_v28 = vld [vmem:[#allocation2 + $0x3] sm:$0xff]  ;;  %3708 = vmatpush.msra.mxu2 %v3680_v56  ;;  %v3671_v56 = vld [vmem:[#allocation13 + $0x288] sm:$0xff] }
 0x432   : > { %v4882_v22 = vld [vmem:[#allocation2 + $0x4] sm:$0xff] }
 0x433   : > { %3709 = vmatpush.msra.mxu2 %v3678_v47  ;;  %v3830_v47 = vld [vmem:[#allocation13 + $0x380] sm:$0xff] }
 0x435   : > { %3710 = vmatpush.msra.mxu2 %v3676_v55  ;;  %v4006_v55 = vld [vmem:[#allocation13 + $0x4f0] sm:$0xf] }
 0x437   : > { %3765 = vrot.lane.b32.xlu1 %v8500_v6, %s7064_s18  ;;  %3603 = vrot.lane.b32.xlu2 %v8482_v48, %s7066_s3 }
 0x438   : > { %3522 = vrot.lane.b32.xlu0 %v8482_v48, %s7065_s28  ;;  %3711 = vmatpush.msra.mxu2 %v3674_v37  ;;  %v3924_v37 = vld [vmem:[#allocation13 + $0x468] sm:$0xff] }
 0x43a   : > { %3712 = vmatpush.msra.mxu2 %v3672_v34  ;;  %v4002_v34 = vld [vmem:[#allocation13 + $0x4d0] sm:$0xff] }
 0x43c   : > { %3713 = vmatpush.msra.mxu2 %v3670_v45  ;;  %v4083_v45 = vld [vmem:[#allocation13 + $0x540] sm:$0xff] }
 0x43f   : > { %3848 = vrot.lane.b32.xlu1 %v8508_v30, %s7063_s30  ;;  %3767 = vrot.lane.b32.xlu2 %v8508_v30, %s7064_s18 }
 0x440   : > { %3605 = vrot.lane.b32.xlu0 %v8490_v7, %s7066_s3 }
 0x447   : > { %4008 = vrot.lane.b32.xlu1 %v8500_v6, %s7066_s3  ;;  %3927 = vrot.lane.b32.xlu2 %v8500_v6, %s7065_s28 }
 0x448   : > { %3846 = vrot.lane.b32.xlu0 %v8500_v6, %s7063_s30 }
 0x44f   : > { %4172 = vrot.lane.b32.xlu1 %v8522_v50, %s7064_s18  ;;  %4010 = vrot.lane.b32.xlu2 %v8508_v30, %s7066_s3 }
 0x450   : > { %3929 = vrot.lane.b32.xlu0 %v8508_v30, %s7065_s28 }
 0x457   : > { %4332 = vrot.lane.b32.xlu1 %v8532_v1, %s7065_s28  ;;  %4251 = vrot.lane.b32.xlu2 %v8532_v1, %s7063_s30 }
 0x458   : > { %4170 = vrot.lane.b32.xlu0 %v8532_v1, %s7064_s18 }
 0x45f   : > { %4415 = vrot.lane.b32.xlu1 %v8522_v50, %s7066_s3  ;;  %4334 = vrot.lane.b32.xlu2 %v8522_v50, %s7065_s28 }
 0x460   : > { %4253 = vrot.lane.b32.xlu0 %v8522_v50, %s7063_s30 }
 0x467   : > { %4656 = vrot.lane.b32.xlu1 %v4477_v28, %s7063_s30  ;;  %4575 = vrot.lane.b32.xlu2 %v4477_v28, %s7064_s18 }
 0x468   : > { %4413 = vrot.lane.b32.xlu0 %v8532_v1, %s7066_s3 }
 0x46f   : > { %4739 = vrot.lane.b32.xlu1 %v4478_v35, %s7065_s28  ;;  %4658 = vrot.lane.b32.xlu2 %v4478_v35, %s7063_s30 }
 0x470   : > { %4577 = vrot.lane.b32.xlu0 %v4478_v35, %s7064_s18 }
 0x477   : > { %4980 = vrot.lane.b32.xlu1 %v4882_v22, %s7064_s18  ;;  %4818 = vrot.lane.b32.xlu2 %v4477_v28, %s7066_s3 }
 0x478   : > { %4737 = vrot.lane.b32.xlu0 %v4477_v28, %s7065_s28  ;;  %v3594_v28 = vld [vmem:[#allocation13 + $0x238] sm:$0xff] }
 0x47f   : > { %5063 = vrot.lane.b32.xlu1 %v8561_v33, %s7063_s30  ;;  %4982 = vrot.lane.b32.xlu2 %v8561_v33, %s7064_s18  ;;  %s9170_s18 = sld [smem:[#allocation81_spill]] }
 0x480   : > { %4820 = vrot.lane.b32.xlu0 %v4478_v35, %s7066_s3  ;;  %v3763_v35 = vld [vmem:[#allocation13 + $0x370] sm:$0xf] }
 0x481   : > { %v3308_v44 = vpop.permute.xlu2 %3307 }
 0x482   : > { %6177 = vmatmul.msk.f32.vlgmr.msrb.gmra.mxu3 %vm3311_vm5, %v3308_v44  ;;  %6180 = vmatmul.msk.f32.vlgmr.msra.gmra.mxu1 %vm3311_vm5, %v3308_v44  ;;  %v3764_v44 = vld [vmem:[#allocation13 + $0x378] sm:$0xf] }
 0x483   : > { %6197 = vmatpush.msk.msrb.mxu3 %vm742_vm0, %v3521_v59  ;;  %6203 = vmatpush.msk.msra.mxu1 %vm742_vm0, %v3602_v63  ;;  %v3675_v59 = vld [vmem:[#allocation13 + $0x2a8] sm:$0xff] }
 0x484   : > { %v3754_v63 = vld [vmem:[#allocation13 + $0x328] sm:$0xff] }
 0x485   : > { %3568 = vmatpush.msrb.mxu3 %v3519_v40  ;;  %3649 = vmatpush.msra.mxu1 %v3600_v58  ;;  %v3673_v40 = vld [vmem:[#allocation13 + $0x298] sm:$0xff] }
 0x486   : > { %v3752_v58 = vld [vmem:[#allocation13 + $0x318] sm:$0xff] }
 0x487   : > { %5223 = vrot.lane.b32.xlu1 %v4882_v22, %s7066_s3  ;;  %5142 = vrot.lane.b32.xlu2 %v4882_v22, %s7065_s28 }
 0x488   : > { %5061 = vrot.lane.b32.xlu0 %v4882_v22, %s7063_s30  ;;  %3569 = vmatpush.msrb.mxu3 %v3517_v41  ;;  %v3761_v22 = vld [vmem:[#allocation13 + $0x360] sm:$0xff]  ;;  %v3832_v41 = vld [vmem:[#allocation13 + $0x390] sm:$0xff]  ;;  %s9169_s30 = sld [smem:[#allocation80_spill]] }
 0x489   : > { %3650 = vmatpush.msra.mxu1 %v3598_v19  ;;  %v3444_v16 = vpop.permute.xlu2 %3443  ;;  %v3913_v19 = vld [vmem:[#allocation13 + $0x410] sm:$0xff] }
 0x48a   : > { %3570 = vmatpush.msrb.mxu3 %v3515_v26  ;;  %v3750_v26 = vld [vmem:[#allocation13 + $0x308] sm:$0xff] }
 0x48b   : > { %3651 = vmatpush.msra.mxu1 %v3596_v5  ;;  %v3911_v5 = vld [vmem:[#allocation13 + $0x400] sm:$0xff] }
 0x48c   : > { %3571 = vmatpush.msrb.mxu3 %v3513_v18  ;;  %v3845_v18 = vld [vmem:[#allocation13 + $0x3f8] sm:$0xf] }
 0x48d   : > { %3652 = vmatpush.msra.mxu1 %v3594_v28  ;;  %v3926_v28 = vld [vmem:[#allocation13 + $0x478] sm:$0xf] }
 0x48e   : > { %3572 = vmatpush.msrb.mxu3 %v3511_v15  ;;  %v4089_v15 = vld [vmem:[#allocation13 + $0x570] sm:$0xf] }
 0x48f   : > { %5225 = vrot.lane.b32.xlu2 %v8561_v33, %s7066_s3  ;;  %3653 = vmatpush.msra.mxu1 %v3592_v46  ;;  %s5702_s3 = scalar_lea.hbm %s9170_s18, %s9093_s25 }
 0x490   : > { %5144 = vrot.lane.b32.xlu0 %v8561_v33, %s7065_s28  ;;  %3573 = vmatpush.msrb.mxu3 %v3509_v0  ;;  %v3751_v33 = vld [vmem:[#allocation13 + $0x310] sm:$0xff]  ;;  %v4087_v0 = vld [vmem:[#allocation13 + $0x560] sm:$0xff]  ;;  %s9171_s28 = smov %s9170_s18  ;;  %s5706_s4 = sshll.u32 %s5702_s3, 4  ;;  %s5707_s4 = int_to_ptr.hbm [resolvable:$true] %s5706_s4 }
 0x491   : > { %3654 = vmatpush.msra.mxu1 %v3590_v29  ;;  %v8585_v23 = vpop.permute.xlu2 %3603  ;;  %v3841_v29 = vld [vmem:[#allocation13 + $0x3d8] sm:$0xff]  ;;  %s6965_s15 = sshra.s32 %s5707_s4, 4  ;;  %s6971_s1 = scalar_lea.hbm %s9171_s28, 2  ;;  %s6966_s15 = int_to_ptr.hbm [resolvable:$true] %s6965_s15 }
 0x492   : > { %3574 = vmatpush.msrb.mxu3 %v3507_v11  ;;  %v4085_v11 = vld [vmem:[#allocation13 + $0x550] sm:$0xff]  ;;  %s6967_s29 = scalar_lea.hbm %s6966_s15, 1  ;;  %p6972_p12 = scmp.lt.s32.totalorder %s6966_s15, %s9171_s28 }
 0x493   : > { %3655 = vmatpush.msra.mxu1 %v3588_v13  ;;  %v3839_v13 = vld [vmem:[#allocation13 + $0x3c8] sm:$0xff]  ;;  %p6968_p1 = scmp.ne.s32.totalorder %s6966_s15, %s6967_s29  ;;  %p6973_p7 = scmp.lt.s32.totalorder %s6971_s1, %s6967_s29 }
 0x495   : > { %p6969_p3 = pnand %p6968_p1, %p7286_p4  ;;  %p6974_p8 = por %p6973_p7, %p6972_p12 }
 0x497   : > { %p6970_p5 = pneg %p6969_p3 }
 0x499   : > { %v3442_v54 = vpop.permute.xlu1 %3441  ;;  %v8618_v46 = vpop.permute.xlu2 %3767  ;;  %p6975_p9 = pnand %p6974_p8, %p6970_p5 }
 0x49a   : > { %6189 = vmatmul.msk.f32.vlgmr.msra.gmra.mxu0 %vm3311_vm5, %v3442_v54 }
 0x49b   : > { %6212 = vmatpush.msk.msra.mxu0 %vm742_vm0, %v3763_v35  ;;  %v3843_v35 = vld [vmem:[#allocation13 + $0x3e8] sm:$0xff] }
 0x49d   : > { %3788 = vmatpush.msra.mxu0 %v3761_v22  ;;  %v3922_v22 = vld [vmem:[#allocation13 + $0x458] sm:$0xff] }
 0x49f   : > { %3789 = vmatpush.msra.mxu0 %v3759_v10  ;;  %v3920_v10 = vld [vmem:[#allocation13 + $0x448] sm:$0xff] }
 0x4a1   : > { %3790 = vmatpush.msra.mxu0 %v3757_v24  ;;  %v8600_v51 = vpop.permute.xlu1 %3524  ;;  %v4000_v24 = vld [vmem:[#allocation13 + $0x4c0] sm:$0xff] }
 0x4a2   : > { %v3310_v9 = vpop.permute.xlu0 %3309  ;;  %6190 = vmatmul.msk.f32.gmra.mxu0 %vm3311_vm5, %v3444_v16 }
 0x4a3   : > { %6178 = vmatmul.msk.f32.gmra.mxu3 %vm3311_vm5, %v3310_v9  ;;  %6181 = vmatmul.msk.f32.gmra.mxu1 %vm3311_vm5, %v3310_v9  ;;  %v3918_v9 = vld [vmem:[#allocation13 + $0x438] sm:$0xff] }
 0x4a4   : > { %3791 = vmatpush.msra.mxu0 %v3755_v57  ;;  %v3837_v57 = vld [vmem:[#allocation13 + $0x3b8] sm:$0xff] }
 0x4a6   : > { %3792 = vmatpush.msra.mxu0 %v3753_v62  ;;  %v3928_v62 = vpop.permute.xlu2 %3927 }
 0x4a8   : > { %3793 = vmatpush.msra.mxu0 %v3751_v33  ;;  %v3998_v33 = vld [vmem:[#allocation13 + $0x4b0] sm:$0xff] }
 0x4a9   : > { %v3766_v21 = vpop.permute.xlu1 %3765 }
 0x4aa   : > { %v8587_v32 = vpop.permute.xlu0 %3522  ;;  %6201 = vmatmul.msk.f32.vlgmr.msrb.gmra.mxu0 %vm3311_vm5, %v8585_v23 }
 0x4ab   : > { %6186 = vmatmul.msk.f32.vlgmr.msra.gmra.mxu3 %vm3311_vm5, %v8482_v48  ;;  %6192 = vmatmul.msk.f32.vlgmr.msrb.gmra.mxu1 %vm3311_vm5, %v3442_v54  ;;  %v3681_v48 = vld [vmem:[#allocation13 + $0x2d8] sm:$0xff]  ;;  %v4004_v54 = vld [vmem:[#allocation13 + $0x4e0] sm:$0xff] }
 0x4ac   : > { %6195 = vmatmul.msk.f32.vlgmr.msrb.gmra.mxu2 %vm3311_vm5, %v8587_v32  ;;  %3794 = vmatpush.msra.mxu0 %v3749_v2  ;;  %v3835_v2 = vld [vmem:[#allocation13 + $0x3a8] sm:$0xff] }
 0x4ad   : > { %6209 = vmatpush.msk.msra.mxu3 %vm742_vm0, %v3685_v36  ;;  %6215 = vmatpush.msk.msrb.mxu1 %vm742_vm0, %v3764_v44  ;;  %v3996_v36 = vld [vmem:[#allocation13 + $0x4a0] sm:$0xff] }
 0x4ae   : > { %6218 = vmatpush.msk.msrb.mxu2 %vm742_vm0, %v3844_v43  ;;  %6224 = vmatpush.msk.msrb.mxu0 %vm742_vm0, %v3925_v61  ;;  %v4079_v44 = vld [vmem:[#allocation13 + $0x520] sm:$0xff]  ;;  %v3833_v43 = vld [vmem:[#allocation13 + $0x398] sm:$0xff] }
 0x4af   : > { %3730 = vmatpush.msra.mxu3 %v3683_v12  ;;  %3811 = vmatpush.msrb.mxu1 %v3762_v17  ;;  %v3914_v61 = vld [vmem:[#allocation13 + $0x418] sm:$0xff]  ;;  %v4077_v12 = vld [vmem:[#allocation13 + $0x510] sm:$0xff] }
 0x4b0   : > { %3869 = vmatpush.msrb.mxu2 %v3842_v3  ;;  %3950 = vmatpush.msrb.mxu0 %v3923_v20  ;;  %v3831_v3 = vld [vmem:[#allocation13 + $0x388] sm:$0xff] }
 0x4b1   : > { %3731 = vmatpush.msra.mxu3 %v3681_v48  ;;  %3812 = vmatpush.msrb.mxu1 %v3760_v42  ;;  %v8640_v17 = vpop.permute.xlu1 %3848  ;;  %v3912_v20 = vld [vmem:[#allocation13 + $0x408] sm:$0xff]  ;;  %v4075_v42 = vld [vmem:[#allocation13 + $0x500] sm:$0xff] }
 0x4b2   : > { %v8602_v8 = vpop.permute.xlu0 %3605  ;;  %3870 = vmatpush.msrb.mxu2 %v3840_v25  ;;  %3951 = vmatpush.msrb.mxu0 %v3921_v31  ;;  %v3992_v25 = vld [vmem:[#allocation13 + $0x480] sm:$0xff]  ;;  %v4007_v31 = vld [vmem:[#allocation13 + $0x4f8] sm:$0xf] }
 0x4b3   : > { %6187 = vmatmul.msk.f32.gmra.mxu3 %vm3311_vm5, %v8490_v7  ;;  %6193 = vmatmul.msk.f32.gmra.mxu1 %vm3311_vm5, %v3444_v16  ;;  %v3915_v7 = vld [vmem:[#allocation13 + $0x420] sm:$0xff] }
 0x4b4   : > { %6196 = vmatmul.msk.f32.gmra.mxu2 %vm3311_vm5, %v8600_v51  ;;  %6202 = vmatmul.msk.f32.gmra.mxu0 %vm3311_vm5, %v8602_v8 }
 0x4b5   : > { %3952 = vmatpush.msrb.mxu0 %v3919_v4  ;;  %3732 = vmatpush.msra.mxu3 %v3679_v38  ;;  %v4249_v4 = vld [vmem:[#allocation13 + $0x670] sm:$0xf]  ;;  %v4005_v38 = vld [vmem:[#allocation13 + $0x4e8] sm:$0xff] }
 0x4b6   : > { %3813 = vmatpush.msrb.mxu1 %v3758_v49  ;;  %3871 = vmatpush.msrb.mxu2 %v3838_v53  ;;  %v4166_v49 = vld [vmem:[#allocation13 + $0x5e0] sm:$0xff] }
 0x4b7   : > { %3733 = vmatpush.msra.mxu3 %v3677_v27  ;;  %3953 = vmatpush.msrb.mxu0 %v3917_v39  ;;  %v4247_v53 = vld [vmem:[#allocation13 + $0x660] sm:$0xff]  ;;  %v4003_v27 = vld [vmem:[#allocation13 + $0x4d8] sm:$0xff] }
 0x4b8   : > { %3814 = vmatpush.msrb.mxu1 %v3756_v14  ;;  %3872 = vmatpush.msrb.mxu2 %v3836_v52  ;;  %v4086_v39 = vld [vmem:[#allocation13 + $0x558] sm:$0xff]  ;;  %v4164_v52 = vld [vmem:[#allocation13 + $0x5d0] sm:$0xff] }
 0x4b9   : > { %3734 = vmatpush.msra.mxu3 %v3675_v59  ;;  %3954 = vmatpush.msrb.mxu0 %v3915_v7  ;;  %v4009_v14 = vpop.permute.xlu1 %4008  ;;  %v4245_v59 = vld [vmem:[#allocation13 + $0x650] sm:$0xff]  ;;  %v4001_v7 = vld [vmem:[#allocation13 + $0x4c8] sm:$0xff] }
 0x4ba   : > { %3815 = vmatpush.msrb.mxu1 %v3754_v63  ;;  %3873 = vmatpush.msrb.mxu2 %v3834_v60  ;;  %v8632_v16 = vpop.permute.xlu0 %3846  ;;  %v4084_v63 = vld [vmem:[#allocation13 + $0x548] sm:$0xff]  ;;  %v4243_v60 = vld [vmem:[#allocation13 + $0x640] sm:$0xff] }
 0x4bb   : > { %6198 = vmatmul.msk.f32.vlgmr.msrb.gmra.mxu3 %vm3311_vm5, %v8587_v32  ;;  %6204 = vmatmul.msk.f32.vlgmr.msra.gmra.mxu1 %vm3311_vm5, %v8585_v23  ;;  %v4081_v23 = vld [vmem:[#allocation13 + $0x530] sm:$0xff]  ;;  %v3916_v32 = vld [vmem:[#allocation13 + $0x428] sm:$0xff] }
 0x4bc   : > { %6207 = vmatmul.msk.f32.vlgmr.msra.gmra.mxu2 %vm3311_vm5, %v8500_v6  ;;  %6213 = vmatmul.msk.f32.vlgmr.msra.gmra.mxu0 %vm3311_vm5, %v3766_v21 }
 0x4bd   : > { %3735 = vmatpush.msra.mxu3 %v3673_v40  ;;  %3816 = vmatpush.msrb.mxu1 %v3752_v58  ;;  %v4162_v40 = vld [vmem:[#allocation13 + $0x5c0] sm:$0xff]  ;;  %v3999_v58 = vld [vmem:[#allocation13 + $0x4b8] sm:$0xff] }
 0x4be   : > { %3874 = vmatpush.msrb.mxu2 %v3832_v41  ;;  %3955 = vmatpush.msrb.mxu0 %v3913_v19  ;;  %v4160_v41 = vld [vmem:[#allocation13 + $0x5b0] sm:$0xff] }
 0x4bf   : > { %3736 = vmatpush.msra.mxu3 %v3671_v56  ;;  %3817 = vmatpush.msrb.mxu1 %v3750_v26  ;;  %v4241_v19 = vld [vmem:[#allocation13 + $0x630] sm:$0xff]  ;;  %v8659_v56 = vpop.permute.xlu2 %4010  ;;  %v3997_v26 = vld [vmem:[#allocation13 + $0x4a8] sm:$0xff] }
 0x4c0   : > { %3956 = vmatpush.msrb.mxu0 %v3911_v5  ;;  %3875 = vmatpush.msrb.mxu2 %v3830_v47  ;;  %v4080_v5 = vld [vmem:[#allocation13 + $0x528] sm:$0xff]  ;;  %v4158_v47 = vld [vmem:[#allocation13 + $0x5a0] sm:$0xff] }
 0x4c1   : > { %6221 = vmatpush.msk.msrb.mxu3 %vm742_vm0, %v3845_v18  ;;  %6227 = vmatpush.msk.msra.mxu1 %vm742_vm0, %v3926_v28  ;;  %v4239_v18 = vld [vmem:[#allocation13 + $0x620] sm:$0xff]  ;;  %v3995_v28 = vld [vmem:[#allocation13 + $0x498] sm:$0xff] }
 0x4c2   : > { %6230 = vmatpush.msk.msra.mxu2 %vm742_vm0, %v4006_v55  ;;  %6236 = vmatpush.msk.msra.mxu0 %vm742_vm0, %v4089_v15  ;;  %v3930_v48 = vpop.permute.xlu0 %3929  ;;  %v4078_v55 = vld [vmem:[#allocation13 + $0x518] sm:$0xff]  ;;  %v4156_v15 = vld [vmem:[#allocation13 + $0x590] sm:$0xff] }
 0x4c3   : > { %6199 = vmatmul.msk.f32.gmra.mxu3 %vm3311_vm5, %v8600_v51  ;;  %6205 = vmatmul.msk.f32.gmra.mxu1 %vm3311_vm5, %v8602_v8  ;;  %v4090_v51 = vld [vmem:[#allocation13 + $0x578] sm:$0xf]  ;;  %v4168_v8 = vld [vmem:[#allocation13 + $0x5f0] sm:$0xf] }
 0x4c4   : > { %6208 = vmatmul.msk.f32.gmra.mxu2 %vm3311_vm5, %v8508_v30  ;;  %6214 = vmatmul.msk.f32.gmra.mxu0 %vm3311_vm5, %v8618_v46 }
 0x4c5   : > { %3892 = vmatpush.msrb.mxu3 %v3843_v35  ;;  %3973 = vmatpush.msra.mxu1 %v3924_v37  ;;  %v3993_v35 = vld [vmem:[#allocation13 + $0x488] sm:$0xff] }
 0x4c6   : > { %4031 = vmatpush.msra.mxu2 %v4004_v54  ;;  %4112 = vmatpush.msra.mxu0 %v4087_v0  ;;  %v4076_v37 = vld [vmem:[#allocation13 + $0x508] sm:$0xff]  ;;  %v4235_v54 = vld [vmem:[#allocation13 + $0x600] sm:$0xff] }
 0x4c7   : > { %3893 = vmatpush.msrb.mxu3 %v3841_v29  ;;  %3974 = vmatpush.msra.mxu1 %v3922_v22  ;;  %v4154_v0 = vld [vmem:[#allocation13 + $0x580] sm:$0xff]  ;;  %v4169_v29 = vld [vmem:[#allocation13 + $0x5f8] sm:$0xf] }
 0x4c8   : > { %4032 = vmatpush.msra.mxu2 %v4002_v34  ;;  %4113 = vmatpush.msra.mxu0 %v4085_v11  ;;  %v4250_v22 = vld [vmem:[#allocation13 + $0x678] sm:$0xf]  ;;  %v8668_v34 = vpop.permute.xlu2 %4251 }
 0x4c9   : > { %3894 = vmatpush.msrb.mxu3 %v3839_v13  ;;  %3975 = vmatpush.msra.mxu1 %v3920_v10  ;;  %v4330_v13 = vld [vmem:[#allocation13 + $0x6f0] sm:$0xf] }
 0x4ca   : > { %4114 = vmatpush.msra.mxu0 %v4083_v45  ;;  %4033 = vmatpush.msra.mxu2 %v4000_v24  ;;  %v8670_v11 = vpop.permute.xlu0 %4170  ;;  %v4411_v10 = vld [vmem:[#allocation13 + $0x770] sm:$0xf]  ;;  %v4167_v45 = vld [vmem:[#allocation13 + $0x5e8] sm:$0xff] }
 0x4cb   : > { %6210 = vmatmul.msk.f32.vlgmr.msra.gmra.mxu3 %vm3311_vm5, %v8500_v6  ;;  %6216 = vmatmul.msk.f32.vlgmr.msrb.gmra.mxu1 %vm3311_vm5, %v3766_v21  ;;  %v3994_v6 = vld [vmem:[#allocation13 + $0x490] sm:$0xff]  ;;  %v4082_v21 = vld [vmem:[#allocation13 + $0x538] sm:$0xff]  ;;  %v4248_v24 = vld [vmem:[#allocation13 + $0x668] sm:$0xff] }
 0x4cc   : > { %6219 = vmatmul.msk.f32.vlgmr.msrb.gmra.mxu2 %vm3311_vm5, %v8632_v16  ;;  %6225 = vmatmul.msk.f32.vlgmr.msrb.gmra.mxu0 %vm3311_vm5, %v3928_v62 }
 0x4cd   : > { %3895 = vmatpush.msrb.mxu3 %v3837_v57  ;;  %3976 = vmatpush.msra.mxu1 %v3918_v9  ;;  %v4409_v57 = vld [vmem:[#allocation13 + $0x760] sm:$0xff]  ;;  %v4246_v9 = vld [vmem:[#allocation13 + $0x658] sm:$0xff] }
 0x4ce   : > { %4034 = vmatpush.msra.mxu2 %v3998_v33  ;;  %4115 = vmatpush.msra.mxu0 %v4081_v23  ;;  %v4407_v33 = vld [vmem:[#allocation13 + $0x750] sm:$0xff]  ;;  %v4163_v23 = vld [vmem:[#allocation13 + $0x5c8] sm:$0xff] }
 0x4cf   : > { %3896 = vmatpush.msrb.mxu3 %v3835_v2  ;;  %3977 = vmatpush.msra.mxu1 %v3916_v32  ;;  %v4244_v2 = vld [vmem:[#allocation13 + $0x648] sm:$0xff]  ;;  %v4405_v32 = vld [vmem:[#allocation13 + $0x740] sm:$0xff] }
 0x4d0   : > { %4035 = vmatpush.msra.mxu2 %v3996_v36  ;;  %4116 = vmatpush.msra.mxu0 %v4079_v44  ;;  %v4324_v36 = vld [vmem:[#allocation13 + $0x6c0] sm:$0xff]  ;;  %v4161_v44 = vld [vmem:[#allocation13 + $0x5b8] sm:$0xff] }
 0x4d1   : > { %3897 = vmatpush.msrb.mxu3 %v3833_v43  ;;  %3978 = vmatpush.msra.mxu1 %v3914_v61  ;;  %v4242_v43 = vld [vmem:[#allocation13 + $0x638] sm:$0xff]  ;;  %v8683_v61 = vpop.permute.xlu1 %4172 }
 0x4d2   : > { %4036 = vmatpush.msra.mxu2 %v3994_v6  ;;  %4117 = vmatpush.msra.mxu0 %v4077_v12  ;;  %v8685_v6 = vpop.permute.xlu0 %4253  ;;  %v4322_v12 = vld [vmem:[#allocation13 + $0x6b0] sm:$0xff] }
 0x4d3   : > { %6211 = vmatmul.msk.f32.gmra.mxu3 %vm3311_vm5, %v8508_v30  ;;  %6217 = vmatmul.msk.f32.gmra.mxu1 %vm3311_vm5, %v8618_v46  ;;  %v4088_v30 = vld [vmem:[#allocation13 + $0x568] sm:$0xff]  ;;  %v4237_v46 = vld [vmem:[#allocation13 + $0x610] sm:$0xff] }
 0x4d4   : > { %6220 = vmatmul.msk.f32.gmra.mxu2 %vm3311_vm5, %v8640_v17  ;;  %6226 = vmatmul.msk.f32.gmra.mxu0 %vm3311_vm5, %v3930_v48 }
 0x4d5   : > { %3898 = vmatpush.msrb.mxu3 %v3831_v3  ;;  %3979 = vmatpush.msra.mxu1 %v3912_v20  ;;  %v4159_v3 = vld [vmem:[#allocation13 + $0x5a8] sm:$0xff] }
 0x4d6   : > { %4118 = vmatpush.msra.mxu0 %v4075_v42  ;;  %4037 = vmatpush.msra.mxu2 %v3992_v25  ;;  %v4240_v20 = vld [vmem:[#allocation13 + $0x628] sm:$0xff]  ;;  %v4401_v42 = vld [vmem:[#allocation13 + $0x720] sm:$0xff]  ;;  %v4157_v25 = vld [vmem:[#allocation13 + $0x598] sm:$0xff] }
 0x4d7   : > { %6233 = vmatpush.msk.msra.mxu3 %vm742_vm0, %v4007_v31  ;;  %6239 = vmatpush.msk.msrb.mxu1 %vm742_vm0, %v4090_v51  ;;  %v4238_v31 = vld [vmem:[#allocation13 + $0x618] sm:$0xff]  ;;  %v4399_v51 = vld [vmem:[#allocation13 + $0x710] sm:$0xff] }
 0x4d8   : > { %6242 = vmatpush.msk.msrb.mxu2 %vm742_vm0, %v4168_v8  ;;  %6248 = vmatpush.msk.msrb.mxu0 %vm742_vm0, %v4249_v4  ;;  %v4155_v8 = vld [vmem:[#allocation13 + $0x588] sm:$0xff] }
 0x4d9   : > { %4054 = vmatpush.msra.mxu3 %v4005_v38  ;;  %4135 = vmatpush.msrb.mxu1 %v4088_v30  ;;  %v4236_v4 = vld [vmem:[#allocation13 + $0x608] sm:$0xff]  ;;  %v4397_v38 = vld [vmem:[#allocation13 + $0x700] sm:$0xff] }
 0x4da   : > { %4193 = vmatpush.msrb.mxu2 %v4166_v49  ;;  %4274 = vmatpush.msrb.mxu0 %v4247_v53  ;;  %v4316_v30 = vld [vmem:[#allocation13 + $0x680] sm:$0xff]  ;;  %v4331_v49 = vld [vmem:[#allocation13 + $0x6f8] sm:$0xf] }
 0x4db   : > { %6222 = vmatmul.msk.f32.vlgmr.msrb.gmra.mxu3 %vm3311_vm5, %v8632_v16  ;;  %6228 = vmatmul.msk.f32.vlgmr.msra.gmra.mxu1 %vm3311_vm5, %v3928_v62  ;;  %v4328_v16 = vld [vmem:[#allocation13 + $0x6e0] sm:$0xff]  ;;  %v4326_v62 = vld [vmem:[#allocation13 + $0x6d0] sm:$0xff]  ;;  %v4412_v53 = vld [vmem:[#allocation13 + $0x778] sm:$0xf] }
 0x4dc   : > { %6231 = vmatmul.msk.f32.vlgmr.msra.gmra.mxu2 %vm3311_vm5, %v4009_v14  ;;  %6237 = vmatmul.msk.f32.vlgmr.msra.gmra.mxu0 %vm3311_vm5, %v8532_v1 }
 0x4dd   : > { %4055 = vmatpush.msra.mxu3 %v4003_v27  ;;  %4136 = vmatpush.msrb.mxu1 %v4086_v39  ;;  %v8695_v27 = vpop.permute.xlu1 %4332  ;;  %v8697_v39 = vpop.permute.xlu0 %4413 }
 0x4de   : > { %4194 = vmatpush.msrb.mxu2 %v4164_v52  ;;  %4275 = vmatpush.msrb.mxu0 %v4245_v59  ;;  %v4573_v52 = vld [vmem:[#allocation13 + $0x870] sm:$0xf]  ;;  %v4329_v59 = vld [vmem:[#allocation13 + $0x6e8] sm:$0xff] }
 0x4df   : > { %4056 = vmatpush.msra.mxu3 %v4001_v7  ;;  %4137 = vmatpush.msrb.mxu1 %v4084_v63  ;;  %v4410_v7 = vld [vmem:[#allocation13 + $0x768] sm:$0xff]  ;;  %v4492_v63 = vld [vmem:[#allocation13 + $0x7e0] sm:$0xff] }
 0x4e0   : > { %4276 = vmatpush.msrb.mxu0 %v4243_v60  ;;  %4195 = vmatpush.msrb.mxu2 %v4162_v40  ;;  %v4571_v60 = vld [vmem:[#allocation13 + $0x860] sm:$0xff]  ;;  %v4327_v40 = vld [vmem:[#allocation13 + $0x6d8] sm:$0xff] }
 0x4e1   : > { %4057 = vmatpush.msra.mxu3 %v3999_v58  ;;  %4138 = vmatpush.msrb.mxu1 %v4082_v21  ;;  %v4408_v58 = vld [vmem:[#allocation13 + $0x758] sm:$0xff]  ;;  %v4490_v21 = vld [vmem:[#allocation13 + $0x7d0] sm:$0xff] }
 0x4e2   : > { %4196 = vmatpush.msrb.mxu2 %v4160_v41  ;;  %4277 = vmatpush.msrb.mxu0 %v4241_v19  ;;  %v4569_v41 = vld [vmem:[#allocation13 + $0x850] sm:$0xff]  ;;  %v4325_v19 = vld [vmem:[#allocation13 + $0x6c8] sm:$0xff] }
 0x4e3   : > { %6223 = vmatmul.msk.f32.gmra.mxu3 %vm3311_vm5, %v8640_v17  ;;  %6229 = vmatmul.msk.f32.gmra.mxu1 %vm3311_vm5, %v3930_v48  ;;  %v4403_v17 = vld [vmem:[#allocation13 + $0x730] sm:$0xff]  ;;  %v4320_v48 = vld [vmem:[#allocation13 + $0x6a0] sm:$0xff] }
 0x4e4   : > { %6232 = vmatmul.msk.f32.gmra.mxu2 %vm3311_vm5, %v8659_v56  ;;  %6238 = vmatmul.msk.f32.gmra.mxu0 %vm3311_vm5, %v8522_v50 }
 0x4e5   : > { %4058 = vmatpush.msra.mxu3 %v3997_v26  ;;  %4139 = vmatpush.msrb.mxu1 %v4080_v5  ;;  %v4567_v26 = vld [vmem:[#allocation13 + $0x840] sm:$0xff] }
 0x4e6   : > { %4197 = vmatpush.msrb.mxu2 %v4158_v47  ;;  %4278 = vmatpush.msrb.mxu0 %v4239_v18  ;;  %v4488_v5 = vld [vmem:[#allocation13 + $0x7c0] sm:$0xff]  ;;  %v4323_v47 = vld [vmem:[#allocation13 + $0x6b8] sm:$0xff] }
 0x4e7   : > { %4059 = vmatpush.msra.mxu3 %v3995_v28  ;;  %4140 = vmatpush.msrb.mxu1 %v4078_v55  ;;  %v4404_v18 = vld [vmem:[#allocation13 + $0x738] sm:$0xff]  ;;  %v8711_v28 = vpop.permute.xlu2 %4334  ;;  %v8713_v55 = vpop.permute.xlu1 %4415 }
 0x4e8   : > { %4198 = vmatpush.msrb.mxu2 %v4156_v15  ;;  %4279 = vmatpush.msrb.mxu0 %v4237_v46  ;;  %v4486_v15 = vld [vmem:[#allocation13 + $0x7b0] sm:$0xff] }
 0x4e9   : > { %4060 = vmatpush.msra.mxu3 %v3993_v35  ;;  %4141 = vmatpush.msrb.mxu1 %v4076_v37  ;;  %v4565_v46 = vld [vmem:[#allocation13 + $0x830] sm:$0xff]  ;;  %v4321_v35 = vld [vmem:[#allocation13 + $0x6a8] sm:$0xff] }
 0x4ea   : > { %4280 = vmatpush.msrb.mxu0 %v4235_v54  ;;  %4199 = vmatpush.msrb.mxu2 %v4154_v0  ;;  %v4402_v37 = vld [vmem:[#allocation13 + $0x728] sm:$0xff]  ;;  %v4484_v54 = vld [vmem:[#allocation13 + $0x7a0] sm:$0xff] }
 0x4eb   : > { %6234 = vmatmul.msk.f32.vlgmr.msra.gmra.mxu3 %vm3311_vm5, %v4009_v14  ;;  %6240 = vmatmul.msk.f32.vlgmr.msrb.gmra.mxu1 %vm3311_vm5, %v8532_v1  ;;  %v4165_v1 = vld [vmem:[#allocation13 + $0x5d8] sm:$0xff]  ;;  %v4494_v14 = vld [vmem:[#allocation13 + $0x7f0] sm:$0xf]  ;;  %v4563_v0 = vld [vmem:[#allocation13 + $0x820] sm:$0xff] }
 0x4ec   : > { %6243 = vmatmul.msk.f32.vlgmr.msrb.gmra.mxu2 %vm3311_vm5, %v8670_v11  ;;  %6249 = vmatmul.msk.f32.vlgmr.msrb.gmra.mxu0 %vm3311_vm5, %v8668_v34 }
 0x4ed   : > { %6245 = vmatpush.msk.msrb.mxu3 %vm742_vm0, %v4169_v29  ;;  %6251 = vmatpush.msk.msra.mxu1 %vm742_vm0, %v4250_v22  ;;  %v4319_v29 = vld [vmem:[#allocation13 + $0x698] sm:$0xff] }
 0x4ee   : > { %6254 = vmatpush.msk.msra.mxu2 %vm742_vm0, %v4330_v13  ;;  %6260 = vmatpush.msk.msra.mxu0 %vm742_vm0, %v4411_v10  ;;  %v4400_v22 = vld [vmem:[#allocation13 + $0x718] sm:$0xff]  ;;  %v4317_v13 = vld [vmem:[#allocation13 + $0x688] sm:$0xff] }
 0x4ef   : > { %4216 = vmatpush.msrb.mxu3 %v4167_v45  ;;  %4297 = vmatpush.msra.mxu1 %v4248_v24  ;;  %v4398_v10 = vld [vmem:[#allocation13 + $0x708] sm:$0xff]  ;;  %v4480_v45 = vld [vmem:[#allocation13 + $0x780] sm:$0xff] }
 0x4f0   : > { %4355 = vmatpush.msra.mxu2 %v4328_v16  ;;  %4436 = vmatpush.msra.mxu0 %v4409_v57  ;;  %v4559_v24 = vld [vmem:[#allocation13 + $0x800] sm:$0xff]  ;;  %v4495_v16 = vld [vmem:[#allocation13 + $0x7f8] sm:$0xf] }
 0x4f1   : > { %4217 = vmatpush.msrb.mxu3 %v4165_v1  ;;  %4298 = vmatpush.msra.mxu1 %v4246_v9  ;;  %v4574_v57 = vld [vmem:[#allocation13 + $0x878] sm:$0xf]  ;;  %v8723_v1 = vpop.permute.xlu2 %4575  ;;  %v4654_v9 = vld [vmem:[#allocation13 + $0x8f0] sm:$0xf] }
 0x4f2   : > { %4356 = vmatpush.msra.mxu2 %v4326_v62  ;;  %4437 = vmatpush.msra.mxu0 %v4407_v33  ;;  %v4735_v62 = vld [vmem:[#allocation13 + $0x970] sm:$0xf] }
 0x4f3   : > { %4218 = vmatpush.msrb.mxu3 %v4163_v23  ;;  %4299 = vmatpush.msra.mxu1 %v4244_v2  ;;  %v8729_v33 = vld [vmem:[#allocation2 + $0x3] sm:$0xff]  ;;  %v4493_v23 = vld [vmem:[#allocation13 + $0x7e8] sm:$0xff] }
 0x4f4   : > { %4438 = vmatpush.msra.mxu0 %v4405_v32  ;;  %4357 = vmatpush.msra.mxu2 %v4324_v36  ;;  %v4572_v2 = vld [vmem:[#allocation13 + $0x868] sm:$0xff]  ;;  %v4652_v32 = vld [vmem:[#allocation13 + $0x8e0] sm:$0xff] }
 0x4f5   : > { %6235 = vmatmul.msk.f32.gmra.mxu3 %vm3311_vm5, %v8659_v56  ;;  %6241 = vmatmul.msk.f32.gmra.mxu1 %vm3311_vm5, %v8522_v50  ;;  %v4318_v50 = vld [vmem:[#allocation13 + $0x690] sm:$0xff]  ;;  %v4406_v56 = vld [vmem:[#allocation13 + $0x748] sm:$0xff]  ;;  %v4733_v36 = vld [vmem:[#allocation13 + $0x960] sm:$0xff] }
 0x4f6   : > { %6244 = vmatmul.msk.f32.gmra.mxu2 %vm3311_vm5, %v8683_v61  ;;  %6250 = vmatmul.msk.f32.gmra.mxu0 %vm3311_vm5, %v8685_v6 }
 0x4f7   : > { %4219 = vmatpush.msrb.mxu3 %v4161_v44  ;;  %4300 = vmatpush.msra.mxu1 %v4242_v43  ;;  %v4491_v44 = vld [vmem:[#allocation13 + $0x7d8] sm:$0xff] }
 0x4f8   : > { %4358 = vmatpush.msra.mxu2 %v4322_v12  ;;  %4439 = vmatpush.msra.mxu0 %v4403_v17  ;;  %v4570_v43 = vld [vmem:[#allocation13 + $0x858] sm:$0xff] }
 0x4f9   : > { %4220 = vmatpush.msrb.mxu3 %v4159_v3  ;;  %4301 = vmatpush.msra.mxu1 %v4240_v20  ;;  %v4489_v3 = vld [vmem:[#allocation13 + $0x7c8] sm:$0xff] }
 0x4fa   : > { %4359 = vmatpush.msra.mxu2 %v4320_v48  ;;  %4440 = vmatpush.msra.mxu0 %v4401_v42  ;;  %v4568_v20 = vld [vmem:[#allocation13 + $0x848] sm:$0xff]  ;;  %v4648_v48 = vld [vmem:[#allocation13 + $0x8c0] sm:$0xff] }
 0x4fb   : > { %4221 = vmatpush.msrb.mxu3 %v4157_v25  ;;  %4302 = vmatpush.msra.mxu1 %v4238_v31  ;;  %v4729_v42 = vld [vmem:[#allocation13 + $0x940] sm:$0xff]  ;;  %v8743_v25 = vpop.f32.mrf.mxu2  ;;  %v4487_v31 = vld [vmem:[#allocation13 + $0x7b8] sm:$0xff] }
 0x4fc   : > { %4360 = vmatpush.msra.mxu2 %v4318_v50  ;;  %4441 = vmatpush.msra.mxu0 %v4399_v51  ;;  %v4566_v50 = vld [vmem:[#allocation13 + $0x838] sm:$0xff]  ;;  %v8745_v51 = vpop.permute.xlu0 %4577 }
 0x4fd   : > { %4222 = vmatpush.msrb.mxu3 %v4155_v8  ;;  %4303 = vmatpush.msra.mxu1 %v4236_v4  ;;  %v4646_v8 = vld [vmem:[#allocation13 + $0x8b0] sm:$0xff] }
 0x4fe   : > { %4442 = vmatpush.msra.mxu0 %v4397_v38  ;;  %4361 = vmatpush.msra.mxu2 %v4316_v30  ;;  %v4727_v4 = vld [vmem:[#allocation13 + $0x930] sm:$0xff]  ;;  %v8753_v30 = vld [vmem:[#allocation2 + $0xb] sm:$0x3] }
 0x4ff   : > { %6246 = vmatmul.msk.f32.vlgmr.msrb.gmra.mxu3 %vm3311_vm5, %v8670_v11  ;;  %6252 = vmatmul.msk.f32.vlgmr.msra.gmra.mxu1 %vm3311_vm5, %v8668_v34  ;;  %v4482_v34 = vld [vmem:[#allocation13 + $0x790] sm:$0xff]  ;;  %v8741_v17 = vpop.f32.mrf.mxu1 }
 0x500   : > { %6255 = vmatmul.msk.f32.vlgmr.msra.gmra.mxu2 %vm3311_vm5, %v8695_v27  ;;  %6261 = vmatmul.msk.f32.vlgmr.msra.gmra.mxu0 %vm3311_vm5, %v8697_v39  ;;  %v4561_v11 = vld [vmem:[#allocation13 + $0x810] sm:$0xff] }
 0x501   : > { %6257 = vmatpush.msk.msra.mxu3 %vm742_vm0, %v4331_v49  ;;  %6263 = vmatpush.msk.msrb.mxu1 %vm742_vm0, %v4412_v53  ;;  %v4485_v49 = vld [vmem:[#allocation13 + $0x7a8] sm:$0xff] }
 0x502   : > { %6266 = vmatpush.msk.msrb.mxu2 %vm742_vm0, %v4494_v14  ;;  %6272 = vmatpush.msk.msrb.mxu0 %vm742_vm0, %v4573_v52  ;;  %v4564_v53 = vld [vmem:[#allocation13 + $0x828] sm:$0xff]  ;;  %v4483_v52 = vld [vmem:[#allocation13 + $0x798] sm:$0xff] }
 0x503   : > { %4378 = vmatpush.msra.mxu3 %v4329_v59  ;;  %4459 = vmatpush.msrb.mxu1 %v4410_v7  ;;  %v4562_v59 = vld [vmem:[#allocation13 + $0x818] sm:$0xff] }
 0x504   : > { %4517 = vmatpush.msrb.mxu2 %v4492_v63  ;;  %4598 = vmatpush.msrb.mxu0 %v4571_v60  ;;  %v4642_v63 = vld [vmem:[#allocation13 + $0x890] sm:$0xff] }
 0x505   : > { %4379 = vmatpush.msra.mxu3 %v4327_v40  ;;  %4460 = vmatpush.msrb.mxu1 %v4408_v58  ;;  %v8751_v38 = vpop.f32.mrf.mxu3  ;;  %v4723_v60 = vld [vmem:[#allocation13 + $0x910] sm:$0xff]  ;;  %v4481_v40 = vld [vmem:[#allocation13 + $0x788] sm:$0xff] }
 0x506   : > { %4518 = vmatpush.msrb.mxu2 %v4490_v21  ;;  %4599 = vmatpush.msrb.mxu0 %v4569_v41  ;;  %v4560_v58 = vld [vmem:[#allocation13 + $0x808] sm:$0xff]  ;;  %v4640_v21 = vld [vmem:[#allocation13 + $0x880] sm:$0xff] }
 0x507   : > { %4380 = vmatpush.msra.mxu3 %v4325_v19  ;;  %4461 = vmatpush.msrb.mxu1 %v4406_v56  ;;  %v4721_v41 = vld [vmem:[#allocation13 + $0x900] sm:$0xff]  ;;  %v8763_v19 = vpop.f32.mrf.mxu2  ;;  %v8765_v56 = vpop.permute.xlu1 %4656 }
 0x508   : > { %4600 = vmatpush.msrb.mxu0 %v4567_v26  ;;  %4519 = vmatpush.msrb.mxu2 %v4488_v5  ;;  %v4655_v26 = vld [vmem:[#allocation13 + $0x8f8] sm:$0xf] }
 0x509   : > { %6247 = vmatmul.msk.f32.gmra.mxu3 %vm3311_vm5, %v8683_v61  ;;  %6253 = vmatmul.msk.f32.gmra.mxu1 %vm3311_vm5, %v8685_v6  ;;  %v4650_v61 = vld [vmem:[#allocation13 + $0x8d0] sm:$0xff]  ;;  %v4736_v5 = vld [vmem:[#allocation13 + $0x978] sm:$0xf] }
 0x50a   : > { %6256 = vmatmul.msk.f32.gmra.mxu2 %vm3311_vm5, %v8711_v28  ;;  %6262 = vmatmul.msk.f32.gmra.mxu0 %vm3311_vm5, %v8713_v55  ;;  %v4731_v6 = vld [vmem:[#allocation13 + $0x950] sm:$0xff] }
 0x50b   : > { %4381 = vmatpush.msra.mxu3 %v4323_v47  ;;  %4462 = vmatpush.msrb.mxu1 %v4404_v18  ;;  %v8769_v18 = vpop.permute.xlu0 %4737 }
 0x50c   : > { %4520 = vmatpush.msrb.mxu2 %v4486_v15  ;;  %4601 = vmatpush.msrb.mxu0 %v4565_v46  ;;  %v4653_v46 = vld [vmem:[#allocation13 + $0x8e8] sm:$0xff] }
 0x50d   : > { %4382 = vmatpush.msra.mxu3 %v4321_v35  ;;  %4463 = vmatpush.msrb.mxu1 %v4402_v37  ;;  %v4734_v35 = vld [vmem:[#allocation13 + $0x968] sm:$0xff] }
 0x50e   : > { %4521 = vmatpush.msrb.mxu2 %v4484_v54  ;;  %4602 = vmatpush.msrb.mxu0 %v4563_v0  ;;  %v4814_v54 = vld [vmem:[#allocation13 + $0x9e0] sm:$0xff] }
 0x50f   : > { %4383 = vmatpush.msra.mxu3 %v4319_v29  ;;  %4464 = vmatpush.msrb.mxu1 %v4400_v22  ;;  %v4897_v0 = vld [vmem:[#allocation13 + $0xa60] sm:$0xff]  ;;  %v4651_v29 = vld [vmem:[#allocation13 + $0x8d8] sm:$0xff] }
 0x510   : > { %4522 = vmatpush.msrb.mxu2 %v4482_v34  ;;  %4603 = vmatpush.msrb.mxu0 %v4561_v11  ;;  %v4732_v22 = vld [vmem:[#allocation13 + $0x958] sm:$0xff]  ;;  %v4812_v34 = vld [vmem:[#allocation13 + $0x9d0] sm:$0xff] }
 0x511   : > { %4384 = vmatpush.msra.mxu3 %v4317_v13  ;;  %4465 = vmatpush.msrb.mxu1 %v4398_v10  ;;  %v4895_v11 = vld [vmem:[#allocation13 + $0xa50] sm:$0xff]  ;;  %v4649_v13 = vld [vmem:[#allocation13 + $0x8c8] sm:$0xff] }
 0x512   : > { %4523 = vmatpush.msrb.mxu2 %v4480_v45  ;;  %4604 = vmatpush.msrb.mxu0 %v4559_v24  ;;  %v4730_v10 = vld [vmem:[#allocation13 + $0x948] sm:$0xff]  ;;  %v4810_v45 = vld [vmem:[#allocation13 + $0x9c0] sm:$0xff] }
 0x513   : > { %6258 = vmatmul.msk.f32.vlgmr.msra.gmra.mxu3 %vm3311_vm5, %v8695_v27  ;;  %6264 = vmatmul.msk.f32.vlgmr.msrb.gmra.mxu1 %vm3311_vm5, %v8697_v39  ;;  %v4644_v27 = vld [vmem:[#allocation13 + $0x8a0] sm:$0xff] }
 0x514   : > { %6267 = vmatmul.msk.f32.vlgmr.msrb.gmra.mxu2 %vm3311_vm5, %v8729_v33  ;;  %6273 = vmatmul.msk.f32.vlgmr.msrb.gmra.mxu0 %vm3311_vm5, %v8723_v1  ;;  %v4725_v39 = vld [vmem:[#allocation13 + $0x920] sm:$0xff] }
 0x515   : > { %6269 = vmatpush.msk.msrb.mxu3 %vm742_vm0, %v4495_v16  ;;  %6275 = vmatpush.msk.msra.mxu1 %vm742_vm0, %v4574_v57  ;;  %v4893_v24 = vld [vmem:[#allocation13 + $0xa40] sm:$0xff] }
 0x516   : > { %6278 = vmatpush.msk.msra.mxu2 %vm742_vm0, %v4654_v9  ;;  %6284 = vmatpush.msk.msra.mxu0 %vm742_vm0, %v4735_v62  ;;  %v4647_v9 = vld [vmem:[#allocation13 + $0x8b8] sm:$0xff] }
 0x517   : > { %4540 = vmatpush.msrb.mxu3 %v4493_v23  ;;  %4621 = vmatpush.msra.mxu1 %v4572_v2  ;;  %v8739_v12 = vpop.f32.mrf.mxu0  ;;  %v4728_v62 = vld [vmem:[#allocation13 + $0x938] sm:$0xff]  ;;  %v8793_v23 = vpop.permute.xlu1 %4739  ;;  %v4808_v2 = vld [vmem:[#allocation13 + $0x9b0] sm:$0xff] }
 0x518   : > { %4679 = vmatpush.msra.mxu2 %v4652_v32  ;;  %4760 = vmatpush.msra.mxu0 %v4733_v36  ;;  %v4891_v32 = vld [vmem:[#allocation13 + $0xa30] sm:$0xff] }
 0x519   : > { %4541 = vmatpush.msrb.mxu3 %v4491_v44  ;;  %4622 = vmatpush.msra.mxu1 %v4570_v43  ;;  %v4645_v44 = vld [vmem:[#allocation13 + $0x8a8] sm:$0xff] }
 0x51a   : > { %4680 = vmatpush.msra.mxu2 %v4650_v61  ;;  %4761 = vmatpush.msra.mxu0 %v4731_v6  ;;  %v4726_v43 = vld [vmem:[#allocation13 + $0x928] sm:$0xff]  ;;  %v4806_v61 = vld [vmem:[#allocation13 + $0x9a0] sm:$0xff] }
 0x51b   : > { %4542 = vmatpush.msrb.mxu3 %v4489_v3  ;;  %4623 = vmatpush.msra.mxu1 %v4568_v20  ;;  %v4889_v6 = vld [vmem:[#allocation13 + $0xa20] sm:$0xff]  ;;  %v4643_v3 = vld [vmem:[#allocation13 + $0x898] sm:$0xff] }
 0x51c   : > { %4681 = vmatpush.msra.mxu2 %v4648_v48  ;;  %4762 = vmatpush.msra.mxu0 %v4729_v42  ;;  %v4724_v20 = vld [vmem:[#allocation13 + $0x918] sm:$0xff]  ;;  %v4804_v48 = vld [vmem:[#allocation13 + $0x990] sm:$0xff] }
 0x51d   : > { %6259 = vmatmul.msk.f32.gmra.mxu3 %vm3311_vm5, %v8711_v28  ;;  %6265 = vmatmul.msk.f32.gmra.mxu1 %vm3311_vm5, %v8713_v55  ;;  %v4816_v28 = vld [vmem:[#allocation13 + $0x9f0] sm:$0xf] }
 0x51e   : > { %6268 = vmatmul.msk.f32.gmra.mxu2 %vm3311_vm5, %v8753_v30  ;;  %6274 = vmatmul.msk.f32.gmra.mxu0 %vm3311_vm5, %v8745_v51  ;;  %v4899_v55 = vld [vmem:[#allocation13 + $0xa70] sm:$0xf] }
 0x51f   : > { %4543 = vmatpush.msrb.mxu3 %v4487_v31  ;;  %4624 = vmatpush.msra.mxu1 %v4566_v50  ;;  %v8759_v14 = vpop.f32.mrf.mxu0  ;;  %v4887_v42 = vld [vmem:[#allocation13 + $0xa10] sm:$0xff]  ;;  %v3396_v31 = vadd.f32 %v8743_v25, %v8751_v38  ;;  %v4641_v50 = vld [vmem:[#allocation13 + $0x888] sm:$0xff]  ;;  %v4817_v25 = vld [vmem:[#allocation13 + $0x9f8] sm:$0xf] }
 0x520   : > { %4682 = vmatpush.msra.mxu2 %v4646_v8  ;;  %4763 = vmatpush.msra.mxu0 %v4727_v4  ;;  %v8761_v7 = vpop.f32.mrf.mxu1  ;;  %v4802_v4 = vld [vmem:[#allocation13 + $0x980] sm:$0xff]  ;;  %v4900_v38 = vld [vmem:[#allocation13 + $0xa78] sm:$0xf] }
 0x521   : > { %4544 = vmatpush.msrb.mxu3 %v4485_v49  ;;  %4625 = vmatpush.msra.mxu1 %v4564_v53  ;;  %v3501_v53 = vadd.f32 %v8739_v12, %v3396_v31  ;;  %v4978_v12 = vld [vmem:[#allocation13 + $0xaf0] sm:$0xf] }
 0x522   : > { %4683 = vmatpush.msra.mxu2 %v4644_v27  ;;  %4764 = vmatpush.msra.mxu0 %v4725_v39  ;;  %v5047_v31 = vld [vmem:[#allocation13 + $0xb10] sm:$0xff] }
 0x523   : > { %4545 = vmatpush.msrb.mxu3 %v4483_v52  ;;  %4626 = vmatpush.msra.mxu1 %v4562_v59 }
 0x524   : > { %4684 = vmatpush.msra.mxu2 %v4642_v63  ;;  %4765 = vmatpush.msra.mxu0 %v4723_v60  ;;  %v5059_v63 = vld [vmem:[#allocation13 + $0xb70] sm:$0xf] }
 0x525   : > { %4546 = vmatpush.msrb.mxu3 %v4481_v40  ;;  %4627 = vmatpush.msra.mxu1 %v4560_v58  ;;  %v8820_v40 = vld [vmem:[#allocation2 + $0x4] sm:$0xff]  ;;  %v4815_v58 = vld [vmem:[#allocation13 + $0x9e8] sm:$0xff] }
 0x526   : > { %4685 = vmatpush.msra.mxu2 %v4640_v21  ;;  %4766 = vmatpush.msra.mxu0 %v4721_v41  ;;  %v8767_v47 = vpop.f32.mrf.mxu3  ;;  %v4898_v21 = vld [vmem:[#allocation13 + $0xa68] sm:$0xff]  ;;  %v4976_v41 = vld [vmem:[#allocation13 + $0xae0] sm:$0xff] }
 0x527   : > { %6270 = vmatmul.msk.f32.vlgmr.msrb.gmra.mxu3 %vm3311_vm5, %v8729_v33  ;;  %6276 = vmatmul.msk.f32.vlgmr.msra.gmra.mxu1 %vm3311_vm5, %v8723_v1  ;;  %v8775_v15 = vpop.f32.mrf.mxu0  ;;  %v8789_v1 = vpop.permute.xlu2 %4658  ;;  %v3399_v60 = vadd.f32 %v8763_v19, %v8767_v47  ;;  %v4813_v19 = vld [vmem:[#allocation13 + $0x9d8] sm:$0xff] }
 0x528   : > { %6279 = vmatmul.msk.f32.vlgmr.msra.gmra.mxu2 %vm3311_vm5, %v8765_v56  ;;  %6285 = vmatmul.msk.f32.vlgmr.msra.gmra.mxu0 %vm3311_vm5, %v8769_v18  ;;  %v8781_v37 = vpop.f32.mrf.mxu1 }
 0x529   : > { %6281 = vmatpush.msk.msra.mxu3 %vm742_vm0, %v4655_v26  ;;  %6287 = vmatpush.msk.msrb.mxu1 %vm742_vm0, %v4736_v5  ;;  %v4896_v26 = vld [vmem:[#allocation13 + $0xa58] sm:$0xff] }
 0x52a   : > { %6290 = vmatpush.msk.msrb.mxu2 %vm742_vm0, %v4816_v28  ;;  %6296 = vmatpush.msk.msrb.mxu0 %vm742_vm0, %v4899_v55  ;;  %v5055_v28 = vld [vmem:[#allocation13 + $0xb50] sm:$0xff] }
 0x52b   : > { %4702 = vmatpush.msra.mxu3 %v4653_v46  ;;  %4783 = vmatpush.msrb.mxu1 %v4734_v35  ;;  %v4811_v46 = vld [vmem:[#allocation13 + $0x9c8] sm:$0xff] }
 0x52c   : > { %4841 = vmatpush.msrb.mxu2 %v4814_v54  ;;  %4922 = vmatpush.msrb.mxu0 %v4897_v0  ;;  %v4894_v35 = vld [vmem:[#allocation13 + $0xa48] sm:$0xff]  ;;  %v3503_v54 = vadd.f32 %v8759_v14, %v3399_v60  ;;  %v4809_v14 = vld [vmem:[#allocation13 + $0x9b8] sm:$0xff]  ;;  %v5221_v60 = vld [vmem:[#allocation13 + $0xc70] sm:$0xf] }
 0x52d   : > { %4703 = vmatpush.msra.mxu3 %v4651_v29  ;;  %4784 = vmatpush.msrb.mxu1 %v4732_v22  ;;  %v4972_v22 = vld [vmem:[#allocation13 + $0xac0] sm:$0xff] }
 0x52e   : > { %4842 = vmatpush.msrb.mxu2 %v4812_v34  ;;  %4923 = vmatpush.msrb.mxu0 %v4895_v11  ;;  %v8787_v16 = vpop.f32.mrf.mxu3  ;;  %v5053_v34 = vld [vmem:[#allocation13 + $0xb40] sm:$0xff] }
 0x52f   : > { %4704 = vmatpush.msra.mxu3 %v4649_v13  ;;  %4785 = vmatpush.msrb.mxu1 %v4730_v10  ;;  %v3553_v57 = vpop.f32.mrf.mxu2  ;;  %v8810_v59 = vpop.permute.xlu2 %4818 }
 0x530   : > { %4843 = vmatpush.msrb.mxu2 %v4810_v45  ;;  %4924 = vmatpush.msrb.mxu0 %v4893_v24  ;;  %v8791_v33 = vpop.f32.mrf.mxu1  ;;  %v3582_v52 = vadd.f32 %v3553_v57, %v3501_v53  ;;  %v3419_v45 = vadd.f32 %v8787_v16, %v8741_v17  ;;  %v4892_v24 = vld [vmem:[#allocation13 + $0xa38] sm:$0xff]  ;;  %v8835_v57 = vpop.permute.xlu0 %4820  ;;  %v4807_v16 = vld [vmem:[#allocation13 + $0x9a8] sm:$0xff] }
 0x531   : > { %6271 = vmatmul.msk.f32.gmra.mxu3 %vm3311_vm5, %v8753_v30  ;;  %6277 = vmatmul.msk.f32.gmra.mxu1 %vm3311_vm5, %v8745_v51  ;;  %v8799_v36 = vpop.f32.mrf.mxu0  ;;  %v4722_v51 = vld [vmem:[#allocation13 + $0x908] sm:$0xff]  ;;  %v4885_v30 = vld [vmem:[#allocation13 + $0xa00] sm:$0xff]  ;;  %v8844_v17 = vld [vmem:[#allocation2 + $0xc] sm:$0x3] }
 0x532   : > { %6280 = vmatmul.msk.f32.gmra.mxu2 %vm3311_vm5, %v8789_v1  ;;  %6286 = vmatmul.msk.f32.gmra.mxu0 %vm3311_vm5, %v8793_v23  ;;  %v3663_v47 = vadd.f32 %v8775_v15, %v3582_v52 }
 0x533   : > { %4705 = vmatpush.msra.mxu3 %v4647_v9  ;;  %4786 = vmatpush.msrb.mxu1 %v4728_v62  ;;  %v5051_v9 = vld [vmem:[#allocation13 + $0xb30] sm:$0xff] }
 0x534   : > { %4844 = vmatpush.msrb.mxu2 %v4808_v2  ;;  %4925 = vmatpush.msrb.mxu0 %v4891_v32  ;;  %v4890_v2 = vld [vmem:[#allocation13 + $0xa28] sm:$0xff] }
 0x535   : > { %4706 = vmatpush.msra.mxu3 %v4645_v44  ;;  %4787 = vmatpush.msrb.mxu1 %v4726_v43  ;;  %v5049_v44 = vld [vmem:[#allocation13 + $0xb20] sm:$0xff]  ;;  %v3502_v43 = vadd.f32 %v8781_v37, %v3419_v45  ;;  %v4886_v37 = vld [vmem:[#allocation13 + $0xa08] sm:$0xff] }
 0x536   : > { %4845 = vmatpush.msrb.mxu2 %v4806_v61  ;;  %4926 = vmatpush.msrb.mxu0 %v4889_v6  ;;  %v3421_v8 = vpop.f32.mrf.mxu3  ;;  %v4805_v6 = vld [vmem:[#allocation13 + $0x998] sm:$0xff] }
 0x537   : > { %4707 = vmatpush.msra.mxu3 %v4643_v3  ;;  %4788 = vmatpush.msrb.mxu1 %v4724_v20  ;;  %v3556_v49 = vpop.f32.mrf.mxu2  ;;  %v3422_v11 = vadd.f32 %v3421_v8, %v8761_v7  ;;  %v4970_v7 = vld [vmem:[#allocation13 + $0xab0] sm:$0xff]  ;;  %v4888_v3 = vld [vmem:[#allocation13 + $0xa18] sm:$0xff]  ;;  %v4803_v8 = vld [vmem:[#allocation13 + $0x988] sm:$0xff] }
 0x538   : > { %4846 = vmatpush.msrb.mxu2 %v4804_v48  ;;  %4927 = vmatpush.msrb.mxu0 %v4887_v42  ;;  %v8808_v27 = vpop.f32.mrf.mxu1  ;;  %v3584_v13 = vadd.f32 %v3556_v49, %v3503_v54  ;;  %v4966_v42 = vld [vmem:[#allocation13 + $0xa90] sm:$0xff]  ;;  %v5045_v49 = vld [vmem:[#allocation13 + $0xb00] sm:$0xff]  ;;  %v5054_v54 = vld [vmem:[#allocation13 + $0xb48] sm:$0xff] }
 0x539   : > { %4708 = vmatpush.msra.mxu3 %v4641_v50  ;;  %4789 = vmatpush.msrb.mxu1 %v4722_v51  ;;  %v3796_v39 = vpop.f32.mrf.mxu0  ;;  %v3504_v62 = vadd.f32 %v8791_v33, %v3422_v11 }
 0x53a   : > { %4847 = vmatpush.msrb.mxu2 %v4802_v4  ;;  %4928 = vmatpush.msrb.mxu0 %v4885_v30  ;;  %v4964_v30 = vld [vmem:[#allocation13 + $0xa80] sm:$0xff] }
 0x53b   : > { %6282 = vmatmul.msk.f32.vlgmr.msra.gmra.mxu3 %vm3311_vm5, %v8765_v56  ;;  %6288 = vmatmul.msk.f32.vlgmr.msrb.gmra.mxu1 %vm3311_vm5, %v8769_v18  ;;  %v5057_v56 = vld [vmem:[#allocation13 + $0xb60] sm:$0xff]  ;;  %v4974_v18 = vld [vmem:[#allocation13 + $0xad0] sm:$0xff] }
 0x53c   : > { %6291 = vmatmul.msk.f32.vlgmr.msrb.gmra.mxu2 %vm3311_vm5, %v8810_v59  ;;  %6297 = vmatmul.msk.f32.vlgmr.msrb.gmra.mxu0 %vm3311_vm5, %v8820_v40 }
 0x53d   : > { %6293 = vmatpush.msk.msrb.mxu3 %vm742_vm0, %v4817_v25  ;;  %6299 = vmatpush.msk.msra.mxu1 %vm742_vm0, %v4900_v38  ;;  %v4979_v25 = vld [vmem:[#allocation13 + $0xaf8] sm:$0xf] }
 0x53e   : > { %6302 = vmatpush.msk.msra.mxu2 %vm742_vm0, %v4978_v12  ;;  %6308 = vmatpush.msk.msra.mxu0 %vm742_vm0, %v5059_v63  ;;  %v3576_v5 = vpop.f32.mrf.mxu3  ;;  %v5060_v38 = vld [vmem:[#allocation13 + $0xb78] sm:$0xf]  ;;  %v8857_v12 = vpop.permute.xlu0 %5061  ;;  %v5140_v63 = vld [vmem:[#allocation13 + $0xbf0] sm:$0xf] }
 0x53f   : > { %4864 = vmatpush.msrb.mxu3 %v4815_v58  ;;  %4945 = vmatpush.msra.mxu1 %v4898_v21  ;;  %v3715_v55 = vpop.f32.mrf.mxu2  ;;  %v3583_v50 = vadd.f32 %v3576_v5, %v3502_v43  ;;  %v4975_v5 = vld [vmem:[#allocation13 + $0xad8] sm:$0xff]  ;;  %v5128_v43 = vld [vmem:[#allocation13 + $0xb90] sm:$0xff] }
 0x540   : > { %5003 = vmatpush.msra.mxu2 %v4976_v41  ;;  %5084 = vmatpush.msra.mxu0 %v5057_v56  ;;  %v3744_v0 = vadd.f32 %v3715_v55, %v3663_v47  ;;  %v3660_v29 = vpop.f32.mrf.mxu1  ;;  %v5058_v41 = vld [vmem:[#allocation13 + $0xb68] sm:$0xff]  ;;  %v5056_v47 = vld [vmem:[#allocation13 + $0xb58] sm:$0xff]  ;;  %v5136_v55 = vld [vmem:[#allocation13 + $0xbd0] sm:$0xff] }
 0x541   : > { %4865 = vmatpush.msrb.mxu3 %v4813_v19  ;;  %4946 = vmatpush.msra.mxu1 %v4896_v26  ;;  %v3799_v15 = vpop.f32.mrf.mxu0  ;;  %v3664_v53 = vadd.f32 %v8808_v27, %v3583_v50  ;;  %v4977_v27 = vld [vmem:[#allocation13 + $0xae8] sm:$0xff] }
 0x542   : > { %5004 = vmatpush.msra.mxu2 %v4974_v18  ;;  %5085 = vmatpush.msra.mxu0 %v5055_v28  ;;  %v8831_v10 = vadd.f32 %v3796_v39, %v3744_v0  ;;  %v8855_v39 = vpop.permute.xlu1 %4980  ;;  %v5134_v0 = vld [vmem:[#allocation13 + $0xbc0] sm:$0xff] }
 0x543   : > { %4866 = vmatpush.msrb.mxu3 %v4811_v46  ;;  %4947 = vmatpush.msra.mxu1 %v4894_v35  ;;  %v5217_v46 = vld [vmem:[#allocation13 + $0xc50] sm:$0xff]  ;;  %v4973_v35 = vld [vmem:[#allocation13 + $0xac8] sm:$0xff] }
 0x544   : > { %5005 = vmatpush.msra.mxu2 %v4972_v22  ;;  %5086 = vmatpush.msra.mxu0 %v5053_v34  ;;  %v8876_v34 = vpop.permute.xlu2 %4982 }
 0x545   : > { %6283 = vmatmul.msk.f32.gmra.mxu3 %vm3311_vm5, %v8789_v1  ;;  %6289 = vmatmul.msk.f32.gmra.mxu1 %vm3311_vm5, %v8793_v23  ;;  %v3665_v1 = vadd.f32 %v8799_v36, %v3584_v13  ;;  %v4968_v23 = vld [vmem:[#allocation13 + $0xaa0] sm:$0xff]  ;;  %v4971_v13 = vld [vmem:[#allocation13 + $0xab8] sm:$0xff] }
 0x546   : > { %6292 = vmatmul.msk.f32.gmra.mxu2 %vm3311_vm5, %v8835_v57  ;;  %6298 = vmatmul.msk.f32.gmra.mxu0 %vm3311_vm5, %v8844_v17  ;;  %v3579_v32 = vpop.f32.mrf.mxu3 }
 0x547   : > { %4867 = vmatpush.msrb.mxu3 %v4809_v14  ;;  %4948 = vmatpush.msra.mxu1 %v4892_v24  ;;  %v3585_v33 = vadd.f32 %v3579_v32, %v3504_v62  ;;  %v3718_v61 = vpop.f32.mrf.mxu2 }
 0x548   : > { %5006 = vmatpush.msra.mxu2 %v4970_v7  ;;  %5087 = vmatpush.msra.mxu0 %v5051_v9  ;;  %v3746_v20 = vadd.f32 %v3718_v61, %v3665_v1  ;;  %v3819_v48 = vpop.f32.mrf.mxu1  ;;  %v5132_v7 = vld [vmem:[#allocation13 + $0xbb0] sm:$0xff]  ;;  %v5130_v1 = vld [vmem:[#allocation13 + $0xba0] sm:$0xff]  ;;  %v4965_v61 = vld [vmem:[#allocation13 + $0xa88] sm:$0xff] }
 0x549   : > { %4868 = vmatpush.msrb.mxu3 %v4807_v16  ;;  %4949 = vmatpush.msra.mxu1 %v4890_v2  ;;  %v3958_v36 = vpop.f32.mrf.mxu0  ;;  %v8850_v51 = vadd.f32 %v3660_v29, %v3585_v33  ;;  %v5215_v29 = vld [vmem:[#allocation13 + $0xc40] sm:$0xff]  ;;  %v5213_v9 = vld [vmem:[#allocation13 + $0xc30] sm:$0xff]  ;;  %v4969_v16 = vld [vmem:[#allocation13 + $0xaa8] sm:$0xff] }
 0x54a   : > { %5007 = vmatpush.msra.mxu2 %v4968_v23  ;;  %5088 = vmatpush.msra.mxu0 %v5049_v44  ;;  %v8852_v4 = vadd.f32 %v3799_v15, %v3746_v20  ;;  %v8880_v24 = vpop.permute.xlu1 %5063  ;;  %v5050_v2 = vld [vmem:[#allocation13 + $0xb28] sm:$0xff]  ;;  %v5211_v23 = vld [vmem:[#allocation13 + $0xc20] sm:$0xff]  ;;  %v5209_v33 = vld [vmem:[#allocation13 + $0xc10] sm:$0xff] }
 0x54b   : > { %4869 = vmatpush.msrb.mxu3 %v4805_v6  ;;  %4950 = vmatpush.msra.mxu1 %v4888_v3  ;;  %v5046_v6 = vld [vmem:[#allocation13 + $0xb08] sm:$0xff]  ;;  %v5126_v20 = vld [vmem:[#allocation13 + $0xb80] sm:$0xff] }
 0x54c   : > { %5008 = vmatpush.msra.mxu2 %v4966_v42  ;;  %5089 = vmatpush.msra.mxu0 %v5047_v31 }
 0x54d   : > { %4870 = vmatpush.msrb.mxu3 %v4803_v8  ;;  %4951 = vmatpush.msra.mxu1 %v4886_v37  ;;  %v5141_v8 = vld [vmem:[#allocation13 + $0xbf8] sm:$0xf] }
 0x54e   : > { %5009 = vmatpush.msra.mxu2 %v4964_v30  ;;  %5090 = vmatpush.msra.mxu0 %v5045_v49  ;;  %v3738_v52 = vpop.f32.mrf.mxu3  ;;  %v5222_v37 = vld [vmem:[#allocation13 + $0xc78] sm:$0xf] }
 0x54f   : > { %6294 = vmatmul.msk.f32.vlgmr.msrb.gmra.mxu3 %vm3311_vm5, %v8810_v59  ;;  %6300 = vmatmul.msk.f32.vlgmr.msra.gmra.mxu1 %vm3311_vm5, %v8820_v40  ;;  %v3745_v58 = vadd.f32 %v3738_v52, %v3664_v53  ;;  %v3877_v21 = vpop.f32.mrf.mxu2  ;;  %v5138_v59 = vld [vmem:[#allocation13 + $0xbe0] sm:$0xff]  ;;  %v5139_v53 = vld [vmem:[#allocation13 + $0xbe8] sm:$0xff]  ;;  %v5218_v52 = vld [vmem:[#allocation13 + $0xc58] sm:$0xff] }
 0x550   : > { %6303 = vmatmul.msk.f32.vlgmr.msra.gmra.mxu2 %vm3311_vm5, %v8855_v39  ;;  %6309 = vmatmul.msk.f32.vlgmr.msra.gmra.mxu0 %vm3311_vm5, %v8857_v12  ;;  %v3906_v56 = vadd.f32 %v3877_v21, %v8831_v10  ;;  %v3822_v19 = vpop.f32.mrf.mxu1  ;;  %v5219_v40 = vld [vmem:[#allocation13 + $0xc60] sm:$0xff]  ;;  %v5052_v10 = vld [vmem:[#allocation13 + $0xb38] sm:$0xff]  ;;  %v5216_v21 = vld [vmem:[#allocation13 + $0xc48] sm:$0xff] }
 0x551   : > { %6305 = vmatpush.msk.msra.mxu3 %vm742_vm0, %v4979_v25  ;;  %6311 = vmatpush.msk.msrb.mxu1 %vm742_vm0, %v5060_v38  ;;  %v8870_v26 = vadd.f32 %v3819_v48, %v3745_v58  ;;  %v3961_v18 = vpop.f32.mrf.mxu0  ;;  %v5207_v48 = vld [vmem:[#allocation13 + $0xc00] sm:$0xff]  ;;  %v5220_v25 = vld [vmem:[#allocation13 + $0xc68] sm:$0xff]  ;;  %v5137_v38 = vld [vmem:[#allocation13 + $0xbd8] sm:$0xff] }
 0x552   : > { %6314 = vmatpush.msk.msrb.mxu2 %vm742_vm0, %v5140_v63  ;;  %6320 = vmatpush.msk.msrb.mxu0 %vm742_vm0, %v5221_v60  ;;  %v8874_v28 = vadd.f32 %v3958_v36, %v3906_v56  ;;  %v8892_v36 = vpop.permute.xlu2 %5142  ;;  %v5224_v49 = vpop.permute.xlu1 %5223 }
 0x553   : > { %5026 = vmatpush.msra.mxu3 %v4977_v27  ;;  %5107 = vmatpush.msrb.mxu1 %v5058_v41 }
 0x554   : > { %5165 = vmatpush.msrb.mxu2 %v5138_v59  ;;  %5246 = vmatpush.msrb.mxu0 %v5219_v40  ;;  %v5133_v59 = vld [vmem:[#allocation13 + $0xbb8] sm:$0xff] }
 0x555   : > { %5027 = vmatpush.msra.mxu3 %v4975_v5  ;;  %5108 = vmatpush.msrb.mxu1 %v5056_v47  ;;  %v5214_v40 = vld [vmem:[#allocation13 + $0xc38] sm:$0xff]  ;;  %v5131_v47 = vld [vmem:[#allocation13 + $0xba8] sm:$0xff] }
 0x556   : > { %5166 = vmatpush.msrb.mxu2 %v5136_v55  ;;  %5247 = vmatpush.msrb.mxu0 %v5217_v46  ;;  %v3741_v22 = vpop.f32.mrf.mxu3  ;;  %v5129_v55 = vld [vmem:[#allocation13 + $0xb98] sm:$0xff] }
 0x557   : > { %5028 = vmatpush.msra.mxu3 %v4973_v35  ;;  %5109 = vmatpush.msrb.mxu1 %v5054_v54  ;;  %v3747_v11 = vadd.f32 %v3741_v22, %v8850_v51  ;;  %v3880_v15 = vpop.f32.mrf.mxu2  ;;  %v5210_v46 = vld [vmem:[#allocation13 + $0xc18] sm:$0xff]  ;;  %v5127_v22 = vld [vmem:[#allocation13 + $0xb88] sm:$0xff] }
 0x558   : > { %5167 = vmatpush.msrb.mxu2 %v5134_v0  ;;  %5248 = vmatpush.msrb.mxu0 %v5215_v29  ;;  %v3908_v45 = vadd.f32 %v3880_v15, %v8852_v4  ;;  %v3981_v14 = vpop.f32.mrf.mxu1 }
 0x559   : > { %6295 = vmatmul.msk.f32.gmra.mxu3 %vm3311_vm5, %v8835_v57  ;;  %6301 = vmatmul.msk.f32.gmra.mxu1 %vm3311_vm5, %v8844_v17  ;;  %v3828_v62 = vadd.f32 %v3822_v19, %v3747_v11  ;;  %v4967_v57 = vld [vmem:[#allocation13 + $0xa98] sm:$0xff]  ;;  %v4120_v44 = vpop.f32.mrf.mxu0 }
 0x55a   : > { %6304 = vmatmul.msk.f32.gmra.mxu2 %vm3311_vm5, %v8876_v34  ;;  %6310 = vmatmul.msk.f32.gmra.mxu0 %vm3311_vm5, %v8880_v24  ;;  %v3989_v32 = vadd.f32 %v3961_v18, %v3908_v45  ;;  %v5048_v17 = vld [vmem:[#allocation13 + $0xb18] sm:$0xff]  ;;  %v5226_v19 = vpop.permute.xlu2 %5225  ;;  %v5212_v18 = vld [vmem:[#allocation13 + $0xc28] sm:$0xff] }
 0x55b   : > { %5029 = vmatpush.msra.mxu3 %v4971_v13  ;;  %5110 = vmatpush.msrb.mxu1 %v5052_v10 }
 0x55c   : > { %5168 = vmatpush.msrb.mxu2 %v5132_v7  ;;  %5249 = vmatpush.msrb.mxu0 %v5213_v9 }
 0x55d   : > { %5030 = vmatpush.msra.mxu3 %v4969_v16  ;;  %5111 = vmatpush.msrb.mxu1 %v5050_v2 }
 0x55e   : > { %5169 = vmatpush.msrb.mxu2 %v5130_v1  ;;  %5250 = vmatpush.msrb.mxu0 %v5211_v23  ;;  %v3900_v3 = vpop.f32.mrf.mxu3 }
 0x55f   : > { %5031 = vmatpush.msra.mxu3 %v4967_v57  ;;  %5112 = vmatpush.msrb.mxu1 %v5048_v17  ;;  %v3907_v42 = vadd.f32 %v3900_v3, %v8870_v26  ;;  %v4039_v31 = vpop.f32.mrf.mxu2  ;;  %v5145_v26 = vpop.permute.xlu0 %5144 }
 0x560   : > { %5170 = vmatpush.msrb.mxu2 %v5128_v43  ;;  %5251 = vmatpush.msrb.mxu0 %v5209_v33  ;;  %v4068_v50 = vadd.f32 %v4039_v31, %v8874_v28  ;;  %v3984_v4 = vpop.f32.mrf.mxu1 }
 0x561   : > { %5032 = vmatpush.msra.mxu3 %v4965_v61  ;;  %5113 = vmatpush.msrb.mxu1 %v5046_v6  ;;  %v3988_v51 = vadd.f32 %v3981_v14, %v3907_v42  ;;  %v4123_v63 = vpop.f32.mrf.mxu0 }
 0x562   : > { %5171 = vmatpush.msrb.mxu2 %v5126_v20  ;;  %5252 = vmatpush.msrb.mxu0 %v5207_v48  ;;  %v4149_v30 = vadd.f32 %v4120_v44, %v4068_v50 }
 0x563   : > { %6306 = vmatmul.msk.f32.vlgmr.msra.gmra.mxu3 %vm3311_vm5, %v8855_v39  ;;  %6312 = vmatmul.msk.f32.vlgmr.msrb.gmra.mxu1 %vm3311_vm5, %v8857_v12  ;;  %v5135_v12 = vld [vmem:[#allocation13 + $0xbc8] sm:$0xff] }
 0x564   : > { %6315 = vmatmul.msk.f32.vlgmr.msrb.gmra.mxu2 %vm3311_vm5, %v8892_v36  ;;  %6321 = vmatmul.msk.f32.vlgmr.msrb.gmra.mxu0 %vm3311_vm5, %v5224_v49 }
 0x565   : > { %6317 = vmatpush.msk.msrb.mxu3 %vm742_vm0, %v5141_v8  ;;  %6323 = vmatpush.msk.msra.mxu1 %vm742_vm0, %v5222_v37 }
 0x566   : > { %v3903_v60 = vpop.f32.mrf.mxu3 }
 0x567   : > { %5188 = vmatpush.msrb.mxu3 %v5139_v53  ;;  %5269 = vmatpush.msra.mxu1 %v5220_v25  ;;  %v3909_v39 = vadd.f32 %v3903_v60, %v3828_v62  ;;  %v4042_v58 = vpop.f32.mrf.mxu2 }
 0x568   : > { %v4070_v27 = vadd.f32 %v4042_v58, %v3989_v32  ;;  %v4143_v5 = vpop.f32.mrf.mxu1 }
 0x569   : > { %5189 = vmatpush.msrb.mxu3 %v5137_v38  ;;  %5270 = vmatpush.msra.mxu1 %v5218_v52  ;;  %v3990_v41 = vadd.f32 %v3984_v4, %v3909_v39  ;;  %v4282_v0 = vpop.f32.mrf.mxu0 }
 0x56a   : > { %v4151_v56 = vadd.f32 %v4123_v63, %v4070_v27 }
 0x56b   : > { %5190 = vmatpush.msrb.mxu3 %v5135_v12  ;;  %5271 = vmatpush.msra.mxu1 %v5216_v21 }
 0x56c   : > { %6307 = vmatmul.msk.f32.gmra.mxu3 %vm3311_vm5, %v8876_v34  ;;  %6313 = vmatmul.msk.f32.gmra.mxu1 %vm3311_vm5, %v8880_v24  ;;  %v5208_v34 = vld [vmem:[#allocation13 + $0xc08] sm:$0xff] }
 0x56d   : > { %6316 = vmatmul.msk.f32.gmra.mxu2 %vm3311_vm5, %v5145_v26  ;;  %6322 = vmatmul.msk.f32.gmra.mxu0 %vm3311_vm5, %v5226_v19 }
 0x56e   : > { %5191 = vmatpush.msrb.mxu3 %v5133_v59  ;;  %5272 = vmatpush.msra.mxu1 %v5214_v40  ;;  %v4062_v28 = vpop.f32.mrf.mxu3 }
 0x56f   : > { %v4069_v35 = vadd.f32 %v4062_v28, %v3988_v51  ;;  %v4201_v54 = vpop.f32.mrf.mxu2 }
 0x570   : > { %5192 = vmatpush.msrb.mxu3 %v5131_v47  ;;  %5273 = vmatpush.msra.mxu1 %v5212_v18  ;;  %v4230_v29 = vadd.f32 %v4201_v54, %v4149_v30 }
 0x571   : > { %v4150_v11 = vadd.f32 %v4143_v5, %v4069_v35 }
 0x572   : > { %5193 = vmatpush.msrb.mxu3 %v5129_v55  ;;  %5274 = vmatpush.msra.mxu1 %v5210_v46  ;;  %v4311_v15 = vadd.f32 %v4282_v0, %v4230_v29  ;;  %v4146_v13 = vpop.f32.mrf.mxu1 }
 0x573   : > { %v4285_v24 = vpop.f32.mrf.mxu0 }
 0x574   : > { %5194 = vmatpush.msrb.mxu3 %v5127_v22  ;;  %5275 = vmatpush.msra.mxu1 %v5208_v34 }
 0x575   : > { %6318 = vmatmul.msk.f32.vlgmr.msrb.gmra.mxu3 %vm3311_vm5, %v8892_v36  ;;  %6324 = vmatmul.msk.f32.vlgmr.msra.gmra.mxu1 %vm3311_vm5, %v5224_v49 }
 0x578   : > { %v4065_v10 = vpop.f32.mrf.mxu3 }
 0x579   : > { %v4071_v45 = vadd.f32 %v4065_v10, %v3990_v41  ;;  %v4204_v14 = vpop.f32.mrf.mxu2 }
 0x57a   : > { %v4232_v7 = vadd.f32 %v4204_v14, %v4151_v56 }
 0x57b   : > { %v4152_v9 = vadd.f32 %v4146_v13, %v4071_v45 }
 0x57c   : > { %v4313_v62 = vadd.f32 %v4285_v24, %v4232_v7  ;;  %v4305_v16 = vpop.f32.mrf.mxu1 }
 0x57d   : > { %6319 = vmatmul.msk.f32.gmra.mxu3 %vm3311_vm5, %v5145_v26  ;;  %6325 = vmatmul.msk.f32.gmra.mxu1 %vm3311_vm5, %v5226_v19  ;;  %v4444_v23 = vpop.f32.mrf.mxu0 }
 0x582   : > { %v4224_v2 = vpop.f32.mrf.mxu3 }
 0x583   : > { %v4231_v32 = vadd.f32 %v4224_v2, %v4150_v11  ;;  %v4363_v1 = vpop.f32.mrf.mxu2 }
 0x584   : > { %v4392_v57 = vadd.f32 %v4363_v1, %v4311_v15 }
 0x585   : > { %v4312_v17 = vadd.f32 %v4305_v16, %v4231_v32 }
 0x586   : > { %v4473_v44 = vadd.f32 %v4444_v23, %v4392_v57  ;;  %v4308_v43 = vpop.f32.mrf.mxu1 }
 0x587   : > { %v4447_v3 = vpop.f32.mrf.mxu0 }
 0x58c   : > { %v4227_v33 = vpop.f32.mrf.mxu3 }
 0x58d   : > { %v4233_v61 = vadd.f32 %v4227_v33, %v4152_v9  ;;  %v4366_v6 = vpop.f32.mrf.mxu2 }
 0x58e   : > { %v4394_v5 = vadd.f32 %v4366_v6, %v4313_v62 }
 0x58f   : > { %v4314_v20 = vadd.f32 %v4308_v43, %v4233_v61 }
 0x590   : > { %v4467_v48 = vpop.f32.mrf.mxu1  ;;  %v4475_v55 = vadd.f32 %v4447_v3, %v4394_v5  ;;  %v5363_v5 = vld [vmem:[#allocation18 + $0x50] sm:$0xff] }
 0x591   : > { %v4606_v36 = vpop.f32.mrf.mxu0 }
 0x596   : > { %v4386_v42 = vpop.f32.mrf.mxu3 }
 0x597   : > { %v4393_v31 = vadd.f32 %v4386_v42, %v4312_v17  ;;  %v4525_v50 = vpop.f32.mrf.mxu2 }
 0x598   : > { %v4554_v28 = vadd.f32 %v4525_v50, %v4473_v44 }
 0x599   : > { %v4474_v51 = vadd.f32 %v4467_v48, %v4393_v31  ;;  %v8914_v48 = vld [vmem:[#allocation15] sm:$0x3] }
 0x59a   : > { %v4470_v8 = vpop.f32.mrf.mxu1  ;;  %v4635_v35 = vadd.f32 %v4606_v36, %v4554_v28 }
 0x59b   : > { %v4609_v30 = vpop.f32.mrf.mxu0 }
 0x5a0   : > { %v4389_v37 = vpop.f32.mrf.mxu3 }
 0x5a1   : > { %v4528_v4 = vpop.f32.mrf.mxu2  ;;  %v4395_v45 = vadd.f32 %v4389_v37, %v4314_v20 }
 0x5a2   : > { %v4556_v46 = vadd.f32 %v4528_v4, %v4475_v55  ;;  %v5289_v4 = vperm.slane %v8914_v48, 0  ;;  %v5361_v55 = vld [vmem:[#allocation18 + $0x40] sm:$0xff] }
 0x5a3   : > { %v4476_v2 = vadd.f32 %v4470_v8, %v4395_v45 }
 0x5a4   : > { %v4629_v49 = vpop.f32.mrf.mxu1  ;;  %v4637_v22 = vadd.f32 %v4609_v30, %v4556_v46 }
 0x5a5   : > { %v4768_v38 = vpop.f32.mrf.mxu0 }
 0x5aa   : > { %v4548_v53 = vpop.f32.mrf.mxu3 }
 0x5ab   : > { %v4687_v25 = vpop.f32.mrf.mxu2  ;;  %v4555_v7 = vadd.f32 %v4548_v53, %v4474_v51  ;;  %v5367_v53 = vld [vmem:[#allocation18 + $0x70] sm:$0xff] }
 0x5ac   : > { %v4716_v0 = vadd.f32 %v4687_v25, %v4635_v35 }
 0x5ad   : > { %v4636_v17 = vadd.f32 %v4629_v49, %v4555_v7  ;;  %v5368_v49 = vld [vmem:[#allocation18 + $0x78] sm:$0xff]  ;;  %v5370_v7 = vld [vmem:[#allocation18 + $0x88] sm:$0xff] }
 0x5ae   : > { %v4632_v52 = vpop.f32.mrf.mxu1  ;;  %v4797_v13 = vadd.f32 %v4768_v38, %v4716_v0  ;;  %5377 = vmatpush.msra.mxu0 %v5368_v49  ;;  %v5360_v0 = vld [vmem:[#allocation18 + $0x38] sm:$0xff]  ;;  %v5422_v49 = vld [vmem:[#allocation19 + $0x10] sm:$0xff] }
 0x5af   : > { %v4771_v39 = vpop.f32.mrf.mxu0 }
 0x5b0   : > { %5378 = vmatpush.msra.mxu0 %v5367_v53  ;;  %v5434_v53 = vld [vmem:[#allocation19 + $0x60] sm:$0xff] }
 0x5b4   : > { %v4551_v63 = vpop.f32.mrf.mxu3 }
 0x5b5   : > { %v4690_v60 = vpop.f32.mrf.mxu2  ;;  %v4557_v57 = vadd.f32 %v4551_v63, %v4476_v2  ;;  %v5366_v63 = vld [vmem:[#allocation18 + $0x68] sm:$0xff] }
 0x5b6   : > { %v4718_v15 = vadd.f32 %v4690_v60, %v4637_v22  ;;  %5379 = vmatpush.msra.mxu0 %v5366_v63 }
 0x5b7   : > { %v4638_v6 = vadd.f32 %v4632_v52, %v4557_v57  ;;  %v5355_v57 = vld [vmem:[#allocation18 + $0x10] sm:$0xff] }
 0x5b8   : > { %v4791_v58 = vpop.f32.mrf.mxu1  ;;  %v4799_v14 = vadd.f32 %v4771_v39, %v4718_v15 }
 0x5b9   : > { %v4930_v27 = vpop.f32.mrf.mxu0 }
 0x5be   : > { %v4710_v12 = vpop.f32.mrf.mxu3 }
 0x5bf   : > { %v4849_v21 = vpop.f32.mrf.mxu2  ;;  %v4717_v43 = vadd.f32 %v4710_v12, %v4636_v17  ;;  %v5354_v17 = vld [vmem:[#allocation18 + $0x8] sm:$0xff] }
 0x5c0   : > { %v4878_v10 = vadd.f32 %v4849_v21, %v4797_v13  ;;  %v5365_v21 = vld [vmem:[#allocation18 + $0x60] sm:$0xff]  ;;  %v5359_v13 = vld [vmem:[#allocation18 + $0x30] sm:$0xff] }
 0x5c1   : > { %v4798_v31 = vadd.f32 %v4791_v58, %v4717_v43  ;;  %5380 = vmatpush.msra.mxu0 %v5365_v21  ;;  %v5428_v43 = vld [vmem:[#allocation19 + $0x40] sm:$0xff]  ;;  %v5572_v21 = vld [vmem:[#allocation19 + $0x188] sm:$0xff] }
 0x5c2   : > { %v4794_v41 = vpop.f32.mrf.mxu1  ;;  %v4959_v62 = vadd.f32 %v4930_v27, %v4878_v10  ;;  %v5371_v10 = vld [vmem:[#allocation18 + $0x90] sm:$0xff] }
 0x5c3   : > { %v4933_v59 = vpop.f32.mrf.mxu0 }
 0x5c8   : > { %v4713_v56 = vpop.f32.mrf.mxu3 }
 0x5c9   : > { %v4852_v19 = vpop.f32.mrf.mxu2  ;;  %v4719_v42 = vadd.f32 %v4713_v56, %v4638_v6  ;;  %v5364_v56 = vld [vmem:[#allocation18 + $0x58] sm:$0xff]  ;;  %v5440_v6 = vld [vmem:[#allocation19 + $0x90] sm:$0xff] }
 0x5ca   : > { %v4880_v9 = vadd.f32 %v4852_v19, %v4799_v14  ;;  %5381 = vmatpush.msra.mxu0 %v5364_v56  ;;  %v5536_v56 = vld [vmem:[#allocation19 + $0x138] sm:$0xff] }
 0x5cb   : > { %v4800_v38 = vadd.f32 %v4794_v41, %v4719_v42  ;;  %v5438_v42 = vld [vmem:[#allocation19 + $0x80] sm:$0xff] }
 0x5cc   : > { %v4953_v40 = vpop.f32.mrf.mxu1  ;;  %v4961_v44 = vadd.f32 %v4933_v59, %v4880_v9  ;;  %5382 = vmatpush.msra.mxu0 %v5363_v5  ;;  %v5570_v5 = vld [vmem:[#allocation19 + $0x178] sm:$0xff] }
 0x5cd   : > { %v5092_v18 = vpop.f32.mrf.mxu0 }
 0x5d2   : > { %v4872_v26 = vpop.f32.mrf.mxu3 }
 0x5d3   : > { %v5011_v47 = vpop.f32.mrf.mxu2  ;;  %v4879_v8 = vadd.f32 %v4872_v26, %v4798_v31  ;;  %v5500_v31 = vld [vmem:[#allocation19 + $0xe8] sm:$0xff] }
 0x5d4   : > { %v5040_v32 = vadd.f32 %v5011_v47, %v4959_v62 }
 0x5d5   : > { %v4960_v39 = vadd.f32 %v4953_v40, %v4879_v8  ;;  %v5424_v8 = vld [vmem:[#allocation19 + $0x20] sm:$0xff] }
 0x5d6   : > { %v4956_v54 = vpop.f32.mrf.mxu1  ;;  %v5121_v61 = vadd.f32 %v5092_v18, %v5040_v32  ;;  %v5362_v18 = vld [vmem:[#allocation18 + $0x48] sm:$0xff] }
 0x5d7   : > { %v5095_v11 = vpop.f32.mrf.mxu0  ;;  %5383 = vmatpush.msra.mxu0 %v5362_v18  ;;  %v5534_v18 = vld [vmem:[#allocation19 + $0x128] sm:$0xff] }
 0x5d9   : > { %5384 = vmatpush.msra.mxu0 %v5361_v55  ;;  %v5533_v55 = vld [vmem:[#allocation19 + $0x120] sm:$0xff] }
 0x5db   : > { %5385 = vmatpush.msra.mxu0 %v5360_v0  ;;  %v5532_v0 = vld [vmem:[#allocation19 + $0x118] sm:$0xff] }
 0x5dc   : > { %v4875_v29 = vpop.f32.mrf.mxu3 }
 0x5dd   : > { %v5014_v34 = vpop.f32.mrf.mxu2  ;;  %v4881_v60 = vadd.f32 %v4875_v29, %v4800_v38  ;;  %v5372_v29 = vld [vmem:[#allocation18 + $0x98] sm:$0xff]  ;;  %5386 = vmatpush.msra.mxu0 %v5359_v13  ;;  %v5421_v38 = vld [vmem:[#allocation19 + $0x8] sm:$0xff] }
 0x5de   : > { %v5042_v33 = vadd.f32 %v5014_v34, %v4961_v44  ;;  %v5429_v44 = vld [vmem:[#allocation19 + $0x48] sm:$0xff] }
 0x5df   : > { %v4962_v26 = vadd.f32 %v4956_v54, %v4881_v60  ;;  %v5301_v54 = vld [vmem:[#allocation16] sm:$0x1f]  ;;  %v5564_v13 = vld [vmem:[#allocation19 + $0x148] sm:$0xff] }
 0x5e0   : > { %v5115_v24 = vpop.f32.mrf.mxu1  ;;  %v5123_v36 = vadd.f32 %v5095_v11, %v5042_v33  ;;  %v5290_v11 = vperm.slane %v8914_v48, 1  ;;  %v5441_v33 = vld [vmem:[#allocation19 + $0x98] sm:$0xff]  ;;  %v5439_v48 = vld [vmem:[#allocation19 + $0x88] sm:$0xff] }
 0x5e1   : > { %v5254_v23 = vpop.f32.mrf.mxu0  ;;  %5452 = vmatpush.msrb.mxu1 %v5441_v33  ;;  %v5498_v60 = vld [vmem:[#allocation19 + $0xd8] sm:$0xff]  ;;  %v5609_v33 = vld [vmem:[%s9168_s2 + $0x48] sm:$0xff] }
 0x5e3   : > { %5453 = vmatpush.msrb.mxu1 %v5440_v6  ;;  %v5607_v6 = vld [vmem:[%s9168_s2 + $0x38] sm:$0xff] }
 0x5e5   : > { %5454 = vmatpush.msrb.mxu1 %v5439_v48  ;;  %v5605_v48 = vld [vmem:[%s9168_s2 + $0x28] sm:$0xff] }
 0x5e6   : > { %v5034_v16 = vpop.f32.mrf.mxu3 }
 0x5e7   : > { %v5173_v1 = vpop.f32.mrf.mxu2  ;;  %v5041_v27 = vadd.f32 %v5034_v16, %v4960_v39  ;;  %v5357_v16 = vld [vmem:[#allocation18 + $0x20] sm:$0xff]  ;;  %5455 = vmatpush.msrb.mxu1 %v5438_v42  ;;  %v5433_v39 = vld [vmem:[#allocation19 + $0x58] sm:$0xff] }
 0x5e8   : > { %v5202_v3 = vadd.f32 %v5173_v1, %v5121_v61  ;;  %v5356_v1 = vld [vmem:[#allocation18 + $0x18] sm:$0xff]  ;;  %v5353_v61 = vld [vmem:[#allocation18] sm:$0xff] }
 0x5e9   : > { %v5118_v20 = vpop.f32.mrf.mxu1  ;;  %v5122_v47 = vadd.f32 %v5115_v24, %v5041_v27  ;;  %v5358_v24 = vld [vmem:[#allocation18 + $0x28] sm:$0xff]  ;;  %v5603_v42 = vld [vmem:[%s9168_s2 + $0x18] sm:$0xff] }
 0x5ea   : > { %v5283_v37 = vadd.f32 %v5254_v23, %v5202_v3  ;;  %v5257_v25 = vpop.f32.mrf.mxu0  ;;  %5387 = vmatpush.msra.mxu0 %v5358_v24  ;;  %v5369_v23 = vld [vmem:[#allocation18 + $0x80] sm:$0xff]  ;;  %v5427_v3 = vld [vmem:[#allocation19 + $0x38] sm:$0xff]  ;;  %v5496_v27 = vld [vmem:[#allocation19 + $0xc8] sm:$0xff] }
 0x5eb   : > { %v5614_v24 = vld [vmem:[%s9168_s2 + $0x70] sm:$0xff] }
 0x5ec   : > { %v5293_v12 = vadd.f32 %v5289_v4, %v5283_v37  ;;  %5388 = vmatpush.msra.mxu0 %v5357_v16  ;;  %v5436_v37 = vld [vmem:[#allocation19 + $0x70] sm:$0xff] }
 0x5ee   : > { %5389 = vmatpush.msra.mxu0 %v5356_v1 }
 0x5ef   : > { %v5037_v50 = vpop.f32.mrf.mxu3 }
 0x5f0   : > { %v5176_v51 = vpop.f32.mrf.mxu2  ;;  %v5043_v41 = vadd.f32 %v5037_v50, %v4962_v26  ;;  %5390 = vmatpush.msra.mxu0 %v5355_v57  ;;  %v5499_v50 = vld [vmem:[#allocation19 + $0xe0] sm:$0xff]  ;;  %v5535_v26 = vld [vmem:[#allocation19 + $0x130] sm:$0xff] }
 0x5f1   : > { %v5204_v30 = vadd.f32 %v5176_v51, %v5123_v36  ;;  %v5425_v36 = vld [vmem:[#allocation19 + $0x28] sm:$0xff]  ;;  %v5437_v51 = vld [vmem:[#allocation19 + $0x78] sm:$0xff] }
 0x5f2   : > { %v5277_v19 = vpop.f32.mrf.mxu1  ;;  %v5124_v35 = vadd.f32 %v5118_v20, %v5043_v41  ;;  %5391 = vmatpush.msra.mxu0 %v5354_v17  ;;  %v5426_v20 = vld [vmem:[#allocation19 + $0x30] sm:$0xff]  ;;  %5456 = vmatpush.msrb.mxu1 %v5437_v51 }
 0x5f3   : > { %v5285_v52 = vadd.f32 %v5257_v25, %v5204_v30  ;;  %v5435_v30 = vld [vmem:[#allocation19 + $0x68] sm:$0xff]  ;;  %v5569_v41 = vld [vmem:[#allocation19 + $0x170] sm:$0xff] }
 0x5f4   : > { %5392 = vmatpush.msra.mxu0 %v5353_v61  ;;  %5457 = vmatpush.msrb.mxu1 %v5436_v37  ;;  %v5608_v61 = vld [vmem:[%s9168_s2 + $0x40] sm:$0xff]  ;;  %v5651_v51 = vld [vmem:[%s9169_s30 + $0x50] sm:$0xf] }
 0x5f5   : > { %v5295_v58 = vadd.f32 %v5289_v4, %v5285_v52  ;;  %v5423_v4 = vld [vmem:[#allocation19 + $0x18] sm:$0xff]  ;;  %v5420_v52 = vld [vmem:[#allocation19] sm:$0xff] }
 0x5f6   : > { %5458 = vmatpush.msrb.mxu1 %v5435_v30  ;;  %6337 = vmatpush.msk.msrb.mxu0 %vm742_vm0, %v5651_v51  ;;  %v5649_v37 = vld [vmem:[%s9169_s30 + $0x40] sm:$0xff]  ;;  %v5647_v30 = vld [vmem:[%s9169_s30 + $0x30] sm:$0xff] }
 0x5f7   : > { %6541 = vtanh.f32 %v5295_v58  ;;  %v5432_v58 = vld [vmem:[#allocation19 + $0x50] sm:$0xff] }
 0x5f8   : > { %v5196_v59 = vpop.f32.mrf.mxu3  ;;  %6543 = vtanh.f32 %v5293_v12  ;;  %5459 = vmatpush.msrb.mxu1 %v5434_v53  ;;  %v5497_v12 = vld [vmem:[#allocation19 + $0xd0] sm:$0xff] }
 0x5f9   : > { %v5203_v28 = vadd.f32 %v5196_v59, %v5122_v47  ;;  %v5495_v59 = vld [vmem:[#allocation19 + $0xc0] sm:$0xff]  ;;  %v5494_v47 = vld [vmem:[#allocation19 + $0xb8] sm:$0xff]  ;;  %v5646_v53 = vld [vmem:[%s9169_s30 + $0x28] sm:$0xff] }
 0x5fa   : > { %v5280_v45 = vpop.f32.mrf.mxu1  ;;  %5460 = vmatpush.msrb.mxu1 %v5433_v39 }
 0x5fb   : > { %v5284_v34 = vadd.f32 %v5277_v19, %v5203_v28  ;;  %v5571_v19 = vld [vmem:[#allocation19 + $0x180] sm:$0xff]  ;;  %v5568_v28 = vld [vmem:[#allocation19 + $0x168] sm:$0xff] }
 0x5fc   : > { %5461 = vmatpush.msrb.mxu1 %v5432_v58  ;;  %v5597_v58 = vld [vmem:[#allocation21] sm:$0x1] }
 0x5fd   : > { %v6542_v40 = vpop.eup %6541  ;;  %v5294_v9 = vadd.f32 %v5290_v11, %v5284_v34  ;;  %v5565_v34 = vld [vmem:[#allocation19 + $0x150] sm:$0xff] }
 0x5fe   : > { %6326 = vmatpush.msk.msra.mxu2 %vm5306_vm6, %v6542_v40  ;;  %v6544_v46 = vpop.eup %6543  ;;  %5546 = vmatpush.msra.mxu1 %v5536_v56  ;;  %v5493_v40 = vld [vmem:[#allocation19 + $0xb0] sm:$0xff] }
 0x600   : > { %v5199_v22 = vpop.f32.mrf.mxu3  ;;  %5328 = vmatpush.msra.mxu2 %v6544_v46  ;;  %5547 = vmatpush.msra.mxu1 %v5535_v26  ;;  %v5567_v46 = vld [vmem:[#allocation19 + $0x160] sm:$0xff]  ;;  %v5643_v26 = vld [vmem:[%s9169_s30 + $0x10] sm:$0xff] }
 0x601   : > { %v5205_v15 = vadd.f32 %v5199_v22, %v5124_v35  ;;  %6327 = vmatmul.msk.f32.vlgmr.msra.gmra.mxu2 %vm5302_vm7, %v5301_v54  ;;  %v5492_v35 = vld [vmem:[#allocation19 + $0xa8] sm:$0xff]  ;;  %v5531_v22 = vld [vmem:[#allocation19 + $0x110] sm:$0xff] }
 0x602   : > { %5409 = vmatpush.msrb.mxu2 %v5372_v29  ;;  %5548 = vmatpush.msra.mxu1 %v5534_v18  ;;  %v5491_v29 = vld [vmem:[#allocation19 + $0xa0] sm:$0xff] }
 0x603   : > { %v5286_v14 = vadd.f32 %v5280_v45, %v5205_v15  ;;  %v5529_v15 = vld [vmem:[#allocation19 + $0x100] sm:$0xff]  ;;  %v5528_v45 = vld [vmem:[#allocation19 + $0xf8] sm:$0xff] }
 0x604   : > { %5410 = vmatpush.msrb.mxu2 %v5371_v10  ;;  %5549 = vmatpush.msra.mxu1 %v5533_v55  ;;  %v5563_v10 = vld [vmem:[#allocation19 + $0x140] sm:$0xff]  ;;  %v5652_v55 = vld [vmem:[#allocation24] sm:$0x1] }
 0x605   : > { %v5296_v62 = vadd.f32 %v5290_v11, %v5286_v14  ;;  %v5530_v11 = vld [vmem:[#allocation19 + $0x108] sm:$0xff]  ;;  %v5527_v14 = vld [vmem:[#allocation19 + $0xf0] sm:$0xff] }
 0x606   : > { %5411 = vmatpush.msrb.mxu2 %v5370_v7  ;;  %5550 = vmatpush.msra.mxu1 %v5532_v0  ;;  %v5613_v7 = vld [vmem:[%s9168_s2 + $0x68] sm:$0xff] }
 0x607   : > { %6545 = vtanh.f32 %v5296_v62  ;;  %v5611_v62 = vld [vmem:[%s9168_s2 + $0x58] sm:$0xff] }
 0x608   : > { %6547 = vtanh.f32 %v5294_v9  ;;  %5412 = vmatpush.msrb.mxu2 %v5369_v23  ;;  %5551 = vmatpush.msra.mxu1 %v5531_v22  ;;  %v5612_v9 = vld [vmem:[%s9168_s2 + $0x60] sm:$0xff] }
 0x60a   : > { %5510 = vmatpush.msra.mxu2 %v5500_v31  ;;  %5552 = vmatpush.msra.mxu1 %v5530_v11  ;;  %v5602_v31 = vld [vmem:[%s9168_s2 + $0x10] sm:$0xff] }
 0x60c   : > { %5511 = vmatpush.msra.mxu2 %v5499_v50  ;;  %5553 = vmatpush.msra.mxu1 %v5529_v15  ;;  %v5601_v50 = vld [vmem:[%s9168_s2 + $0x8] sm:$0xff] }
 0x60d   : > { %v6546_v2 = vpop.eup %6545 }
 0x60e   : > { %6328 = vmatpush.msk.msra.mxu3 %vm5306_vm6, %v6546_v2  ;;  %v6548_v32 = vpop.eup %6547  ;;  %5512 = vmatpush.msra.mxu2 %v5498_v60 }
 0x60f   : > { %5554 = vmatpush.msra.mxu1 %v5528_v45 }
 0x610   : > { %5348 = vmatpush.msra.mxu3 %v6548_v32  ;;  %5513 = vmatpush.msra.mxu2 %v5497_v12 }
 0x611   : > { %6329 = vmatmul.msk.f32.vlgmr.msra.gmra.mxu3 %vm5302_vm7, %v5301_v54  ;;  %v5566_v54 = vld [vmem:[#allocation19 + $0x158] sm:$0xff]  ;;  %5555 = vmatpush.msra.mxu1 %v5527_v14 }
 0x612   : > { %5475 = vmatpush.msrb.mxu3 %v5429_v44  ;;  %5514 = vmatpush.msra.mxu2 %v5496_v27 }
 0x614   : > { %5476 = vmatpush.msrb.mxu3 %v5428_v43  ;;  %5515 = vmatpush.msra.mxu2 %v5495_v59  ;;  %v5610_v43 = vld [vmem:[%s9168_s2 + $0x50] sm:$0xff]  ;;  %v5644_v59 = vld [vmem:[%s9169_s30 + $0x18] sm:$0xff] }
 0x616   : > { %5477 = vmatpush.msrb.mxu3 %v5427_v3  ;;  %5516 = vmatpush.msra.mxu2 %v5494_v47  ;;  %v5606_v3 = vld [vmem:[%s9168_s2 + $0x30] sm:$0xff]  ;;  %v5615_v47 = vld [vmem:[#allocation22] sm:$0x1] }
 0x618   : > { %5478 = vmatpush.msrb.mxu3 %v5426_v20  ;;  %5517 = vmatpush.msra.mxu2 %v5493_v40  ;;  %v5604_v20 = vld [vmem:[%s9168_s2 + $0x20] sm:$0xff] }
 0x61a   : > { %5479 = vmatpush.msrb.mxu3 %v5425_v36  ;;  %5518 = vmatpush.msra.mxu2 %v5492_v35  ;;  %v5600_v36 = vld [vmem:[%s9168_s2] sm:$0xff] }
 0x61c   : > { %5480 = vmatpush.msrb.mxu3 %v5424_v8  ;;  %5519 = vmatpush.msra.mxu2 %v5491_v29  ;;  %v5650_v8 = vld [vmem:[%s9169_s30 + $0x48] sm:$0xff] }
 0x61d   : > { %5665 = vmatpush.msrb.mxu0 %v5650_v8 }
 0x61e   : > { %5481 = vmatpush.msrb.mxu3 %v5423_v4  ;;  %v5648_v4 = vld [vmem:[%s9169_s30 + $0x38] sm:$0xff] }
 0x61f   : > { %5666 = vmatpush.msrb.mxu0 %v5649_v37 }
 0x620   : > { %5482 = vmatpush.msrb.mxu3 %v5422_v49 }
 0x621   : > { %5667 = vmatpush.msrb.mxu0 %v5648_v4 }
 0x622   : > { %5483 = vmatpush.msrb.mxu3 %v5421_v38 }
 0x623   : > { %5668 = vmatpush.msrb.mxu0 %v5647_v30 }
 0x624   : > { %5484 = vmatpush.msrb.mxu3 %v5420_v52 }
 0x625   : > { %5669 = vmatpush.msrb.mxu0 %v5646_v53 }
 0x626   : > { %5582 = vmatpush.msra.mxu3 %v5572_v21 }
 0x628   : > { %5583 = vmatpush.msra.mxu3 %v5571_v19  ;;  %v5645_v19 = vld [vmem:[%s9169_s30 + $0x20] sm:$0xff] }
 0x629   : > { %5670 = vmatpush.msrb.mxu0 %v5645_v19 }
 0x62a   : > { %5584 = vmatpush.msra.mxu3 %v5570_v5  ;;  %v5642_v5 = vld [vmem:[%s9169_s30 + $0x8] sm:$0xff] }
 0x62b   : > { %5671 = vmatpush.msrb.mxu0 %v5644_v59 }
 0x62c   : > { %5585 = vmatpush.msra.mxu3 %v5569_v41  ;;  %v5641_v41 = vld [vmem:[%s9169_s30] sm:$0xff] }
 0x62d   : > { %5672 = vmatpush.msrb.mxu0 %v5643_v26 }
 0x62e   : > { %5586 = vmatpush.msra.mxu3 %v5568_v28 }
 0x62f   : > { %5673 = vmatpush.msrb.mxu0 %v5642_v5 }
 0x630   : > { %5587 = vmatpush.msra.mxu3 %v5567_v46 }
 0x631   : > { %5674 = vmatpush.msrb.mxu0 %v5641_v41 }
 0x632   : > { %5588 = vmatpush.msra.mxu3 %v5566_v54 }
 0x634   : > { %5589 = vmatpush.msra.mxu3 %v5565_v34 }
 0x636   : > { %5590 = vmatpush.msra.mxu3 %v5564_v13 }
 0x638   : > { %5591 = vmatpush.msra.mxu3 %v5563_v10 }
 0x684   : > { %v5330_v25 = vpop.f32.mrf.mxu2 }
 0x685   : > { %5393 = vmatmul.f32.vlgmr.msra.gmra.mxu0 %v5330_v25 }
 0x694   : > { %v5350_v63 = vpop.f32.mrf.mxu3 }
 0x695   : > { %6330 = vmatmul.msk.f32.vlgmr.msrb.gmra.mxu2 %vm5373_vm8, %v5350_v63 }
 0x696   : > { %5621 = vmatpush.msrb.mxu2 %v5614_v24 }
 0x698   : > { %5622 = vmatpush.msrb.mxu2 %v5613_v7 }
 0x69a   : > { %5623 = vmatpush.msrb.mxu2 %v5612_v9 }
 0x69c   : > { %5624 = vmatpush.msrb.mxu2 %v5611_v62 }
 0x69e   : > { %5625 = vmatpush.msrb.mxu2 %v5610_v43 }
 0x6a0   : > { %5626 = vmatpush.msrb.mxu2 %v5609_v33 }
 0x6a2   : > { %5627 = vmatpush.msrb.mxu2 %v5608_v61 }
 0x6a4   : > { %5628 = vmatpush.msrb.mxu2 %v5607_v6 }
 0x6a6   : > { %5629 = vmatpush.msrb.mxu2 %v5606_v3 }
 0x6a8   : > { %5630 = vmatpush.msrb.mxu2 %v5605_v48 }
 0x6aa   : > { %5631 = vmatpush.msrb.mxu2 %v5604_v20 }
 0x6ac   : > { %5632 = vmatpush.msrb.mxu2 %v5603_v42 }
 0x6ae   : > { %5633 = vmatpush.msrb.mxu2 %v5602_v31 }
 0x6b0   : > { %5634 = vmatpush.msrb.mxu2 %v5601_v50 }
 0x6b2   : > { %5635 = vmatpush.msrb.mxu2 %v5600_v36 }
 0x702   : > { %v5394_v16 = vpop.f32.mrf.mxu0 }
 0x718   : > { %v5414_v2 = vpop.f32.mrf.mxu2 }
 0x719   : > { %v5415_v32 = vadd.f32 %v5414_v2, %v5394_v16 }
 0x71b   : > { %5418 = vst.msk [vmem:[#allocation3] sm:$0x1f] %vm5417_vm9, %v5415_v32 }
 0x722   : > { %v5419_v1 = vld [vmem:[#allocation3] sm:$0x1]  ;;  %v5430_v23 = vld [vmem:[#allocation3 + $0x1] sm:$0x1]  ;;  %v5489_v57 = vld [vmem:[#allocation3 + $0x2] sm:$0x1] }
 0x723   : > { %6332 = vmatmul.msk.f32.vlgmr.msrb.gmra.mxu3 %vm5442_vm10, %v5419_v1  ;;  %6331 = vmatmul.msk.f32.vlgmr.msrb.gmra.mxu1 %vm5442_vm10, %v5430_v23  ;;  %v5561_v17 = vld [vmem:[#allocation3 + $0x4] sm:$0x1]  ;;  %v5525_v44 = vld [vmem:[#allocation3 + $0x3] sm:$0x1] }
 0x724   : > { %6333 = vmatmul.msk.f32.vlgmr.msra.gmra.mxu2 %vm5442_vm10, %v5489_v57 }
 0x72b   : > { %6335 = vmatmul.msk.f32.vlgmr.msra.gmra.mxu3 %vm5442_vm10, %v5561_v17  ;;  %6334 = vmatmul.msk.f32.vlgmr.msra.gmra.mxu1 %vm5442_vm10, %v5525_v44 }
 0x7a0   : > { %v5463_v49 = vpop.f32.mrf.mxu1 }
 0x7a6   : > { %v5486_v25 = vpop.f32.mrf.mxu3 }
 0x7a7   : > { %v5487_v38 = vadd.f32 %v5486_v25, %v5463_v49  ;;  %v5521_v52 = vpop.f32.mrf.mxu2 }
 0x7a8   : > { %v5557_v60 = vpop.f32.mrf.mxu1 }
 0x7a9   : > { %v5524_v63 = vadd.f32 %v5521_v52, %v5487_v38 }
 0x7ab   : > { %v5560_v39 = vadd.f32 %v5557_v60, %v5524_v63 }
 0x7ae   : > { %v5593_v12 = vpop.f32.mrf.mxu3 }
 0x7af   : > { %v5596_v21 = vadd.f32 %v5593_v12, %v5560_v39 }
 0x7b1   : > { %v5598_v27 = vadd.f32 %v5597_v58, %v5596_v21 }
 0x7b3   : > { %6549 = vtanh.f32 %v5598_v27 }
 0x7b9   : > { %v6550_v56 = vpop.eup %6549 }
 0x7ba   : > { %6336 = vmatmul.msk.f32.vlgmr.msrb.gmra.mxu2 %vm5616_vm11, %v6550_v56 }
 0x83d   : > { %v5637_v18 = vpop.f32.mrf.mxu2 }
 0x83e   : > { %v5638_v40 = vadd.f32 %v5637_v18, %v5615_v47 }
 0x840   : > { %6551 = vtanh.f32 %v5638_v40 }
 0x846   : > { %v6552_v28 = vpop.eup %6551 }
 0x847   : > { %6338 = vmatmul.msk.f32.vlgmr.msrb.gmra.mxu0 %vm3266_vm3, %v6552_v28 }
 0x8c4   : > { %v5676_v46 = vpop.f32.mrf.mxu0 }
 0x8c5   : > { %v5677_v35 = vadd.f32 %v5676_v46, %v5652_v55 }
 0x8c7   : > { %v5680_v0 = vsel %vm5679_vm12, %v5677_v35, -inf }
 0x8c8   : > { %5681 = vmax.xlane.f32.xlu0 %v5680_v0 }
 0x93b   : > { %v5682_v29 = vpop.xlane.xlu0 %5681 }
 0x93c   : > { %v5683_v22 = vsub.f32 %v5677_v35, %v5682_v29 }
 0x93e   : > { %v5684_v54 = vmul.f32 1.442695, %v5683_v22 }
 0x940   : > { %6553 = vpow2.f32 %v5684_v54 }
 0x946   : > { %v6554_v34 = vpop.eup %6553 }
 0x947   : > { %v5686_v11 = vsel %vm5679_vm12, %v6554_v34, 0.0 }
 0x948   : > { %5687 = vadd.xlane.f32.xlu1 %v5686_v11 }
 0x9bb   : > { %v5688_v15 = vpop.xlane.xlu1 %5687 }
 0x9bc   : > { %6555 = vlog2.f32 %v5688_v15 }
 0x9c2   : > { %v6556_v13 = vpop.eup %6555 }
 0x9c3   : > { %v5690_v10 = vmul.f32 0.6931472, %v6556_v13 }
 0x9c5   : > { %v5691_v45 = vsub.f32 %v5683_v22, %v5690_v10 }
 0x9c7   : > { %5692 = vst.msk [vmem:[%s699_s22] sm:$0x1] %vm5679_vm12, %v5691_v45 }
 0x9c8   : > { %6978 = shalt.err (!%p6975_p9)
}
 0x9c9   : > { %6396 = dma.vmem_to_hbm [thread:$0]  (%p7286_p4), %s5705_s16, 16, %s5707_s4, %s5694_s0  }
 0x9ca PF: > { %s9172_s24 = sld [smem:[#allocation34_spill]]  ;;  %p9173_p10 = scmp.ge.s32.totalorder %s7041_s21, 2 }
 0x9cc   : > { %p6440_p13 = pnand %p9173_p10, %p7290_p6 }
 0x9ce   : > { %p6441_p11 = pneg %p6440_p13 }
 0x9d0   : > { %s5718_s22 = sand.u32 1, %s9172_s24  }
 0x9d1   : > { %s5719_s17 = scalar_lea.sflag [#allocation6], %s5718_s22 }
 0x9d2   : > { %7024 = dma.done.wait (%p6441_p11), %s5719_s17, 16  }
 0x9d3   : > { %7026 = vsyncadd (%p6441_p11), %s5719_s17, 4294967280  ;;  %p34_p0 = scmp.ge.s32.totalorder %s7260_s27, 4   ;;  %s9174_s18 = smov %s7033_s19 }
 0x9d4   : > { %s9175_s19 = smov %s7037_s20  ;;  %s9176_s20 = smov %s7271_s11 }
 0x9d5   : > { %s9177_s21 = smov %s7260_s27  ;;  %36 = sbr.rel (!%p34_p0) target bundleno = 20 (0x14), region = 225 }
 0x9da   :  { %5724 = vsyncpa [#allocation5], 1 }
 0x9db   :  { %5726 = vsyncpa [#allocation5 + $0x1], 1 }
 0x9dc   :  { %5727 = vsyncpa [#allocation8], 1 }
 0x9dd   :  { %5728 = vsyncpa [#allocation11], 1 }
 0x9de   :  { %5729 = vsyncpa [#allocation14], 1 }
 0x9df   :  { %5730 = vsyncpa [#allocation17], 1 }
 0x9e0   :  { %5731 = vsyncpa [#allocation20], 1 }
 0x9e1   :  { %5732 = vsyncpa [#allocation23], 1 }
 0x9e2   :  { %5733 = vsyncpa [#allocation6], 1 }
 0x9e3   :  { %5735 = vsyncpa [#allocation6 + $0x1], 1 }

</bundles_post_ra>
